<compile_context>
chip_gen: v7x
topology: tpu7x:2x2x1
jax: 0.10.0
libtpu: 0.0.40
codegen_flags: <defaults>
</compile_context>

<pallas_src>
import functools

import jax
import jax.numpy as jnp
from jax.experimental import pallas as pl
from jax.experimental.pallas import tpu as pltpu

BN_EPS = 1e-5  # nn.BatchNorm3d default


def _get_divisible_by(num, divisor):
    ret = int(num)
    if divisor > 0 and num % divisor != 0:
        ret = int(round(num / divisor) * divisor)
        if ret < 0.9 * num:
            ret += divisor
    return ret


# ---------------------------------------------------------------------------
# Fused kernel: pw + dw + tw + pwl + residual, one sample per grid step.
# ---------------------------------------------------------------------------
def _fused_irf2dp1_kernel(*refs, use_res):
    if use_res:
        (x_ref, xres_ref, wpw_ref, bpw_ref, wdw_ref, bdw_ref,
         wtw_ref, btw_ref, wpwl_ref, bpwl_ref, o_ref, pad_ref) = refs
    else:
        (x_ref, wpw_ref, bpw_ref, wdw_ref, bdw_ref,
         wtw_ref, btw_ref, wpwl_ref, bpwl_ref, o_ref, pad_ref) = refs
        xres_ref = None

    _, T, H, W, Cin = x_ref.shape
    mid = wpw_ref.shape[1]
    Cout = o_ref.shape[1]
    HW = H * W
    M = T * HW

    # ---- pw: 1x1x1 conv (BN folded into wpw) + ReLU; one matmul, M = T*H*W ----
    x2d = x_ref[...].reshape(M, Cin)
    y = jnp.dot(x2d.astype(jnp.bfloat16), wpw_ref[...],
                preferred_element_type=jnp.float32)                   # (M, mid)
    y = jnp.maximum(y + bpw_ref[...], 0.0)
    y = y.reshape(T, H, W, mid)

    # ---- dw: depthwise (1,3,3), pad (0,1,1) (BN folded) + ReLU ----
    # Zero-padded VMEM scratch volume.  Interior lives at rows 1..H and
    # sublane-aligned columns 8..W+7; taps read rows 0..H+1, cols 7..W+8.
    # Only the halo that is actually read gets zeroed (interior is fully
    # overwritten every step).
    pad_ref[:, 0:1, :, :] = jnp.zeros((T, 1, W + 16, mid), jnp.float32)
    pad_ref[:, H + 1:H + 2, :, :] = jnp.zeros((T, 1, W + 16, mid), jnp.float32)
    pad_ref[:, :, 0:8, :] = jnp.zeros((T, H + 2, 8, mid), jnp.float32)
    pad_ref[:, :, W + 8:W + 16, :] = jnp.zeros((T, H + 2, 8, mid), jnp.float32)
    pad_ref[:, 1:H + 1, 8:W + 8, :] = y

    # Load the 9 taps once and build broadcast shapes outside the unrolled loop.
    w_dw = wdw_ref[...]                                               # (9, mid) f32
    taps = [w_dw[k:k + 1, :].reshape(1, 1, 1, mid) for k in range(9)]
    acc = pad_ref[:, 0:H, 7:7 + W, :] * taps[0]                       # kh=0, kw=0
    for k in range(1, 9):
        kh, kw = divmod(k, 3)
        acc = acc + pad_ref[:, kh:kh + H, kw + 7:kw + 7 + W, :] * taps[k]
    u = jnp.maximum(acc + bdw_ref[...].reshape(1, 1, 1, mid), 0.0)    # (T,H,W,mid)

    # ---- tw: temporal (3,1,1) conv (BN folded) + ReLU as ONE K=3*mid matmul ----
    # LHS per frame t is [u(t-1) | u(t) | u(t+1)] with zero-frame temporal
    # padding; weight was flattened to (3*mid, mid) in the wrapper with the
    # matching tap order (d=0 -> t-1, d=1 -> t, d=2 -> t+1).
    u3 = u.reshape(T, HW, mid)
    zf = jnp.zeros((1, HW, mid), jnp.float32)
    if T > 1:
        u_prev = jnp.concatenate([zf, u3[:T - 1]], axis=0)
        u_next = jnp.concatenate([u3[1:], zf], axis=0)
    else:
        u_prev = zf
        u_next = zf
    lhs = jnp.concatenate([u_prev, u3, u_next], axis=-1)              # (T,HW,3*mid)
    lhs = lhs.reshape(M, 3 * mid).astype(jnp.bfloat16)
    v = jnp.dot(lhs, wtw_ref[...], preferred_element_type=jnp.float32)  # (M, mid)
    v = jnp.maximum(v + btw_ref[...], 0.0)

    # ---- pwl: 1x1x1 conv (BN folded), no ReLU; computed as Wpwl @ v^T so the
    # result is channel-major (Cout, M) -> lane-dense NCDHW-flat store. ----
    z = jax.lax.dot_general(
        wpwl_ref[...], v.astype(jnp.bfloat16),
        dimension_numbers=(((1,), (1,)), ((), ())),
        preferred_element_type=jnp.float32)                           # (Cout, M)
    z = z + bpwl_ref[...]                                             # (Cout, 1)

    if use_res:
        z = z + xres_ref[...].reshape(Cin, M).astype(jnp.float32)

    o_ref[...] = z.reshape(1, Cout, M).astype(o_ref.dtype)


def irf2dp1_block(x_ncdhw, params):
    N, Cin, T, H, W = x_ncdhw.shape
    wpw = params["pw_w"]      # (mid, Cin)
    wdw = params["dw_w"]      # (mid, 3, 3)
    wtw = params["tw_w"]      # (mid, mid, 3)
    wpwl = params["pwl_w"]    # (Cout, mid)
    mid = wpw.shape[0]
    Cout = wpwl.shape[0]
    M = T * H * W
    use_res = Cin == Cout     # stride == 1, stride_temporal == 1 (defaults)

    def fold(prefix):
        g = params[prefix + "_gamma"]
        b = params[prefix + "_beta"]
        m = params[prefix + "_mean"]
        v = params[prefix + "_var"]
        s = g * jax.lax.rsqrt(v + BN_EPS)
        return s, b - m * s

    s_pw, b_pw = fold("pw_bn")
    s_dw, b_dw = fold("dw_bn")
    s_tw, b_tw = fold("tw_bn")
    s_pwl, b_pwl = fold("pwl_bn")

    # Fold BN scales into the conv weights.  MXU operands in bf16 (accumulation
    # stays f32 via preferred_element_type); VPU-path taps & biases stay f32.
    wpw_t = (wpw * s_pw[:, None]).T.astype(jnp.bfloat16)                  # (Cin, mid)
    b_pw2 = b_pw.reshape(1, mid).astype(jnp.float32)
    wdw_t = jnp.transpose(wdw * s_dw[:, None, None],
                          (1, 2, 0)).reshape(9, mid).astype(jnp.float32)  # (9, mid)
    b_dw2 = b_dw.reshape(1, mid).astype(jnp.float32)
    # Temporal taps flattened to (3*mid, mid): row block d applies to frame
    # t + d - 1 (matches the in-kernel [u_prev | u | u_next] concat order).
    wtw_t = jnp.transpose(wtw * s_tw[:, None, None],
                          (2, 1, 0)).reshape(3 * mid, mid).astype(jnp.bfloat16)
    b_tw2 = b_tw.reshape(1, mid).astype(jnp.float32)
    wpwl_t = (wpwl * s_pwl[:, None]).astype(jnp.bfloat16)                 # (Cout, mid)
    b_pwl2 = b_pwl.reshape(Cout, 1).astype(jnp.float32)

    # Channels-last view of x for the pw/dw path (one small layout conversion).
    x_cl = jnp.transpose(x_ncdhw, (0, 2, 3, 4, 1))                        # (N,T,H,W,Cin)

    in_specs = [pl.BlockSpec((1, T, H, W, Cin), lambda n: (n, 0, 0, 0, 0))]
    inputs = [x_cl]
    if use_res:
        # Residual in native NCDHW layout (free reshape, lane-dense block).
        x_res = x_ncdhw.reshape(N, Cin, M)
        in_specs.append(pl.BlockSpec((1, Cin, M), lambda n: (n, 0, 0)))
        inputs.append(x_res)
    in_specs += [
        pl.BlockSpec((Cin, mid), lambda n: (0, 0)),
        pl.BlockSpec((1, mid), lambda n: (0, 0)),
        pl.BlockSpec((9, mid), lambda n: (0, 0)),
        pl.BlockSpec((1, mid), lambda n: (0, 0)),
        pl.BlockSpec((3 * mid, mid), lambda n: (0, 0)),
        pl.BlockSpec((1, mid), lambda n: (0, 0)),
        pl.BlockSpec((Cout, mid), lambda n: (0, 0)),
        pl.BlockSpec((Cout, 1), lambda n: (0, 0)),
    ]
    inputs += [wpw_t, b_pw2, wdw_t, b_dw2, wtw_t, b_tw2, wpwl_t, b_pwl2]

    out_cf = pl.pallas_call(
        functools.partial(_fused_irf2dp1_kernel, use_res=use_res),
        out_shape=jax.ShapeDtypeStruct((N, Cout, M), x_ncdhw.dtype),
        grid=(N,),
        in_specs=in_specs,
        out_specs=pl.BlockSpec((1, Cout, M), lambda n: (n, 0, 0)),
        scratch_shapes=[pltpu.VMEM((T, H + 2, W + 16, mid), jnp.float32)],
        compiler_params=pltpu.CompilerParams(
            dimension_semantics=("parallel",),
            # Explicit budget (>= what a whole-sample block needs at typical
            # shapes, and <= v7x's 64 MiB physical VMEM).
            vmem_limit_bytes=64 * 1024 * 1024),
    )(*inputs)

    # Output is already NCDHW-flat; reshape is free (no post-transpose).
    return out_cf.reshape(N, Cout, T, H, W)


# ---------------------------------------------------------------------------
# Plain-JAX reference mirroring the PyTorch module (inference-mode BN).
# ---------------------------------------------------------------------------
def reference(x, params):
    dn = ("NCDHW", "OIDHW", "NCDHW")
    prec = jax.lax.Precision.HIGHEST
    Cin = x.shape[1]
    mid = params["pw_w"].shape[0]
    Cout = params["pwl_w"].shape[0]

    def bn(y, prefix):
        sh = (1, -1, 1, 1, 1)
        g = params[prefix + "_gamma"].reshape(sh)
        b = params[prefix + "_beta"].reshape(sh)
        m = params[prefix + "_mean"].reshape(sh)
        v = params[prefix + "_var"].reshape(sh)
        return (y - m) / jnp.sqrt(v + BN_EPS) * g + b

    # pw
    w = params["pw_w"].reshape(mid, Cin, 1, 1, 1)
    y = jax.lax.conv_general_dilated(x, w, (1, 1, 1), ((0, 0), (0, 0), (0, 0)),
                                     dimension_numbers=dn, precision=prec)
    y = jnp.maximum(bn(y, "pw_bn"), 0.0)
    # dw (depthwise 1x3x3)
    w = params["dw_w"].reshape(mid, 1, 1, 3, 3)
    y = jax.lax.conv_general_dilated(y, w, (1, 1, 1), ((0, 0), (1, 1), (1, 1)),
                                     dimension_numbers=dn,
                                     feature_group_count=mid, precision=prec)
    y = jnp.maximum(bn(y, "dw_bn"), 0.0)
    # tw (temporal 3x1x1, full channel mixing)
    w = params["tw_w"].reshape(mid, mid, 3, 1, 1)
    y = jax.lax.conv_general_dilated(y, w, (1, 1, 1), ((1, 1), (0, 0), (0, 0)),
                                     dimension_numbers=dn, precision=prec)
    y = jnp.maximum(bn(y, "tw_bn"), 0.0)
    # pwl (no ReLU)
    w = params["pwl_w"].reshape(Cout, mid, 1, 1, 1)
    y = jax.lax.conv_general_dilated(y, w, (1, 1, 1), ((0, 0), (0, 0), (0, 0)),
                                     dimension_numbers=dn, precision=prec)
    y = bn(y, "pwl_bn")
    if Cin == Cout:
        y = y + x
    return y


if __name__ == "__main__":
    N, Cin, Cout, T, H, W = 2, 8, 8, 4, 8, 8
    expansion, width_divisor = 6, 8
    mid = _get_divisible_by(Cin * expansion, width_divisor)  # 48

    key = jax.random.PRNGKey(0)
    ks = jax.random.split(key, 10)
    x = jax.random.normal(ks[0], (N, Cin, T, H, W), dtype=jnp.float32)

    params = {
        "pw_w": 0.1 * jax.random.normal(ks[1], (mid, Cin), jnp.float32),
        "dw_w": 0.1 * jax.random.normal(ks[2], (mid, 3, 3), jnp.float32),
        "tw_w": 0.1 * jax.random.normal(ks[3], (mid, mid, 3), jnp.float32),
        "pwl_w": 0.1 * jax.random.normal(ks[4], (Cout, mid), jnp.float32),
    }
    for i, (name, C) in enumerate(
            [("pw_bn", mid), ("dw_bn", mid), ("tw_bn", mid), ("pwl_bn", Cout)]):
        k1, k2, k3, k4 = jax.random.split(ks[5 + i], 4)
        params[name + "_gamma"] = 1.0 + 0.05 * jax.random.normal(k1, (C,), jnp.float32)
        params[name + "_beta"] = 0.05 * jax.random.normal(k2, (C,), jnp.float32)
        params[name + "_mean"] = 0.05 * jax.random.normal(k3, (C,), jnp.float32)
        params[name + "_var"] = 0.5 + jnp.abs(jax.random.normal(k4, (C,), jnp.float32))

    out = irf2dp1_block(x, params)
    out = jax.block_until_ready(out)

    ref = reference(x, params)
    assert out.shape == ref.shape, (out.shape, ref.shape)
    max_err = float(jnp.max(jnp.abs(out - ref)))
    # bf16 matmul operands (f32 accumulation): tolerance loosened vs pure-f32.
    assert jnp.allclose(out, ref, atol=2e-2, rtol=2e-2), max_err
    print("KERNEL_OK")
</pallas_src>

<mosaic_0001>
module attributes {stable_mosaic.version = 11 : i64} {
  func.func @_fused_irf2dp1_kernel(%arg0: i32, %arg1: memref<1x4x8x8x8xf32, #tpu.memory_space<vmem>>, %arg2: memref<1x8x256xf32, #tpu.memory_space<vmem>>, %arg3: memref<8x48xbf16, #tpu.memory_space<vmem>>, %arg4: memref<1x48xf32, #tpu.memory_space<vmem>>, %arg5: memref<9x48xf32, #tpu.memory_space<vmem>>, %arg6: memref<1x48xf32, #tpu.memory_space<vmem>>, %arg7: memref<144x48xbf16, #tpu.memory_space<vmem>>, %arg8: memref<1x48xf32, #tpu.memory_space<vmem>>, %arg9: memref<8x48xbf16, #tpu.memory_space<vmem>>, %arg10: memref<8x1xf32, #tpu.memory_space<vmem>>, %arg11: memref<1x8x256xf32, #tpu.memory_space<vmem>>, %arg12: memref<4x10x24x48xf32, #tpu.memory_space<vmem>>) attributes {dimension_semantics = [#tpu.dimension_semantics<parallel>], iteration_bounds = array<i64: 2>, scalar_prefetch = 0 : i64, scratch_operands = 1 : i64, tpu.core_type = #tpu.core_type<tc>, window_params = [{transform_indices = @transform_0, window_bounds = array<i64: 1, 4, 8, 8, 8>}, {transform_indices = @transform_1, window_bounds = array<i64: 1, 8, 256>}, {pipeline_mode = #tpu.pipeline_mode<synchronous>, transform_indices = @transform_2, window_bounds = array<i64: 8, 48>}, {pipeline_mode = #tpu.pipeline_mode<synchronous>, transform_indices = @transform_3, window_bounds = array<i64: 1, 48>}, {pipeline_mode = #tpu.pipeline_mode<synchronous>, transform_indices = @transform_4, window_bounds = array<i64: 9, 48>}, {pipeline_mode = #tpu.pipeline_mode<synchronous>, transform_indices = @transform_5, window_bounds = array<i64: 1, 48>}, {pipeline_mode = #tpu.pipeline_mode<synchronous>, transform_indices = @transform_6, window_bounds = array<i64: 144, 48>}, {pipeline_mode = #tpu.pipeline_mode<synchronous>, transform_indices = @transform_7, window_bounds = array<i64: 1, 48>}, {pipeline_mode = #tpu.pipeline_mode<synchronous>, transform_indices = @transform_8, window_bounds = array<i64: 8, 48>}, {pipeline_mode = #tpu.pipeline_mode<synchronous>, transform_indices = @transform_9, window_bounds = array<i64: 8, 1>}, {transform_indices = @transform_10, window_bounds = array<i64: 1, 8, 256>}]} {
    %c0 = arith.constant 0 : index
    %c0_0 = arith.constant 0 : index
    %c0_1 = arith.constant 0 : index
    %c0_2 = arith.constant 0 : index
    %c0_3 = arith.constant 0 : index
    %0 = vector.load %arg1[%c0, %c0_0, %c0_1, %c0_2, %c0_3] : memref<1x4x8x8x8xf32, #tpu.memory_space<vmem>>, vector<1x4x8x8x8xf32>
    %1 = vector.shape_cast %0 : vector<1x4x8x8x8xf32> to vector<256x8xf32>
    %2 = arith.truncf %1 : vector<256x8xf32> to vector<256x8xbf16>
    %c0_4 = arith.constant 0 : index
    %c0_5 = arith.constant 0 : index
    %3 = vector.load %arg3[%c0_4, %c0_5] : memref<8x48xbf16, #tpu.memory_space<vmem>>, vector<8x48xbf16>
    %cst = arith.constant dense<0.000000e+00> : vector<256x48xf32>
    %4 = tpu.matmul %2, %3, %cst {dimension_numbers = #tpu.dot_dimension_numbers<[1], [0], [0], [1], [0, 0, 1, 1], [], []>} : vector<256x8xbf16>, vector<8x48xbf16>, vector<256x48xf32> -> vector<256x48xf32>
    %c0_6 = arith.constant 0 : index
    %c0_7 = arith.constant 0 : index
    %5 = vector.load %arg4[%c0_6, %c0_7] : memref<1x48xf32, #tpu.memory_space<vmem>>, vector<1x48xf32>
    %6 = vector.broadcast %5 : vector<1x48xf32> to vector<256x48xf32>
    %7 = arith.addf %4, %6 : vector<256x48xf32>
    %cst_8 = arith.constant 0.000000e+00 : f32
    %8 = vector.broadcast %cst_8 : f32 to vector<256x48xf32>
    %9 = arith.maximumf %7, %8 : vector<256x48xf32>
    %10 = vector.shape_cast %9 : vector<256x48xf32> to vector<4x8x8x48xf32>
    %cst_9 = arith.constant 0.000000e+00 : f32
    %11 = vector.broadcast %cst_9 : f32 to vector<4x1x24x48xf32>
    %c0_10 = arith.constant 0 : index
    %c0_11 = arith.constant 0 : index
    %c0_12 = arith.constant 0 : index
    %c0_13 = arith.constant 0 : index
    %12 = vector.load %arg12[%c0_10, %c0_11, %c0_12, %c0_13] : memref<4x10x24x48xf32, #tpu.memory_space<vmem>>, vector<4x1x24x48xf32>
    tpu.vector_store %arg12[%c0_10, %c0_11, %c0_12, %c0_13], %11 {strides = array<i32>} : memref<4x10x24x48xf32, #tpu.memory_space<vmem>>, vector<4x1x24x48xf32>,
    %cst_14 = arith.constant 0.000000e+00 : f32
    %13 = vector.broadcast %cst_14 : f32 to vector<4x1x24x48xf32>
    %c0_15 = arith.constant 0 : index
    %c9 = arith.constant 9 : index
    %c0_16 = arith.constant 0 : index
    %c0_17 = arith.constant 0 : index
    %14 = vector.load %arg12[%c0_15, %c9, %c0_16, %c0_17] : memref<4x10x24x48xf32, #tpu.memory_space<vmem>>, vector<4x1x24x48xf32>
    tpu.vector_store %arg12[%c0_15, %c9, %c0_16, %c0_17], %13 {strides = array<i32>} : memref<4x10x24x48xf32, #tpu.memory_space<vmem>>, vector<4x1x24x48xf32>,
    %cst_18 = arith.constant 0.000000e+00 : f32
    %15 = vector.broadcast %cst_18 : f32 to vector<4x10x8x48xf32>
    %c0_19 = arith.constant 0 : index
    %c0_20 = arith.constant 0 : index
    %c0_21 = arith.constant 0 : index
    %c0_22 = arith.constant 0 : index
    %16 = vector.load %arg12[%c0_19, %c0_20, %c0_21, %c0_22] : memref<4x10x24x48xf32, #tpu.memory_space<vmem>>, vector<4x10x8x48xf32>
    tpu.vector_store %arg12[%c0_19, %c0_20, %c0_21, %c0_22], %15 {strides = array<i32>} : memref<4x10x24x48xf32, #tpu.memory_space<vmem>>, vector<4x10x8x48xf32>,
    %cst_23 = arith.constant 0.000000e+00 : f32
    %17 = vector.broadcast %cst_23 : f32 to vector<4x10x8x48xf32>
    %c0_24 = arith.constant 0 : index
    %c0_25 = arith.constant 0 : index
    %c16 = arith.constant 16 : index
    %c0_26 = arith.constant 0 : index
    %18 = vector.load %arg12[%c0_24, %c0_25, %c16, %c0_26] : memref<4x10x24x48xf32, #tpu.memory_space<vmem>>, vector<4x10x8x48xf32>
    tpu.vector_store %arg12[%c0_24, %c0_25, %c16, %c0_26], %17 {strides = array<i32>} : memref<4x10x24x48xf32, #tpu.memory_space<vmem>>, vector<4x10x8x48xf32>,
    %c0_27 = arith.constant 0 : index
    %c1 = arith.constant 1 : index
    %c8 = arith.constant 8 : index
    %c0_28 = arith.constant 0 : index
    %19 = vector.load %arg12[%c0_27, %c1, %c8, %c0_28] : memref<4x10x24x48xf32, #tpu.memory_space<vmem>>, vector<4x8x8x48xf32>
    tpu.vector_store %arg12[%c0_27, %c1, %c8, %c0_28], %10 {strides = array<i32>} : memref<4x10x24x48xf32, #tpu.memory_space<vmem>>, vector<4x8x8x48xf32>,
    %c0_29 = arith.constant 0 : index
    %c0_30 = arith.constant 0 : index
    %20 = vector.load %arg5[%c0_29, %c0_30] : memref<9x48xf32, #tpu.memory_space<vmem>>, vector<9x48xf32>
    %21 = vector.extract_strided_slice %20 {offsets = [0, 0], sizes = [1, 48], strides = [1, 1]} : vector<9x48xf32> to vector<1x48xf32>
    %22 = vector.shape_cast %21 : vector<1x48xf32> to vector<1x1x1x48xf32>
    %23 = vector.extract_strided_slice %20 {offsets = [1, 0], sizes = [1, 48], strides = [1, 1]} : vector<9x48xf32> to vector<1x48xf32>
    %24 = vector.shape_cast %23 : vector<1x48xf32> to vector<1x1x1x48xf32>
    %25 = vector.extract_strided_slice %20 {offsets = [2, 0], sizes = [1, 48], strides = [1, 1]} : vector<9x48xf32> to vector<1x48xf32>
    %26 = vector.shape_cast %25 : vector<1x48xf32> to vector<1x1x1x48xf32>
    %27 = vector.extract_strided_slice %20 {offsets = [3, 0], sizes = [1, 48], strides = [1, 1]} : vector<9x48xf32> to vector<1x48xf32>
    %28 = vector.shape_cast %27 : vector<1x48xf32> to vector<1x1x1x48xf32>
    %29 = vector.extract_strided_slice %20 {offsets = [4, 0], sizes = [1, 48], strides = [1, 1]} : vector<9x48xf32> to vector<1x48xf32>
    %30 = vector.shape_cast %29 : vector<1x48xf32> to vector<1x1x1x48xf32>
    %31 = vector.extract_strided_slice %20 {offsets = [5, 0], sizes = [1, 48], strides = [1, 1]} : vector<9x48xf32> to vector<1x48xf32>
    %32 = vector.shape_cast %31 : vector<1x48xf32> to vector<1x1x1x48xf32>
    %33 = vector.extract_strided_slice %20 {offsets = [6, 0], sizes = [1, 48], strides = [1, 1]} : vector<9x48xf32> to vector<1x48xf32>
    %34 = vector.shape_cast %33 : vector<1x48xf32> to vector<1x1x1x48xf32>
    %35 = vector.extract_strided_slice %20 {offsets = [7, 0], sizes = [1, 48], strides = [1, 1]} : vector<9x48xf32> to vector<1x48xf32>
    %36 = vector.shape_cast %35 : vector<1x48xf32> to vector<1x1x1x48xf32>
    %37 = vector.extract_strided_slice %20 {offsets = [8, 0], sizes = [1, 48], strides = [1, 1]} : vector<9x48xf32> to vector<1x48xf32>
    %38 = vector.shape_cast %37 : vector<1x48xf32> to vector<1x1x1x48xf32>
    %c0_31 = arith.constant 0 : index
    %c0_32 = arith.constant 0 : index
    %c7 = arith.constant 7 : index
    %c0_33 = arith.constant 0 : index
    %39 = vector.load %arg12[%c0_31, %c0_32, %c7, %c0_33] : memref<4x10x24x48xf32, #tpu.memory_space<vmem>>, vector<4x8x8x48xf32>
    %40 = vector.broadcast %22 : vector<1x1x1x48xf32> to vector<4x8x8x48xf32>
    %41 = arith.mulf %39, %40 : vector<4x8x8x48xf32>
    %c0_34 = arith.constant 0 : index
    %c0_35 = arith.constant 0 : index
    %c8_36 = arith.constant 8 : index
    %c0_37 = arith.constant 0 : index
    %42 = vector.load %arg12[%c0_34, %c0_35, %c8_36, %c0_37] : memref<4x10x24x48xf32, #tpu.memory_space<vmem>>, vector<4x8x8x48xf32>
    %43 = vector.broadcast %24 : vector<1x1x1x48xf32> to vector<4x8x8x48xf32>
    %44 = arith.mulf %42, %43 : vector<4x8x8x48xf32>
    %45 = arith.addf %41, %44 : vector<4x8x8x48xf32>
    %c0_38 = arith.constant 0 : index
    %c0_39 = arith.constant 0 : index
    %c9_40 = arith.constant 9 : index
    %c0_41 = arith.constant 0 : index
    %46 = vector.load %arg12[%c0_38, %c0_39, %c9_40, %c0_41] : memref<4x10x24x48xf32, #tpu.memory_space<vmem>>, vector<4x8x8x48xf32>
    %47 = vector.broadcast %26 : vector<1x1x1x48xf32> to vector<4x8x8x48xf32>
    %48 = arith.mulf %46, %47 : vector<4x8x8x48xf32>
    %49 = arith.addf %45, %48 : vector<4x8x8x48xf32>
    %c0_42 = arith.constant 0 : index
    %c1_43 = arith.constant 1 : index
    %c7_44 = arith.constant 7 : index
    %c0_45 = arith.constant 0 : index
    %50 = vector.load %arg12[%c0_42, %c1_43, %c7_44, %c0_45] : memref<4x10x24x48xf32, #tpu.memory_space<vmem>>, vector<4x8x8x48xf32>
    %51 = vector.broadcast %28 : vector<1x1x1x48xf32> to vector<4x8x8x48xf32>
    %52 = arith.mulf %50, %51 : vector<4x8x8x48xf32>
    %53 = arith.addf %49, %52 : vector<4x8x8x48xf32>
    %c0_46 = arith.constant 0 : index
    %c1_47 = arith.constant 1 : index
    %c8_48 = arith.constant 8 : index
    %c0_49 = arith.constant 0 : index
    %54 = vector.load %arg12[%c0_46, %c1_47, %c8_48, %c0_49] : memref<4x10x24x48xf32, #tpu.memory_space<vmem>>, vector<4x8x8x48xf32>
    %55 = vector.broadcast %30 : vector<1x1x1x48xf32> to vector<4x8x8x48xf32>
    %56 = arith.mulf %54, %55 : vector<4x8x8x48xf32>
    %57 = arith.addf %53, %56 : vector<4x8x8x48xf32>
    %c0_50 = arith.constant 0 : index
    %c1_51 = arith.constant 1 : index
    %c9_52 = arith.constant 9 : index
    %c0_53 = arith.constant 0 : index
    %58 = vector.load %arg12[%c0_50, %c1_51, %c9_52, %c0_53] : memref<4x10x24x48xf32, #tpu.memory_space<vmem>>, vector<4x8x8x48xf32>
    %59 = vector.broadcast %32 : vector<1x1x1x48xf32> to vector<4x8x8x48xf32>
    %60 = arith.mulf %58, %59 : vector<4x8x8x48xf32>
    %61 = arith.addf %57, %60 : vector<4x8x8x48xf32>
    %c0_54 = arith.constant 0 : index
    %c2 = arith.constant 2 : index
    %c7_55 = arith.constant 7 : index
    %c0_56 = arith.constant 0 : index
    %62 = vector.load %arg12[%c0_54, %c2, %c7_55, %c0_56] : memref<4x10x24x48xf32, #tpu.memory_space<vmem>>, vector<4x8x8x48xf32>
    %63 = vector.broadcast %34 : vector<1x1x1x48xf32> to vector<4x8x8x48xf32>
    %64 = arith.mulf %62, %63 : vector<4x8x8x48xf32>
    %65 = arith.addf %61, %64 : vector<4x8x8x48xf32>
    %c0_57 = arith.constant 0 : index
    %c2_58 = arith.constant 2 : index
    %c8_59 = arith.constant 8 : index
    %c0_60 = arith.constant 0 : index
    %66 = vector.load %arg12[%c0_57, %c2_58, %c8_59, %c0_60] : memref<4x10x24x48xf32, #tpu.memory_space<vmem>>, vector<4x8x8x48xf32>
    %67 = vector.broadcast %36 : vector<1x1x1x48xf32> to vector<4x8x8x48xf32>
    %68 = arith.mulf %66, %67 : vector<4x8x8x48xf32>
    %69 = arith.addf %65, %68 : vector<4x8x8x48xf32>
    %c0_61 = arith.constant 0 : index
    %c2_62 = arith.constant 2 : index
    %c9_63 = arith.constant 9 : index
    %c0_64 = arith.constant 0 : index
    %70 = vector.load %arg12[%c0_61, %c2_62, %c9_63, %c0_64] : memref<4x10x24x48xf32, #tpu.memory_space<vmem>>, vector<4x8x8x48xf32>
    %71 = vector.broadcast %38 : vector<1x1x1x48xf32> to vector<4x8x8x48xf32>
    %72 = arith.mulf %70, %71 : vector<4x8x8x48xf32>
    %73 = arith.addf %69, %72 : vector<4x8x8x48xf32>
    %c0_65 = arith.constant 0 : index
    %c0_66 = arith.constant 0 : index
    %74 = vector.load %arg6[%c0_65, %c0_66] : memref<1x48xf32, #tpu.memory_space<vmem>>, vector<1x48xf32>
    %75 = vector.shape_cast %74 : vector<1x48xf32> to vector<1x1x1x48xf32>
    %76 = vector.broadcast %75 : vector<1x1x1x48xf32> to vector<4x8x8x48xf32>
    %77 = arith.addf %73, %76 : vector<4x8x8x48xf32>
    %cst_67 = arith.constant 0.000000e+00 : f32
    %78 = vector.broadcast %cst_67 : f32 to vector<4x8x8x48xf32>
    %79 = arith.maximumf %77, %78 : vector<4x8x8x48xf32>
    %80 = vector.shape_cast %79 : vector<4x8x8x48xf32> to vector<4x64x48xf32>
    %cst_68 = arith.constant 0.000000e+00 : f32
    %81 = vector.broadcast %cst_68 : f32 to vector<1x64x48xf32>
    %82 = vector.extract_strided_slice %80 {offsets = [0, 0, 0], sizes = [3, 64, 48], strides = [1, 1, 1]} : vector<4x64x48xf32> to vector<3x64x48xf32>
    %83 = tpu.concatenate %81, %82 in 0 : vector<1x64x48xf32>, vector<3x64x48xf32> -> vector<4x64x48xf32>
    %84 = vector.extract_strided_slice %80 {offsets = [1, 0, 0], sizes = [3, 64, 48], strides = [1, 1, 1]} : vector<4x64x48xf32> to vector<3x64x48xf32>
    %85 = tpu.concatenate %84, %81 in 0 : vector<3x64x48xf32>, vector<1x64x48xf32> -> vector<4x64x48xf32>
    %86 = tpu.concatenate %83, %80, %85 in 2 : vector<4x64x48xf32>, vector<4x64x48xf32>, vector<4x64x48xf32> -> vector<4x64x144xf32>
    %87 = vector.shape_cast %86 : vector<4x64x144xf32> to vector<256x144xf32>
    %88 = arith.truncf %87 : vector<256x144xf32> to vector<256x144xbf16>
    %c0_69 = arith.constant 0 : index
    %c0_70 = arith.constant 0 : index
    %89 = vector.load %arg7[%c0_69, %c0_70] : memref<144x48xbf16, #tpu.memory_space<vmem>>, vector<144x48xbf16>
    %cst_71 = arith.constant dense<0.000000e+00> : vector<256x48xf32>
    %90 = tpu.matmul %88, %89, %cst_71 {dimension_numbers = #tpu.dot_dimension_numbers<[1], [0], [0], [1], [0, 0, 1, 1], [], []>} : vector<256x144xbf16>, vector<144x48xbf16>, vector<256x48xf32> -> vector<256x48xf32>
    %c0_72 = arith.constant 0 : index
    %c0_73 = arith.constant 0 : index
    %91 = vector.load %arg8[%c0_72, %c0_73] : memref<1x48xf32, #tpu.memory_space<vmem>>, vector<1x48xf32>
    %92 = vector.broadcast %91 : vector<1x48xf32> to vector<256x48xf32>
    %93 = arith.addf %90, %92 : vector<256x48xf32>
    %cst_74 = arith.constant 0.000000e+00 : f32
    %94 = vector.broadcast %cst_74 : f32 to vector<256x48xf32>
    %95 = arith.maximumf %93, %94 : vector<256x48xf32>
    %c0_75 = arith.constant 0 : index
    %c0_76 = arith.constant 0 : index
    %96 = vector.load %arg9[%c0_75, %c0_76] : memref<8x48xbf16, #tpu.memory_space<vmem>>, vector<8x48xbf16>
    %97 = arith.truncf %95 : vector<256x48xf32> to vector<256x48xbf16>
    %cst_77 = arith.constant dense<0.000000e+00> : vector<8x256xf32>
    %98 = tpu.matmul %96, %97, %cst_77 {dimension_numbers = #tpu.dot_dimension_numbers<[1], [1], [0], [0], [0, 0, 1, 0], [], []>} : vector<8x48xbf16>, vector<256x48xbf16>, vector<8x256xf32> -> vector<8x256xf32>
    %c0_78 = arith.constant 0 : index
    %c0_79 = arith.constant 0 : index
    %99 = vector.load %arg10[%c0_78, %c0_79] : memref<8x1xf32, #tpu.memory_space<vmem>>, vector<8x1xf32>
    %100 = vector.broadcast %99 : vector<8x1xf32> to vector<8x256xf32>
    %101 = arith.addf %98, %100 : vector<8x256xf32>
    %c0_80 = arith.constant 0 : index
    %c0_81 = arith.constant 0 : index
    %c0_82 = arith.constant 0 : index
    %102 = vector.load %arg2[%c0_80, %c0_81, %c0_82] : memref<1x8x256xf32, #tpu.memory_space<vmem>>, vector<1x8x256xf32>
    %103 = vector.shape_cast %102 : vector<1x8x256xf32> to vector<8x256xf32>
    %104 = arith.addf %101, %103 : vector<8x256xf32>
    %105 = vector.shape_cast %104 : vector<8x256xf32> to vector<1x8x256xf32>
    %c0_83 = arith.constant 0 : index
    %c0_84 = arith.constant 0 : index
    %c0_85 = arith.constant 0 : index
    %106 = vector.load %arg11[%c0_83, %c0_84, %c0_85] : memref<1x8x256xf32, #tpu.memory_space<vmem>>, vector<1x8x256xf32>
    tpu.vector_store %arg11[%c0_83, %c0_84, %c0_85], %105 {strides = array<i32>} : memref<1x8x256xf32, #tpu.memory_space<vmem>>, vector<1x8x256xf32>,
    return
  }
  func.func @transform_0(%arg0: i32) -> (i32, i32, i32, i32, i32) {
    %c0_i32 = arith.constant 0 : i32
    %c0_i32_0 = arith.constant 0 : i32
    %c0_i32_1 = arith.constant 0 : i32
    %c0_i32_2 = arith.constant 0 : i32
    %c0_i32_3 = arith.constant 0 : i32
    return %arg0, %c0_i32, %c0_i32_0, %c0_i32_1, %c0_i32_2 : i32, i32, i32, i32, i32
  }
  func.func @transform_1(%arg0: i32) -> (i32, i32, i32) {
    %c0_i32 = arith.constant 0 : i32
    %c0_i32_0 = arith.constant 0 : i32
    %c0_i32_1 = arith.constant 0 : i32
    return %arg0, %c0_i32, %c0_i32_0 : i32, i32, i32
  }
  func.func @transform_2(%arg0: i32) -> (i32, i32) {
    %c0_i32 = arith.constant 0 : i32
    %c0_i32_0 = arith.constant 0 : i32
    %c0_i32_1 = arith.constant 0 : i32
    return %c0_i32, %c0_i32_0 : i32, i32
  }
  func.func @transform_3(%arg0: i32) -> (i32, i32) {
    %c0_i32 = arith.constant 0 : i32
    %c0_i32_0 = arith.constant 0 : i32
    %c0_i32_1 = arith.constant 0 : i32
    return %c0_i32, %c0_i32_0 : i32, i32
  }
  func.func @transform_4(%arg0: i32) -> (i32, i32) {
    %c0_i32 = arith.constant 0 : i32
    %c0_i32_0 = arith.constant 0 : i32
    %c0_i32_1 = arith.constant 0 : i32
    return %c0_i32, %c0_i32_0 : i32, i32
  }
  func.func @transform_5(%arg0: i32) -> (i32, i32) {
    %c0_i32 = arith.constant 0 : i32
    %c0_i32_0 = arith.constant 0 : i32
    %c0_i32_1 = arith.constant 0 : i32
    return %c0_i32, %c0_i32_0 : i32, i32
  }
  func.func @transform_6(%arg0: i32) -> (i32, i32) {
    %c0_i32 = arith.constant 0 : i32
    %c0_i32_0 = arith.constant 0 : i32
    %c0_i32_1 = arith.constant 0 : i32
    return %c0_i32, %c0_i32_0 : i32, i32
  }
  func.func @transform_7(%arg0: i32) -> (i32, i32) {
    %c0_i32 = arith.constant 0 : i32
    %c0_i32_0 = arith.constant 0 : i32
    %c0_i32_1 = arith.constant 0 : i32
    return %c0_i32, %c0_i32_0 : i32, i32
  }
  func.func @transform_8(%arg0: i32) -> (i32, i32) {
    %c0_i32 = arith.constant 0 : i32
    %c0_i32_0 = arith.constant 0 : i32
    %c0_i32_1 = arith.constant 0 : i32
    return %c0_i32, %c0_i32_0 : i32, i32
  }
  func.func @transform_9(%arg0: i32) -> (i32, i32) {
    %c0_i32 = arith.constant 0 : i32
    %c0_i32_0 = arith.constant 0 : i32
    %c0_i32_1 = arith.constant 0 : i32
    return %c0_i32, %c0_i32_0 : i32, i32
  }
  func.func @transform_10(%arg0: i32) -> (i32, i32, i32) {
    %c0_i32 = arith.constant 0 : i32
    %c0_i32_0 = arith.constant 0 : i32
    %c0_i32_1 = arith.constant 0 : i32
    return %arg0, %c0_i32, %c0_i32_0 : i32, i32, i32
  }
}

</mosaic_0001>

<bundles_post_ra>
// kernel: tpu_custom_call.1
= control target key start
LH: loop header
LB: loop body
LE: loop exit
PB: predicated region body
PF: predicated region fallthrough
CT: control target
= control target key end

     0   :  { %s5413_s0 = inlined_call_operand.hbm [shape: f32[2,4,8,8,8], index: 0, kind: input, shape index: {}]   ;;  %s5414_s1 = inlined_call_operand.hbm [shape: f32[2,8,256], index: 1, kind: input, shape index: {}]   ;;  %s5415_s2 = inlined_call_operand.hbm [shape: bf16[8,48], index: 2, kind: input, shape index: {}]   ;;  %s5416_s3 = inlined_call_operand.hbm [shape: f32[1,48], index: 3, kind: input, shape index: {}]   ;;  %s5417_s4 = inlined_call_operand.hbm [shape: f32[9,48], index: 4, kind: input, shape index: {}]   ;;  %s5418_s5 = inlined_call_operand.hbm [shape: f32[1,48], index: 5, kind: input, shape index: {}]   ;;  %s5419_s6 = inlined_call_operand.hbm [shape: bf16[144,48], index: 6, kind: input, shape index: {}]   ;;  %s5420_s7 = inlined_call_operand.hbm [shape: f32[1,48], index: 7, kind: input, shape index: {}]   ;;  %s5421_s8 = inlined_call_operand.hbm [shape: bf16[8,48], index: 8, kind: input, shape index: {}]   ;;  %s5422_s9 = inlined_call_operand.hbm [shape: f32[8,1], index: 9, kind: input, shape index: {}]   ;;  %s5423_s10 = inlined_call_operand.hbm [shape: f32[2,8,256], index: 10, kind: output, shape index: {}]  }
   0x1   :  { %5460 = sst [smem:[#allocation37_spill]] %s5413_s0 }
   0x2   :  { %5461 = sst [smem:[#allocation38_spill]] %s5415_s2 }
   0x3   :  { %5462 = sst [smem:[#allocation39_spill]] %s5416_s3 }
   0x4   :  { %5463 = sst [smem:[#allocation40_spill]] %s5417_s4 }
   0x5   :  { %5464 = sst [smem:[#allocation41_spill]] %s5418_s5 }
   0x6   :  { %5465 = sst [smem:[#allocation42_spill]] %s5419_s6 }
   0x7   :  { %5466 = sst [smem:[#allocation43_spill]] %s5420_s7 }
   0x8   :  { %5467 = sst [smem:[#allocation44_spill]] %s5423_s10 }
   0x9   :  { %15 = vsyncpa [#allocation4], 0 }
   0xa   :  { %17 = vsyncpa [#allocation4 + $0x1], 0 }
   0xb   :  { %18 = vsyncpa [#allocation7], 0 }
   0xc   :  { %20 = vsyncpa [#allocation7 + $0x1], 0 }
   0xd   :  { %21 = vsyncpa [#allocation10], 0 }
   0xe   :  { %22 = vsyncpa [#allocation13], 0 }
   0xf   :  { %23 = vsyncpa [#allocation16], 0 }
  0x10   :  { %24 = vsyncpa [#allocation19], 0 }
  0x11   :  { %25 = vsyncpa [#allocation5], 0 }
  0x12   :  { %27 = vsyncpa [#allocation5 + $0x1], 0  ;;  %s3723_s13 = smov 0   ;;  %s3725_s14 = smov 0  }
  0x13   :  { %s3727_s15 = smov 0   ;;  %s3729_s16 = smov 0  }
  0x14 LB: > { %s3649_s17 = smov [#allocation8]   ;;  %s3744_s19 = sadd.s32 4294967295, %s3647_s16   ;;  %s3647_s16 = sphi %s3729_s16, %s5543_s16   ;;  %s3643_s15 = sphi %s3727_s15, %s5542_s15   ;;  %s3639_s14 = sphi %s3725_s14, %s5541_s14   ;;  %s3635_s13 = sphi %s3723_s13, %s5540_s13  }
  0x15   : > { %s297_s18 = sshll.u32 %s3649_s17, 4  ;;  %p2820_p0 = scmp.ge.s32.totalorder %s3647_s16, 1  ;;  %s3749_s18 = int_to_ptr.vmem [resolvable:$true] %s297_s18 }
  0x16   : > { %p5425_p1 = scmp.eq.s32.totalorder %s3744_s19, 0  ;;  %p284_p2 = scmp.lt.s32.totalorder %s3647_s16, 3 }
  0x17   : > { %s3650_s21 = smov [#allocation9]   ;;  %s3651_s23 = smov [#allocation12]  }
  0x18   : > { %p3751_p3 = pnand %p2820_p0, %p284_p2  ;;  %s308_s22 = sshll.u32 %s3650_s21, 4  ;;  %s3758_s22 = int_to_ptr.vmem [resolvable:$true] %s308_s22 }
  0x19   : > { %s332_s24 = sshll.u32 %s3651_s23, 4  ;;  %s3652_s26 = smov [#allocation15]   ;;  %s3766_s24 = int_to_ptr.vmem [resolvable:$true] %s332_s24 }
  0x1a   : > { %s5468_s20 = scalar_select %p3751_p3, 1, 0 }
  0x1b   : > { %p3018_p5 = pneg %p3751_p3  ;;  %s3768_s27 = sshll.u32 %s3652_s26, 4  ;;  %s357_s27 = int_to_ptr.vmem [resolvable:$true] %s3768_s27 }
  0x1c   : > { %s5470_s2 = sld [smem:[#allocation38_spill]] }
  0x1d   : > { %p3762_p6 = pnand %p3018_p5, %p5425_p1 }
  0x1f   : > { %p3778_p8 = pneg %p3762_p6 }
  0x22   : > { %s3273_s30 = scalar_lea.hbm %s5470_s2, 64 }
  0x23   : > { %p3274_p7 = scmp.ne.s32.totalorder %s5470_s2, %s3273_s30  ;;  %p3280_p11 = scmp.lt.u32.totalorder %s3273_s30, %s5470_s2 }
  0x25   : > { %p3276_p9 = pnand %p3778_p8, %p3274_p7 }
  0x27   : > { %p3277_p10 = pneg %p3276_p9 }
  0x29   : > { %p3282_p12 = pnand %p3280_p11, %p3277_p10 }
  0x2b   : > { %3285 = shalt.err (!%p3282_p12)
}
  0x2c   : > { %s3286_s26 = scalar_lea.vmem %s3749_s18, 64  ;;  %p3294_p5 = scmp.lt.s32.totalorder %s3749_s18, %s3749_s18 }
  0x2d   : > { %p3287_p13 = scmp.ne.s32.totalorder %s3749_s18, %s3286_s26  ;;  %p3295_p4 = scmp.lt.s32.totalorder %s3286_s26, %s3286_s26 }
  0x2f   : > { %p3289_p0 = pnand %p3287_p13, %p3778_p8  ;;  %p3296_p7 = por %p3295_p4, %p3294_p5 }
  0x31   : > { %p3290_p2 = pneg %p3289_p0 }
  0x33   : > { %p3297_p9 = pnand %p3296_p7, %p3290_p2 }
  0x35   : > { %3300 = shalt.err (!%p3297_p9)
}
  0x36   : > { %3021 = dma.hbm_to_vmem [thread:$0]  (!%p3762_p6), %s5470_s2, 64, %s3749_s18, [#allocation7]  }
  0x37   : > { %s5472_s3 = sld [smem:[#allocation39_spill]] }
  0x3d   : > { %s3301_s12 = scalar_lea.hbm %s5472_s3, 16 }
  0x3e   : > { %p3302_p10 = scmp.ne.s32.totalorder %s5472_s3, %s3301_s12  ;;  %p3308_p12 = scmp.lt.u32.totalorder %s3301_s12, %s5472_s3 }
  0x40   : > { %p3304_p4 = pnand %p3302_p10, %p3778_p8 }
  0x42   : > { %p3305_p11 = pneg %p3304_p4 }
  0x44   : > { %p3310_p13 = pnand %p3308_p12, %p3305_p11 }
  0x46   : > { %3313 = shalt.err (!%p3310_p13)
}
  0x47   : > { %s3314_s18 = scalar_lea.vmem %s3758_s22, 16  ;;  %s3321_s28 = scalar_lea.vmem %s3758_s22, 32 }
  0x48   : > { %p3315_p0 = scmp.ne.s32.totalorder %s3758_s22, %s3314_s18  ;;  %p3322_p7 = scmp.lt.s32.totalorder %s3758_s22, %s3758_s22 }
  0x49   : > { %p3323_p9 = scmp.lt.s32.totalorder %s3321_s28, %s3314_s18 }
  0x4a   : > { %p3317_p2 = pnand %p3315_p0, %p3778_p8 }
  0x4b   : > { %p3324_p10 = por %p3323_p9, %p3322_p7 }
  0x4c   : > { %p3318_p5 = pneg %p3317_p2 }
  0x4e   : > { %p3325_p4 = pnand %p3324_p10, %p3318_p5 }
  0x50   : > { %3328 = shalt.err (!%p3325_p4)
}
  0x51   : > { %3024 = dma.hbm_to_vmem [thread:$0]  (!%p3762_p6), %s5472_s3, 16, %s3758_s22, [#allocation10]  }
  0x52   : > { %s5473_s5 = sld [smem:[#allocation41_spill]] }
  0x58   : > { %s3329_s12 = scalar_lea.hbm %s5473_s5, 16 }
  0x59   : > { %p3330_p11 = scmp.ne.s32.totalorder %s5473_s5, %s3329_s12  ;;  %p3336_p0 = scmp.lt.u32.totalorder %s3329_s12, %s5473_s5 }
  0x5b   : > { %p3332_p12 = pnand %p3330_p11, %p3778_p8 }
  0x5d   : > { %p3333_p13 = pneg %p3332_p12 }
  0x5f   : > { %p3338_p2 = pnand %p3336_p0, %p3333_p13 }
  0x61   : > { %3341 = shalt.err (!%p3338_p2)
}
  0x62   : > { %s3342_s22 = scalar_lea.vmem %s3766_s24, 16  ;;  %s3349_s28 = scalar_lea.vmem %s3766_s24, 32 }
  0x63   : > { %p3343_p5 = scmp.ne.s32.totalorder %s3766_s24, %s3342_s22  ;;  %p3350_p10 = scmp.lt.s32.totalorder %s3766_s24, %s3766_s24 }
  0x64   : > { %p3351_p4 = scmp.lt.s32.totalorder %s3349_s28, %s3342_s22 }
  0x65   : > { %p3345_p7 = pnand %p3343_p5, %p3778_p8 }
  0x66   : > { %p3352_p11 = por %p3351_p4, %p3350_p10 }
  0x67   : > { %p3346_p9 = pneg %p3345_p7 }
  0x69   : > { %p3353_p12 = pnand %p3352_p11, %p3346_p9 }
  0x6b   : > { %3356 = shalt.err (!%p3353_p12)
}
  0x6c   : > { %3030 = dma.hbm_to_vmem [thread:$0]  (!%p3762_p6), %s5473_s5, 16, %s3766_s24, [#allocation13]  }
  0x6d   : > { %s3653_s30 = smov [#allocation11]   ;;  %s5474_s7 = sld [smem:[#allocation43_spill]] }
  0x6e   : > { %s318_s11 = sshll.u32 %s3653_s30, 4  ;;  %s319_s11 = int_to_ptr.vmem [resolvable:$true] %s318_s11 }
  0x73   : > { %s3357_s23 = scalar_lea.hbm %s5474_s7, 16 }
  0x74   : > { %p3358_p13 = scmp.ne.s32.totalorder %s5474_s7, %s3357_s23  ;;  %p3364_p5 = scmp.lt.u32.totalorder %s3357_s23, %s5474_s7 }
  0x76   : > { %p3360_p0 = pnand %p3358_p13, %p3778_p8 }
  0x78   : > { %p3361_p2 = pneg %p3360_p0 }
  0x7a   : > { %p3366_p7 = pnand %p3364_p5, %p3361_p2 }
  0x7c   : > { %3369 = shalt.err (!%p3366_p7)
}
  0x7d   : > { %s3370_s24 = scalar_lea.vmem %s357_s27, 16  ;;  %s3377_s10 = scalar_lea.vmem %s357_s27, 32 }
  0x7e   : > { %p3371_p9 = scmp.ne.s32.totalorder %s357_s27, %s3370_s24  ;;  %p3378_p11 = scmp.lt.s32.totalorder %s357_s27, %s357_s27 }
  0x7f   : > { %p3379_p12 = scmp.lt.s32.totalorder %s3377_s10, %s3370_s24 }
  0x80   : > { %p3373_p10 = pnand %p3371_p9, %p3778_p8 }
  0x81   : > { %p3380_p1 = por %p3379_p12, %p3378_p11 }
  0x82   : > { %p3374_p4 = pneg %p3373_p10 }
  0x84   : > { %p3381_p3 = pnand %p3380_p1, %p3374_p4 }
  0x86   : > { %3384 = shalt.err (!%p3381_p3)
}
  0x87   : > { %3036 = dma.hbm_to_vmem [thread:$0]  (!%p3762_p6), %s5474_s7, 16, %s357_s27, [#allocation16]  }
  0x88   : > { %s5475_s4 = sld [smem:[#allocation40_spill]] }
  0x8e   : > { %s3385_s23 = scalar_lea.hbm %s5475_s4, 256 }
  0x8f   : > { %p3386_p13 = scmp.ne.s32.totalorder %s5475_s4, %s3385_s23  ;;  %p3392_p3 = scmp.lt.u32.totalorder %s3385_s23, %s5475_s4 }
  0x91   : > { %p3388_p0 = pnand %p3386_p13, %p3778_p8 }
  0x93   : > { %p3389_p1 = pneg %p3388_p0 }
  0x95   : > { %p3394_p2 = pnand %p3392_p3, %p3389_p1 }
  0x97   : > { %3397 = shalt.err (!%p3394_p2)
}
  0x98   : > { %s3398_s24 = scalar_lea.vmem %s319_s11, 256  ;;  %p3406_p10 = scmp.lt.s32.totalorder %s319_s11, %s319_s11 }
  0x99   : > { %p3399_p5 = scmp.ne.s32.totalorder %s319_s11, %s3398_s24  ;;  %p3407_p4 = scmp.lt.s32.totalorder %s3398_s24, %s3398_s24 }
  0x9b   : > { %p3401_p7 = pnand %p3399_p5, %p3778_p8  ;;  %p3408_p11 = por %p3407_p4, %p3406_p10 }
  0x9d   : > { %p3402_p9 = pneg %p3401_p7 }
  0x9f   : > { %p3409_p12 = pnand %p3408_p11, %p3402_p9 }
  0xa1   : > { %3412 = shalt.err (!%p3409_p12)
}
  0xa2   : > { %s5427_s27 = smov 128   ;;  %s5428_s10 = smov 8  }
  0xa3   : > { %3027 = dma.hbm_to_vmem [thread:$0]  (!%p3762_p6), %s5475_s4, 256, %s319_s11, [#allocation10], %s5427_s27, %s5427_s27, %s5428_s10  }
  0xa4   : > { %s3656_s12 = smov [#allocation14]   ;;  %s5476_s6 = sld [smem:[#allocation42_spill]] }
  0xa5   : > { %s342_s21 = sshll.u32 %s3656_s12, 4  ;;  %s343_s21 = int_to_ptr.vmem [resolvable:$true] %s342_s21 }
  0xaa   : > { %s3413_s18 = scalar_lea.hbm %s5476_s6, 1152 }
  0xab   : > { %p3414_p13 = scmp.ne.s32.totalorder %s5476_s6, %s3413_s18  ;;  %p3420_p3 = scmp.lt.u32.totalorder %s3413_s18, %s5476_s6 }
  0xad   : > { %p3416_p0 = pnand %p3414_p13, %p3778_p8 }
  0xaf   : > { %p3417_p1 = pneg %p3416_p0 }
  0xb1   : > { %p3422_p2 = pnand %p3420_p3, %p3417_p1 }
  0xb3   : > { %3425 = shalt.err (!%p3422_p2)
}
  0xb4   : > { %s3426_s11 = scalar_lea.vmem %s343_s21, 1152  ;;  %p3434_p10 = scmp.lt.s32.totalorder %s343_s21, %s343_s21 }
  0xb5   : > { %p3427_p5 = scmp.ne.s32.totalorder %s343_s21, %s3426_s11  ;;  %p3435_p4 = scmp.lt.s32.totalorder %s3426_s11, %s3426_s11 }
  0xb7   : > { %p3429_p7 = pnand %p3427_p5, %p3778_p8  ;;  %p3436_p11 = por %p3435_p4, %p3434_p10 }
  0xb9   : > { %p3430_p9 = pneg %p3429_p7 }
  0xbb   : > { %p3437_p12 = pnand %p3436_p11, %p3430_p9 }
  0xbd   : > { %3440 = shalt.err (!%p3437_p12)
}
  0xbe   : > { %s3657_s29 = smov 64   ;;  %s3658_s30 = smov 4  }
  0xbf   : > { %3033 = dma.hbm_to_vmem [thread:$0]  (!%p3762_p6), %s5476_s6, 1152, %s343_s21, [#allocation13], %s3657_s29, %s3657_s29, %s3658_s30  }
  0xc0   : > { %s3659_s23 = smov [#allocation17]   ;;  %s3660_s18 = smov [#allocation18]  }
  0xc1   : > { %s367_s26 = sshll.u32 %s3659_s23, 4  ;;  %s378_s22 = sshll.u32 %s3660_s18, 4  ;;  %s368_s26 = int_to_ptr.vmem [resolvable:$true] %s367_s26  ;;  %s3905_s22 = int_to_ptr.vmem [resolvable:$true] %s378_s22 }
  0xc2   : > { %s3441_s11 = scalar_lea.hbm %s5421_s8, 64 }
  0xc3   : > { %p3442_p13 = scmp.ne.s32.totalorder %s5421_s8, %s3441_s11  ;;  %p3448_p3 = scmp.lt.u32.totalorder %s3441_s11, %s5421_s8 }
  0xc5   : > { %p3444_p0 = pnand %p3442_p13, %p3778_p8 }
  0xc7   : > { %p3445_p1 = pneg %p3444_p0 }
  0xc9   : > { %p3450_p2 = pnand %p3448_p3, %p3445_p1 }
  0xcb   : > { %3453 = shalt.err (!%p3450_p2)
}
  0xcc   : > { %s3454_s29 = scalar_lea.vmem %s368_s26, 64  ;;  %p3462_p10 = scmp.lt.s32.totalorder %s368_s26, %s368_s26 }
  0xcd   : > { %p3455_p5 = scmp.ne.s32.totalorder %s368_s26, %s3454_s29  ;;  %p3463_p4 = scmp.lt.s32.totalorder %s3454_s29, %s3454_s29 }
  0xcf   : > { %p3457_p7 = pnand %p3455_p5, %p3778_p8  ;;  %p3464_p11 = por %p3463_p4, %p3462_p10 }
  0xd1   : > { %p3458_p9 = pneg %p3457_p7 }
  0xd3   : > { %p3465_p12 = pnand %p3464_p11, %p3458_p9 }
  0xd5   : > { %3468 = shalt.err (!%p3465_p12)
}
  0xd6   : > { %3039 = dma.hbm_to_vmem [thread:$0]  (!%p3762_p6), %s5421_s8, 64, %s368_s26, [#allocation16]  }
  0xd7   : > { %s3469_s23 = scalar_lea.hbm %s5422_s9, 128 }
  0xd8   : > { %p3470_p13 = scmp.ne.s32.totalorder %s5422_s9, %s3469_s23  ;;  %p3476_p3 = scmp.lt.u32.totalorder %s3469_s23, %s5422_s9 }
  0xda   : > { %p3472_p0 = pnand %p3470_p13, %p3778_p8 }
  0xdc   : > { %p3473_p1 = pneg %p3472_p0 }
  0xde   : > { %p3478_p2 = pnand %p3476_p3, %p3473_p1 }
  0xe0   : > { %3481 = shalt.err (!%p3478_p2)
}
  0xe1   : > { %s3482_s26 = scalar_lea.vmem %s3905_s22, 128  ;;  %p3490_p10 = scmp.lt.s32.totalorder %s3905_s22, %s3905_s22 }
  0xe2   : > { %p3483_p5 = scmp.ne.s32.totalorder %s3905_s22, %s3482_s26  ;;  %p3491_p4 = scmp.lt.s32.totalorder %s3482_s26, %s3482_s26 }
  0xe4   : > { %p3485_p7 = pnand %p3483_p5, %p3778_p8  ;;  %p3492_p11 = por %p3491_p4, %p3490_p10 }
  0xe6   : > { %p3486_p9 = pneg %p3485_p7 }
  0xe8   : > { %p3493_p12 = pnand %p3492_p11, %p3486_p9 }
  0xea   : > { %3496 = shalt.err (!%p3493_p12)
}
  0xeb   : > { %3042 = dma.hbm_to_vmem [thread:$0]  (!%p3762_p6), %s5422_s9, 128, %s3905_s22, [#allocation19]  }
  0xec   : > { %s2819_s25 = sadd.s32 4294967294, %s3647_s16   ;;  %s3950_s17 = sadd.s32 1, %s3647_s16  }
  0xed   : > { %s37_s29 = ssub.s32 %s3647_s16, %s3950_s17  ;;  %s40_s27 = sadd.s32 1, %s3643_s15 }
  0xee   : > { %p38_p8 = scmp.eq.s32.totalorder %s37_s29, 0  ;;  %p47_p13 = scmp.ne.s32.totalorder %s3643_s15, %s3639_s14 }
  0xef   : > { %p48_p0 = scmp.eq.s32.totalorder %s3647_s16, 0  ;;  %p53_p1 = scmp.ne.s32.totalorder %s3639_s14, %s3635_s13 }
  0xf0   : > { %s3961_s10 = scalar_select %p38_p8, %s3643_s15, %s40_s27  }
  0xf1   : > { %p3963_p3 = por %p48_p0, %p47_p13  ;;  %p5478_p2 = scmp.eq.s32.totalorder %s3744_s19, 0 }
  0xf2   : > { %p271_p5 = scmp.eq.s32.totalorder %s3744_s19, 1  ;;  %p277_p7 = scmp.eq.s32.totalorder %s2819_s25, 1 }
  0xf3   : > { %p3969_p6 = por %p5478_p2, %p53_p1  ;;  %p3062_p9 = scmp.lt.s32.totalorder %s3647_s16, 2 }
  0xf4   : > { %s3976_s12 = sand.u32 1, %s3643_s15   ;;  %p3978_p10 = por %p271_p5, %p47_p13 }
  0xf5   : > { %s5479_s22 = scalar_select %p3969_p6, 1, 0 }
  0xf6   : > { %s5480_s23 = scalar_select %p3978_p10, 1, 0 }
  0xf7   : > { %p3982_p4 = por %p277_p7, %p53_p1  ;;  %s2830_s28 = sshll.u32 %s3976_s12, 8 }
  0xf8   : > { %s2899_s24 = sshll.u32 %s3647_s16, 12  ;;  %s5482_s0 = sld [smem:[#allocation37_spill]] }
  0xf9   : > { %s5481_s18 = scalar_select %p3982_p4, 1, 0 }
  0xfa   : > { %s393_s21 = scalar_lea.vmem [#allocation3], %s2830_s28  ;;  %p3997_p11 = pnand %p3062_p9, %p3963_p3 }
  0xfb   : > { %s400_s25 = sshll.u32 %s393_s21, 4  ;;  %s2833_s3 = sshll.u32 %s3976_s12, 4  ;;  %s3993_s25 = int_to_ptr.vmem [resolvable:$true] %s400_s25 }
  0xfc   : > { %s390_s11 = scalar_lea.sflag [#allocation4], %s3976_s12  ;;  %p3499_p8 = pneg %p3997_p11 }
  0xfe   : > { %s3991_s2 = scalar_lea.hbm %s5482_s0, %s2899_s24  ;;  %s3502_s30 = scalar_lea.hbm %s5482_s0, 8192 }
  0xff   : > { %s3497_s24 = scalar_lea.hbm %s3991_s2, 4096  ;;  %p3503_p1 = scmp.lt.u32.totalorder %s3991_s2, %s5482_s0 }
 0x100   : > { %p3498_p12 = scmp.ne.s32.totalorder %s3991_s2, %s3497_s24  ;;  %p3504_p3 = scmp.lt.u32.totalorder %s3502_s30, %s3497_s24 }
 0x101   : > { %p3506_p5 = scmp.lt.u32.totalorder %s3497_s24, %s3991_s2 }
 0x102   : > { %p3500_p13 = pnand %p3499_p8, %p3498_p12  ;;  %p3505_p2 = por %p3504_p3, %p3503_p1 }
 0x104   : > { %p3501_p0 = pneg %p3500_p13  ;;  %p3507_p7 = por %p3506_p5, %p3505_p2 }
 0x106   : > { %p3508_p9 = pnand %p3507_p7, %p3501_p0 }
 0x108   : > { %3511 = shalt.err (!%p3508_p9)
}
 0x109   : > { %s3512_s27 = scalar_lea.vmem %s3993_s25, 4096  ;;  %s3661_s28 = smov [#allocation3]  }
 0x10a   : > { %p3513_p12 = scmp.ne.s32.totalorder %s3993_s25, %s3512_s27  ;;  %s3517_s26 = sshll.u32 %s3661_s28, 4  ;;  %s3518_s26 = int_to_ptr.vmem [resolvable:$false] %s3517_s26 }
 0x10b   : > { %s3519_s4 = scalar_lea.vmem %s3518_s26, 8192  ;;  %p3520_p10 = scmp.lt.s32.totalorder %s3993_s25, %s3518_s26 }
 0x10c   : > { %p3515_p13 = pnand %p3513_p12, %p3499_p8  ;;  %p3521_p1 = scmp.lt.s32.totalorder %s3519_s4, %s3512_s27 }
 0x10e   : > { %p3516_p4 = pneg %p3515_p13  ;;  %p3522_p3 = por %p3521_p1, %p3520_p10 }
 0x110   : > { %p3523_p2 = pnand %p3522_p3, %p3516_p4 }
 0x112   : > { %3526 = shalt.err (!%p3523_p2)
}
 0x113   : > { %s5484_s24 = smov 8   ;;  %s5485_s30 = smov 128  }
 0x114   : > { %3046 = dma.hbm_to_vmem [thread:$0]  (!%p3997_p11), %s3991_s2, 4096, %s3993_s25, %s390_s11, %s5485_s30, %s5485_s30, %s5484_s24  }
 0x115   : > { %s2900_s21 = sshll.u32 %s3647_s16, 8  ;;  %s414_s4 = scalar_lea.vmem [#allocation6], %s2833_s3 }
 0x116   : > { %s4038_s26 = scalar_lea.hbm %s5414_s1, %s2900_s21  ;;  %s422_s0 = sshll.u32 %s414_s4, 4  ;;  %s423_s0 = int_to_ptr.vmem [resolvable:$true] %s422_s0 }
 0x117   : > { %s5486_s5 = sand.u32 1, %s3647_s16   ;;  %s3527_s7 = scalar_lea.hbm %s4038_s26, 256 }
 0x118   : > { %s411_s6 = scalar_lea.sflag [#allocation7], %s5486_s5  ;;  %p3528_p10 = scmp.ne.s32.totalorder %s4038_s26, %s3527_s7 }
 0x119   : > { %s3532_s11 = scalar_lea.hbm %s5414_s1, 512  ;;  %p3533_p5 = scmp.lt.u32.totalorder %s4038_s26, %s5414_s1 }
 0x11a   : > { %p3530_p4 = pnand %p3528_p10, %p3499_p8  ;;  %p3534_p7 = scmp.lt.u32.totalorder %s3532_s11, %s3527_s7 }
 0x11b   : > { %p3536_p12 = scmp.lt.u32.totalorder %s3527_s7, %s4038_s26 }
 0x11c   : > { %p3531_p0 = pneg %p3530_p4  ;;  %p3535_p9 = por %p3534_p7, %p3533_p5 }
 0x11e   : > { %p3537_p13 = por %p3536_p12, %p3535_p9 }
 0x120   : > { %p3538_p1 = pnand %p3537_p13, %p3531_p0 }
 0x122   : > { %3541 = shalt.err (!%p3538_p1)
}
 0x123   : > { %s3542_s3 = scalar_lea.vmem %s423_s0, 256  ;;  %s3662_s5 = smov [#allocation6]  }
 0x124   : > { %p3543_p3 = scmp.ne.s32.totalorder %s423_s0, %s3542_s3  ;;  %s3547_s30 = sshll.u32 %s3662_s5, 4  ;;  %s3548_s30 = int_to_ptr.vmem [resolvable:$false] %s3547_s30 }
 0x125   : > { %s3549_s21 = scalar_lea.vmem %s3548_s30, 512  ;;  %p3550_p4 = scmp.lt.s32.totalorder %s423_s0, %s3548_s30 }
 0x126   : > { %p3545_p2 = pnand %p3543_p3, %p3499_p8  ;;  %p3551_p6 = scmp.lt.s32.totalorder %s3549_s21, %s3542_s3 }
 0x128   : > { %p3546_p10 = pneg %p3545_p2  ;;  %p3552_p5 = por %p3551_p6, %p3550_p4 }
 0x12a   : > { %p3553_p7 = pnand %p3552_p5, %p3546_p10 }
 0x12c   : > { %3556 = shalt.err (!%p3553_p7)
}
 0x12d   : > { %3049 = dma.hbm_to_vmem [thread:$0]  (!%p3997_p11), %s4038_s26, 256, %s423_s0, %s411_s6  }
 0x12e   : > { %p5487_p0 = scmp.ne.s32.totalorder %s5468_s20, 0 }
 0x130   : > { %431 = sbr.rel (%p5487_p0) target bundleno = 1347 (0x543), region = 60 }
 0x137   : > { %s4066_s7 = sand.u32 1, %s3639_s14   ;;  %p5488_p6 = scmp.ne.s32.totalorder %s5479_s22, 0 }
 0x138   : > { %s2837_s28 = sshll.u32 %s4066_s7, 8  ;;  %s434_s27 = scalar_lea.sflag [#allocation4], %s4066_s7 }
 0x139   : > { %s4070_s4 = scalar_lea.vmem [#allocation3], %s2837_s28 }
 0x13a   : > { %3602 = dma.done.wait (%p5488_p6), %s434_s27, 4096  }
 0x13b   : > { %3604 = vsyncadd (%p5488_p6), %s434_s27, 4294963200  ;;  %s442_s0 = sand.u32 1, %s3744_s19   ;;  %s2838_s6 = sshll.u32 %s4066_s7, 4 }
 0x13c   : > { %s443_s20 = scalar_lea.sflag [#allocation7], %s442_s0  ;;  %s4080_s29 = scalar_lea.vmem [#allocation6], %s2838_s6 }
 0x13d   : > { %3606 = dma.done.wait (%p5488_p6), %s443_s20, 256  }
 0x13e   : > { %3608 = vsyncadd (%p5488_p6), %s443_s20, 4294967040  ;;  %p5489_p11 = scmp.eq.s32.totalorder %s3744_s19, 0 }
 0x140   : > { %3610 = dma.done.wait (%p5489_p11), [#allocation7], 64   ;;  %p5490_p8 = pmov %p5489_p11 }
 0x142   : > { %3612 = vsyncadd (%p5490_p8), [#allocation7], 4294967232  ;;  %p5491_p9 = pmov %p5490_p8 }
 0x143   : > { %p5492_p12 = pmov %p5490_p8 }
 0x144   : > { %3614 = dma.done.wait (%p5491_p9), [#allocation10], 272  }
 0x145   : > { %3616 = vsyncadd (%p5492_p12), [#allocation10], 4294967024  ;;  %p5493_p13 = pmov %p5490_p8 }
 0x146   : > { %p5494_p1 = pmov %p5490_p8 }
 0x147   : > { %3618 = dma.done.wait (%p5493_p13), [#allocation13], 1168  }
 0x148   : > { %3620 = vsyncadd (%p5494_p1), [#allocation13], 4294966128  ;;  %p5495_p3 = pmov %p5494_p1 }
 0x149   : > { %p5496_p2 = pmov %p5494_p1 }
 0x14a   : > { %3622 = dma.done.wait (%p5495_p3), [#allocation16], 80  }
 0x14b   : > { %3624 = vsyncadd (%p5496_p2), [#allocation16], 4294967216  ;;  %p5497_p10 = pmov %p5494_p1 }
 0x14c   : > { %p5498_p4 = pmov %p5494_p1 }
 0x14d   : > { %3626 = dma.done.wait (%p5497_p10), [#allocation19], 128  }
 0x14e   : > { %3628 = vsyncadd (%p5498_p4), [#allocation19], 4294967168  ;;  %vm626_vm0 = vcmask 1043456   ;;  %v569_v0 = vld [vmem:[#allocation8] sm:$0xf]  ;;  %v522_v2 = vld [vmem:[%s4070_s4 + $0x8] sm:$0xff]  ;;  %v996_v51 = vlaneseq }
 0x14f   : > { %v521_v1 = vld [vmem:[%s4070_s4] sm:$0xff]  ;;  %vm577_vm1 = vcmask 64512   ;;  %2971 = vmatprep.subr.msk.bf16.mxu0 %vm626_vm0, %v569_v0  ;;  %v628_v3 = vsel %vm626_vm0, %v569_v0, 0  ;;  %v523_v5 = vld [vmem:[%s4070_s4 + $0x10] sm:$0xff]  ;;  %v524_v6 = vld [vmem:[%s4070_s4 + $0x18] sm:$0xff]  ;;  %vm823_vm2 = vcmask 392192  }
 0x150   : > { %v553_v4 = vpack.c.bf16 %v522_v2, %v521_v1  ;;  %v525_v7 = vld [vmem:[%s4070_s4 + $0x20] sm:$0xff]  ;;  %2938 = vmatpush3.bf16.msra.mxu0 %v628_v3  ;;  %v554_v8 = vpack.c.bf16 %v524_v6, %v523_v5  ;;  %v526_v9 = vld [vmem:[%s4070_s4 + $0x28] sm:$0xff]  ;;  %v527_v11 = vld [vmem:[%s4070_s4 + $0x30] sm:$0xff]  ;;  %v5437_v50 = vmov 0.0   ;;  %v4362_v52 = vshrl.u32 %v996_v51, 7  ;;  %s3664_s22 = smov 48  }
 0x151   : > { %v555_v10 = vpack.c.bf16 %v526_v9, %v525_v7  ;;  %v528_v12 = vld [vmem:[%s4070_s4 + $0x38] sm:$0xff]  ;;  %v529_v13 = vld [vmem:[%s4070_s4 + $0x40] sm:$0xff]  ;;  %v530_v14 = vld [vmem:[%s4070_s4 + $0x48] sm:$0xff]  ;;  %824 = vst.msk [vmem:[#allocation2] sm:$0xff] %vm823_vm2, %v5437_v50  ;;  %s3665_s26 = smov 96   ;;  %vm2281_vm3 = vcmask 130048  }
 0x152   : > { %2939 = vmatprep.mubr.msk.bf16.mxu0 %vm577_vm1, %v553_v4  ;;  %v556_v15 = vpack.c.bf16 %v528_v12, %v527_v11  ;;  %v557_v16 = vpack.c.bf16 %v530_v14, %v529_v13  ;;  %v531_v17 = vld [vmem:[%s4070_s4 + $0x50] sm:$0xff]  ;;  %v532_v18 = vld [vmem:[%s4070_s4 + $0x58] sm:$0xff]  ;;  %v533_v19 = vld [vmem:[%s4070_s4 + $0x60] sm:$0xff]  ;;  %825 = vst.msk [vmem:[#allocation2 + $0x8] sm:$0xff] %vm823_vm2, %v5437_v50  ;;  %v998_v53 = vsub.s32 0, %v4362_v52  ;;  %v1066_v54 = vsub.s32 1, %v4362_v52 }
 0x153   : > { %2940 = vmatmul.mubr.msk.bf16.vlgmr.msra.gmra.mrb[0].mxu0 %vm577_vm1, %v554_v8  ;;  %v534_v20 = vld [vmem:[%s4070_s4 + $0x68] sm:$0xff]  ;;  %v558_v21 = vpack.c.bf16 %v532_v18, %v531_v17  ;;  %v535_v23 = vld [vmem:[%s4070_s4 + $0x70] sm:$0xff]  ;;  %v536_v24 = vld [vmem:[%s4070_s4 + $0x78] sm:$0xff]  ;;  %826 = vst.msk [vmem:[#allocation2 + $0x10] sm:$0xff] %vm823_vm2, %v5437_v50  ;;  %v1166_v60 = vsub.s32 2, %v4362_v52  ;;  %v1266_v4 = vsub.s32 3, %v4362_v52 }
 0x154   : > { %2943 = vmatprep.mubr.msk.bf16.mxu0 %vm577_vm1, %v555_v10  ;;  %v559_v22 = vpack.c.bf16 %v534_v20, %v533_v19  ;;  %v537_v25 = vld [vmem:[%s4070_s4 + $0x80] sm:$0xff]  ;;  %v538_v26 = vld [vmem:[%s4070_s4 + $0x88] sm:$0xff]  ;;  %v560_v27 = vpack.c.bf16 %v536_v24, %v535_v23  ;;  %v539_v29 = vld [vmem:[%s4070_s4 + $0x90] sm:$0xff]  ;;  %850 = vst.msk [vmem:[#allocation2 + $0x18] sm:$0xff] %vm823_vm2, %v5437_v50  ;;  %v1366_v8 = vsub.s32 4, %v4362_v52  ;;  %v1466_v9 = vsub.s32 5, %v4362_v52 }
 0x155   : > { %v561_v28 = vpack.c.bf16 %v538_v26, %v537_v25  ;;  %v540_v30 = vld [vmem:[%s4070_s4 + $0x98] sm:$0xff]  ;;  %v541_v31 = vld [vmem:[%s4070_s4 + $0xa0] sm:$0xff]  ;;  %v542_v32 = vld [vmem:[%s4070_s4 + $0xa8] sm:$0xff]  ;;  %851 = vst.msk [vmem:[#allocation2 + $0x30] sm:$0xff] %vm823_vm2, %v5437_v50  ;;  %v1667_v17 = vsub.s32 7, %v4362_v52  ;;  %vm2140_vm4 = vcmask 785408  }
 0x156   : > { %v562_v33 = vpack.c.bf16 %v540_v30, %v539_v29  ;;  %v563_v34 = vpack.c.bf16 %v542_v32, %v541_v31  ;;  %v543_v35 = vld [vmem:[%s4070_s4 + $0xb0] sm:$0xff]  ;;  %v544_v36 = vld [vmem:[%s4070_s4 + $0xb8] sm:$0xff]  ;;  %v545_v37 = vld [vmem:[%s4070_s4 + $0xc0] sm:$0xff]  ;;  %852 = vst.msk [vmem:[#allocation2 + $0x48] sm:$0xff] %vm823_vm2, %v5437_v50  ;;  %s2901_s2 = sshll.u32 %s3744_s19, 8  ;;  %s519_s25 = scalar_lea.vmem [#allocation20], %s2838_s6 }
 0x157   : > { %v546_v38 = vld [vmem:[%s4070_s4 + $0xc8] sm:$0xff]  ;;  %v564_v39 = vpack.c.bf16 %v544_v36, %v543_v35  ;;  %v547_v41 = vld [vmem:[%s4070_s4 + $0xd0] sm:$0xff]  ;;  %v548_v42 = vld [vmem:[%s4070_s4 + $0xd8] sm:$0xff]  ;;  %890 = vst.msk [vmem:[#allocation2 + $0x28] sm:$0xff] %vm823_vm2, %v5437_v50  ;;  %s2650_s11 = sshll.u32 %s519_s25, 4  ;;  %s5536_s3 = sld [smem:[#allocation44_spill]]  ;;  %s5371_s11 = int_to_ptr.vmem [resolvable:$true] %s2650_s11 }
 0x158   : > { %v565_v40 = vpack.c.bf16 %v546_v38, %v545_v37  ;;  %v549_v43 = vld [vmem:[%s4070_s4 + $0xe0] sm:$0xff]  ;;  %v550_v44 = vld [vmem:[%s4070_s4 + $0xe8] sm:$0xff]  ;;  %v566_v45 = vpack.c.bf16 %v548_v42, %v547_v41  ;;  %v551_v47 = vld [vmem:[%s4070_s4 + $0xf0] sm:$0xff]  ;;  %891 = vst.msk [vmem:[#allocation2 + $0x40] sm:$0xff] %vm823_vm2, %v5437_v50  ;;  %s2636_s19 = scalar_lea.sflag [#allocation5], %s4066_s7  ;;  %s3557_s30 = scalar_lea.vmem %s5371_s11, 256 }
 0x159   : > { %v567_v46 = vpack.c.bf16 %v550_v44, %v549_v43  ;;  %v552_v48 = vld [vmem:[%s4070_s4 + $0xf8] sm:$0xff]  ;;  %892 = vst.msk [vmem:[#allocation2 + $0x58] sm:$0xff] %vm823_vm2, %v5437_v50  ;;  %827 = vst.msk [vmem:[#allocation2 + $0xf0] sm:$0xff] %vm823_vm2, %v5437_v50  ;;  %v4366_v55 = vld [vmem:[#allocation11] sm:$0xff]  ;;  %p3558_p5 = scmp.ne.s32.totalorder %s5371_s11, %s3557_s30  ;;  %p5537_p7 = scmp.ne.s32.totalorder %s5480_s23, 0 }
 0x15a   : > { %v568_v49 = vpack.c.bf16 %v552_v48, %v551_v47  ;;  %828 = vst.msk [vmem:[#allocation2 + $0xf8] sm:$0xff] %vm823_vm2, %v5437_v50  ;;  %829 = vst.msk [vmem:[#allocation2 + $0x100] sm:$0xff] %vm823_vm2, %v5437_v50  ;;  %v4369_v56 = vrot.slane %v4366_v55, %v998_v53  ;;  %v4372_v57 = vrot.slane %v4366_v55, %v1066_v54  ;;  %v1032_v59 = vld [vmem:[#allocation2 + $0x8] sm:$0xff]  ;;  %v4377_v1 = vld [vmem:[#allocation9] ss:$0 sm:$0xff]  ;;  %s3667_s21 = smov [#allocation20]  }
 0x15b   : > { %2944 = vmatmul.mubr.msk.bf16.gmra.mrb[4].mxu0 %vm577_vm1, %v556_v15  ;;  %830 = vst.msk [vmem:[#allocation2 + $0x1e0] sm:$0xff] %vm823_vm2, %v5437_v50  ;;  %831 = vst.msk [vmem:[#allocation2 + $0x1e8] sm:$0xff] %vm823_vm2, %v5437_v50  ;;  %v4380_v2 = vrot.slane %v4366_v55, %v1166_v60  ;;  %v4401_v37 = vrot.slane %v4366_v55, %v1266_v4  ;;  %v4413_v47 = vrot.slane %v4366_v55, %v1667_v17  ;;  %v4417_v54 = vld [vmem:[#allocation11 + $0x8] ss:$0 sm:$0xff]  ;;  %p3559_p0 = pnand %p3558_p5, %p5537_p7  ;;  %s3561_s28 = sshll.u32 %s3667_s21, 4  ;;  %s3562_s28 = int_to_ptr.vmem [resolvable:$false] %s3561_s28 }
 0x15c   : > { %2947 = vmatprep.mubr.msk.bf16.mxu0 %vm577_vm1, %v557_v16  ;;  %832 = vst.msk [vmem:[#allocation2 + $0x1f0] sm:$0xff] %vm823_vm2, %v5437_v50  ;;  %833 = vst.msk [vmem:[#allocation2 + $0x2d0] sm:$0xff] %vm823_vm2, %v5437_v50  ;;  %v1068_v62 = vmul.f32 %v4372_v57, %v1032_v59  ;;  %v1567_v16 = vsub.s32 6, %v4362_v52  ;;  %v4420_v59 = vrot.slane %v4366_v55, %v1466_v9  ;;  %s3563_s27 = scalar_lea.vmem %s3562_s28, 512  ;;  %p3564_p11 = scmp.lt.s32.totalorder %s5371_s11, %s3562_s28 }
 0x15d   : > { %834 = vst.msk [vmem:[#allocation2 + $0x2d8] sm:$0xff] %vm823_vm2, %v5437_v50  ;;  %835 = vst.msk [vmem:[#allocation2 + $0x2e0] sm:$0xff] %vm823_vm2, %v5437_v50  ;;  %s5369_s5 = scalar_lea.hbm %s5536_s3, %s2901_s2  ;;  %p3560_p6 = pneg %p3559_p0 }
 0x15e   : > { %837 = vst.msk [vmem:[#allocation2 + $0xd8] sm:$0xff] %vm823_vm2, %v5437_v50  ;;  %838 = vst.msk [vmem:[#allocation2 + $0xe0] sm:$0xff] %vm823_vm2, %v5437_v50  ;;  %p3565_p8 = scmp.lt.s32.totalorder %s3563_s27, %s3557_s30 }
 0x15f   : > { %839 = vst.msk [vmem:[#allocation2 + $0xe8] sm:$0xff] %vm823_vm2, %v5437_v50  ;;  %840 = vst.msk [vmem:[#allocation2 + $0x1c8] sm:$0xff] %vm823_vm2, %v5437_v50 }
 0x160   : > { %841 = vst.msk [vmem:[#allocation2 + $0x1d0] sm:$0xff] %vm823_vm2, %v5437_v50  ;;  %842 = vst.msk [vmem:[#allocation2 + $0x1d8] sm:$0xff] %vm823_vm2, %v5437_v50  ;;  %p3566_p9 = por %p3565_p8, %p3564_p11 }
 0x161   : > { %843 = vst.msk [vmem:[#allocation2 + $0x2b8] sm:$0xff] %vm823_vm2, %v5437_v50  ;;  %844 = vst.msk [vmem:[#allocation2 + $0x2c0] sm:$0xff] %vm823_vm2, %v5437_v50  ;;  %v1040_v0 = vld [vmem:[#allocation2 + $0xf8] sm:$0xff] }
 0x162   : > { %845 = vst.msk [vmem:[#allocation2 + $0x2c8] sm:$0xff] %vm823_vm2, %v5437_v50  ;;  %846 = vst.msk [vmem:[#allocation2 + $0x3a8] sm:$0xff] %vm823_vm2, %v5437_v50  ;;  %v1048_v6 = vld [vmem:[#allocation2 + $0x1e8] sm:$0xff]  ;;  %v1076_v11 = vmul.f32 %v4372_v57, %v1040_v0  ;;  %p3567_p12 = pnand %p3566_p9, %p3560_p6 }
 0x163   : > { %2948 = vmatmul.mubr.msk.bf16.gmra.mrb[8].mxu0 %vm577_vm1, %v558_v21  ;;  %847 = vst.msk [vmem:[#allocation2 + $0x3b0] sm:$0xff] %vm823_vm2, %v5437_v50  ;;  %848 = vst.msk [vmem:[#allocation2 + $0x3b8] sm:$0xff] %vm823_vm2, %v5437_v50  ;;  %v1084_v23 = vmul.f32 %v4372_v57, %v1048_v6 }
 0x164   : > { %2951 = vmatprep.mubr.msk.bf16.mxu0 %vm577_vm1, %v559_v22  ;;  %853 = vst.msk [vmem:[#allocation2 + $0x60] sm:$0xff] %vm823_vm2, %v5437_v50  ;;  %854 = vst.msk [vmem:[#allocation2 + $0x78] sm:$0xff] %vm823_vm2, %v5437_v50  ;;  %v1056_v24 = vld [vmem:[#allocation2 + $0x2d8] sm:$0xff] }
 0x165   : > { %855 = vst.msk [vmem:[#allocation2 + $0x90] sm:$0xff] %vm823_vm2, %v5437_v50  ;;  %856 = vst.msk [vmem:[#allocation2 + $0xa8] sm:$0xff] %vm823_vm2, %v5437_v50  ;;  %v1092_v30 = vmul.f32 %v4372_v57, %v1056_v24  ;;  %v1640_v41 = vld [vmem:[#allocation2 + $0xe0] sm:$0xff] }
 0x166   : > { %857 = vst.msk [vmem:[#allocation2 + $0xc0] sm:$0xff] %vm823_vm2, %v5437_v50  ;;  %860 = vst.msk [vmem:[#allocation2 + $0x108] sm:$0xff] %vm823_vm2, %v5437_v50 }
 0x167   : > { %861 = vst.msk [vmem:[#allocation2 + $0x120] sm:$0xff] %vm823_vm2, %v5437_v50  ;;  %862 = vst.msk [vmem:[#allocation2 + $0x138] sm:$0xff] %vm823_vm2, %v5437_v50  ;;  %v1648_v48 = vld [vmem:[#allocation2 + $0x1d0] sm:$0xff] }
 0x168   : > { %863 = vst.msk [vmem:[#allocation2 + $0x150] sm:$0xff] %vm823_vm2, %v5437_v50  ;;  %864 = vst.msk [vmem:[#allocation2 + $0x168] sm:$0xff] %vm823_vm2, %v5437_v50  ;;  %v4439_v9 = vmul.f32 %v4413_v47, %v1648_v48 }
 0x169   : > { %865 = vst.msk [vmem:[#allocation2 + $0x180] sm:$0xff] %vm823_vm2, %v5437_v50  ;;  %866 = vst.msk [vmem:[#allocation2 + $0x198] sm:$0xff] %vm823_vm2, %v5437_v50 }
 0x16a   : > { %867 = vst.msk [vmem:[#allocation2 + $0x1b0] sm:$0xff] %vm823_vm2, %v5437_v50  ;;  %870 = vst.msk [vmem:[#allocation2 + $0x1f8] sm:$0xff] %vm823_vm2, %v5437_v50 }
 0x16b   : > { %2952 = vmatmul.mubr.msk.bf16.gmra.mrb[12].mxu0 %vm577_vm1, %v560_v27  ;;  %871 = vst.msk [vmem:[#allocation2 + $0x210] sm:$0xff] %vm823_vm2, %v5437_v50  ;;  %872 = vst.msk [vmem:[#allocation2 + $0x228] sm:$0xff] %vm823_vm2, %v5437_v50 }
 0x16c   : > { %2955 = vmatprep.mubr.msk.bf16.mxu0 %vm577_vm1, %v561_v28  ;;  %873 = vst.msk [vmem:[#allocation2 + $0x240] sm:$0xff] %vm823_vm2, %v5437_v50  ;;  %874 = vst.msk [vmem:[#allocation2 + $0x258] sm:$0xff] %vm823_vm2, %v5437_v50 }
 0x16d   : > { %875 = vst.msk [vmem:[#allocation2 + $0x270] sm:$0xff] %vm823_vm2, %v5437_v50  ;;  %876 = vst.msk [vmem:[#allocation2 + $0x288] sm:$0xff] %vm823_vm2, %v5437_v50 }
 0x16e   : > { %877 = vst.msk [vmem:[#allocation2 + $0x2a0] sm:$0xff] %vm823_vm2, %v5437_v50  ;;  %880 = vst.msk [vmem:[#allocation2 + $0x2e8] sm:$0xff] %vm823_vm2, %v5437_v50 }
 0x16f   : > { %881 = vst.msk [vmem:[#allocation2 + $0x300] sm:$0xff] %vm823_vm2, %v5437_v50  ;;  %882 = vst.msk [vmem:[#allocation2 + $0x318] sm:$0xff] %vm823_vm2, %v5437_v50 }
 0x170   : > { %883 = vst.msk [vmem:[#allocation2 + $0x330] sm:$0xff] %vm823_vm2, %v5437_v50  ;;  %884 = vst.msk [vmem:[#allocation2 + $0x348] sm:$0xff] %vm823_vm2, %v5437_v50 }
 0x171   : > { %885 = vst.msk [vmem:[#allocation2 + $0x360] sm:$0xff] %vm823_vm2, %v5437_v50  ;;  %886 = vst.msk [vmem:[#allocation2 + $0x378] sm:$0xff] %vm823_vm2, %v5437_v50 }
 0x172   : > { %887 = vst.msk [vmem:[#allocation2 + $0x390] sm:$0xff] %vm823_vm2, %v5437_v50  ;;  %893 = vst.msk [vmem:[#allocation2 + $0x70] sm:$0xff] %vm823_vm2, %v5437_v50 }
 0x173   : > { %2956 = vmatmul.mubr.msk.bf16.gmra.mrb[16].mxu0 %vm577_vm1, %v562_v33  ;;  %894 = vst.msk [vmem:[#allocation2 + $0x88] sm:$0xff] %vm823_vm2, %v5437_v50  ;;  %895 = vst.msk [vmem:[#allocation2 + $0xa0] sm:$0xff] %vm823_vm2, %v5437_v50 }
 0x174   : > { %2959 = vmatprep.mubr.msk.bf16.mxu0 %vm577_vm1, %v563_v34  ;;  %896 = vst.msk [vmem:[#allocation2 + $0xb8] sm:$0xff] %vm823_vm2, %v5437_v50  ;;  %897 = vst.msk [vmem:[#allocation2 + $0xd0] sm:$0xff] %vm823_vm2, %v5437_v50 }
 0x175   : > { %900 = vst.msk [vmem:[#allocation2 + $0x118] sm:$0xff] %vm823_vm2, %v5437_v50  ;;  %901 = vst.msk [vmem:[#allocation2 + $0x130] sm:$0xff] %vm823_vm2, %v5437_v50 }
 0x176   : > { %902 = vst.msk [vmem:[#allocation2 + $0x148] sm:$0xff] %vm823_vm2, %v5437_v50  ;;  %903 = vst.msk [vmem:[#allocation2 + $0x160] sm:$0xff] %vm823_vm2, %v5437_v50 }
 0x177   : > { %904 = vst.msk [vmem:[#allocation2 + $0x178] sm:$0xff] %vm823_vm2, %v5437_v50  ;;  %905 = vst.msk [vmem:[#allocation2 + $0x190] sm:$0xff] %vm823_vm2, %v5437_v50 }
 0x178   : > { %906 = vst.msk [vmem:[#allocation2 + $0x1a8] sm:$0xff] %vm823_vm2, %v5437_v50  ;;  %907 = vst.msk [vmem:[#allocation2 + $0x1c0] sm:$0xff] %vm823_vm2, %v5437_v50 }
 0x179   : > { %910 = vst.msk [vmem:[#allocation2 + $0x208] sm:$0xff] %vm823_vm2, %v5437_v50  ;;  %911 = vst.msk [vmem:[#allocation2 + $0x220] sm:$0xff] %vm823_vm2, %v5437_v50 }
 0x17a   : > { %912 = vst.msk [vmem:[#allocation2 + $0x238] sm:$0xff] %vm823_vm2, %v5437_v50  ;;  %913 = vst.msk [vmem:[#allocation2 + $0x250] sm:$0xff] %vm823_vm2, %v5437_v50 }
 0x17b   : > { %2960 = vmatmul.mubr.msk.bf16.gmra.mrb[20].mxu0 %vm577_vm1, %v564_v39  ;;  %914 = vst.msk [vmem:[#allocation2 + $0x268] sm:$0xff] %vm823_vm2, %v5437_v50  ;;  %915 = vst.msk [vmem:[#allocation2 + $0x280] sm:$0xff] %vm823_vm2, %v5437_v50 }
 0x17c   : > { %2963 = vmatprep.mubr.msk.bf16.mxu0 %vm577_vm1, %v565_v40  ;;  %916 = vst.msk [vmem:[#allocation2 + $0x298] sm:$0xff] %vm823_vm2, %v5437_v50  ;;  %917 = vst.msk [vmem:[#allocation2 + $0x2b0] sm:$0xff] %vm823_vm2, %v5437_v50  ;;  %v4405_v40 = vrot.slane %v4366_v55, %v1567_v16 }
 0x17d   : > { %920 = vst.msk [vmem:[#allocation2 + $0x2f8] sm:$0xff] %vm823_vm2, %v5437_v50  ;;  %921 = vst.msk [vmem:[#allocation2 + $0x310] sm:$0xff] %vm823_vm2, %v5437_v50 }
 0x17e   : > { %922 = vst.msk [vmem:[#allocation2 + $0x328] sm:$0xff] %vm823_vm2, %v5437_v50  ;;  %923 = vst.msk [vmem:[#allocation2 + $0x340] sm:$0xff] %vm823_vm2, %v5437_v50 }
 0x17f   : > { %924 = vst.msk [vmem:[#allocation2 + $0x358] sm:$0xff] %vm823_vm2, %v5437_v50  ;;  %925 = vst.msk [vmem:[#allocation2 + $0x370] sm:$0xff] %vm823_vm2, %v5437_v50 }
 0x180   : > { %926 = vst.msk [vmem:[#allocation2 + $0x388] sm:$0xff] %vm823_vm2, %v5437_v50  ;;  %927 = vst.msk [vmem:[#allocation2 + $0x3a0] sm:$0xff] %vm823_vm2, %v5437_v50 }
 0x181   : > { %849 = vst.msk [vmem:[#allocation2] sm:$0xff] %vm823_vm2, %v5437_v50  ;;  %889 = vst.msk [vmem:[#allocation2 + $0x10] sm:$0xff] %vm823_vm2, %v5437_v50 }
 0x182   : > { %858 = vst.msk [vmem:[#allocation2 + $0xd8] sm:$0xff] %vm823_vm2, %v5437_v50  ;;  %859 = vst.msk [vmem:[#allocation2 + $0xf0] sm:$0xff] %vm823_vm2, %v5437_v50 }
 0x183   : > { %2964 = vmatmul.mubr.msk.bf16.gmra.mrb[24].mxu0 %vm577_vm1, %v566_v45  ;;  %868 = vst.msk [vmem:[#allocation2 + $0x1c8] sm:$0xff] %vm823_vm2, %v5437_v50  ;;  %869 = vst.msk [vmem:[#allocation2 + $0x1e0] sm:$0xff] %vm823_vm2, %v5437_v50 }
 0x184   : > { %2967 = vmatprep.mubr.msk.bf16.mxu0 %vm577_vm1, %v567_v46  ;;  %878 = vst.msk [vmem:[#allocation2 + $0x2b8] sm:$0xff] %vm823_vm2, %v5437_v50  ;;  %879 = vst.msk [vmem:[#allocation2 + $0x2d0] sm:$0xff] %vm823_vm2, %v5437_v50  ;;  %v4410_v46 = vrot.slane %v4366_v55, %v1366_v8  ;;  %v1656_v55 = vld [vmem:[#allocation2 + $0x2c0] sm:$0xff] }
 0x185   : > { %888 = vst.msk [vmem:[#allocation2 + $0x3a8] sm:$0xff] %vm823_vm2, %v5437_v50  ;;  %898 = vst.msk [vmem:[#allocation2 + $0xe8] sm:$0xff] %vm823_vm2, %v5437_v50 }
 0x186   : > { %899 = vst.msk [vmem:[#allocation2 + $0x100] sm:$0xff] %vm823_vm2, %v5437_v50  ;;  %908 = vst.msk [vmem:[#allocation2 + $0x1d8] sm:$0xff] %vm823_vm2, %v5437_v50 }
 0x187   : > { %909 = vst.msk [vmem:[#allocation2 + $0x1f0] sm:$0xff] %vm823_vm2, %v5437_v50  ;;  %918 = vst.msk [vmem:[#allocation2 + $0x2c8] sm:$0xff] %vm823_vm2, %v5437_v50 }
 0x188   : > { %919 = vst.msk [vmem:[#allocation2 + $0x2e0] sm:$0xff] %vm823_vm2, %v5437_v50  ;;  %928 = vst.msk [vmem:[#allocation2 + $0x3b8] sm:$0xff] %vm823_vm2, %v5437_v50  ;;  %v964_v58 = vld [vmem:[#allocation2 + $0x7] sm:$0xff] }
 0x189   : > { %v1000_v61 = vmul.f32 %v4369_v56, %v964_v58  ;;  %v972_v63 = vld [vmem:[#allocation2 + $0xf7] sm:$0xff]  ;;  %v1132_v3 = vld [vmem:[#allocation2 + $0x9] sm:$0xff]  ;;  %v1540_v38 = vld [vmem:[#allocation2 + $0xdf] sm:$0xff] }
 0x18a   : > { %v980_v5 = vld [vmem:[#allocation2 + $0x1e7] sm:$0xff]  ;;  %v1008_v10 = vmul.f32 %v4369_v56, %v972_v63  ;;  %v1168_v21 = vmul.f32 %v4380_v2, %v1132_v3  ;;  %v1548_v43 = vld [vmem:[#allocation2 + $0x1cf] sm:$0xff]  ;;  %v4429_v3 = vmul.f32 %v4413_v47, %v1640_v41 }
 0x18b   : > { %2968 = vmatmul.mubr.msk.bf16.gmra.mrb[28].mxu0 %vm577_vm1, %v568_v49  ;;  %v988_v12 = vld [vmem:[#allocation2 + $0x2d7] sm:$0xff]  ;;  %v1100_v15 = vadd.f32 %v1068_v62, %v1000_v61  ;;  %v1016_v22 = vmul.f32 %v4369_v56, %v980_v5  ;;  %v4425_v61 = vmul.f32 %v4405_v40, %v1540_v38  ;;  %v1556_v62 = vld [vmem:[#allocation2 + $0x2bf] sm:$0xff]  ;;  %v4435_v5 = vmul.f32 %v4405_v40, %v1548_v43 }
 0x18c   : > { %v1024_v29 = vmul.f32 %v4369_v56, %v988_v12  ;;  %v1108_v33 = vadd.f32 %v1076_v11, %v1008_v10  ;;  %v1740_v42 = vld [vmem:[#allocation2 + $0xe1] sm:$0xff] }
 0x18d   : > { %v1140_v18 = vld [vmem:[#allocation2 + $0xf9] sm:$0xff]  ;;  %v1116_v44 = vadd.f32 %v1084_v23, %v1016_v22  ;;  %v1748_v49 = vld [vmem:[#allocation2 + $0x1d1] sm:$0xff]  ;;  %v1200_v58 = vadd.f32 %v1168_v21, %v1100_v15  ;;  %v4432_v4 = vmul.f32 %v4417_v54, %v1740_v42  ;;  %v4448_v15 = vmul.f32 %v4405_v40, %v1556_v62 }
 0x18e   : > { %v1148_v28 = vld [vmem:[#allocation2 + $0x1e9] sm:$0xff]  ;;  %v1176_v34 = vmul.f32 %v4380_v2, %v1140_v18  ;;  %v1124_v51 = vadd.f32 %v1092_v30, %v1024_v29  ;;  %v1756_v6 = vld [vmem:[#allocation2 + $0x2c1] sm:$0xff]  ;;  %v4442_v10 = vmul.f32 %v4417_v54, %v1748_v49  ;;  %v4460_v22 = vmul.f32 %v4413_v47, %v1656_v55 }
 0x18f   : > { %v1156_v35 = vld [vmem:[#allocation2 + $0x2d9] sm:$0xff]  ;;  %v1184_v45 = vmul.f32 %v4380_v2, %v1148_v28  ;;  %v4463_v23 = vmul.f32 %v4417_v54, %v1756_v6 }
 0x190   : > { %v1192_v52 = vmul.f32 %v4380_v2, %v1156_v35  ;;  %v4422_v60 = vadd.f32 %v1176_v34, %v1108_v33 }
 0x191   : > { %v4444_v11 = vadd.f32 %v1184_v45, %v1116_v44 }
 0x192   : > { %v4450_v16 = vadd.f32 %v1192_v52, %v1124_v51 }
 0x226   : > { %v2941_v7 = vpop.f32.mrb[0].mxu0 }
 0x227   : > { %v673_v13 = vadd.f32 %v2941_v7, %v4377_v1  ;;  %v664_v14 = vpop.f32.mrb[1].mxu0 }
 0x228   : > { %v665_v19 = vadd.f32 %v4377_v1, %v664_v14  ;;  %v2942_v20 = vpop.f32.mrb[2].mxu0 }
 0x229   : > { %v793_v25 = vmax.f32 %v673_v13, 0.0  ;;  %v676_v26 = vadd.f32 %v2942_v20, %v4377_v1  ;;  %v667_v27 = vpop.f32.mrb[3].mxu0 }
 0x22a   : > { %v791_v31 = vmax.f32 %v665_v19, 0.0  ;;  %v668_v32 = vadd.f32 %v4377_v1, %v667_v27 }
 0x22b   : > { %932 = vst.msk [vmem:[#allocation2 + $0x50] sm:$0xff] %vm823_vm2, %v793_v25  ;;  %v794_v36 = vmax.f32 %v676_v26, 0.0 }
 0x22c   : > { %930 = vst.msk [vmem:[#allocation2 + $0x20] sm:$0xff] %vm823_vm2, %v791_v31  ;;  %v792_v39 = vmax.f32 %v668_v32, 0.0 }
 0x22d   : > { %933 = vst.msk [vmem:[#allocation2 + $0x68] sm:$0xff] %vm823_vm2, %v794_v36 }
 0x22e   : > { %931 = vst.msk [vmem:[#allocation2 + $0x38] sm:$0xff] %vm823_vm2, %v792_v39  ;;  %v2945_v53 = vpop.f32.mrb[4].mxu0 }
 0x22f   : > { %v689_v63 = vadd.f32 %v2945_v53, %v4377_v1  ;;  %v680_v0 = vpop.f32.mrb[5].mxu0 }
 0x230   : > { %v681_v7 = vadd.f32 %v4377_v1, %v680_v0  ;;  %v2946_v8 = vpop.f32.mrb[6].mxu0 }
 0x231   : > { %v797_v12 = vmax.f32 %v689_v63, 0.0  ;;  %v692_v13 = vadd.f32 %v2946_v8, %v4377_v1  ;;  %v683_v14 = vpop.f32.mrb[7].mxu0 }
 0x232   : > { %v795_v17 = vmax.f32 %v681_v7, 0.0  ;;  %v684_v18 = vadd.f32 %v4377_v1, %v683_v14  ;;  %v4453_v19 = vld [vmem:[#allocation2 + $0x4f] sm:$0xff] }
 0x233   : > { %v4455_v20 = vld [vmem:[#allocation2 + $0x50] sm:$0xff]  ;;  %936 = vst.msk [vmem:[#allocation2 + $0xb0] sm:$0xff] %vm823_vm2, %v797_v12  ;;  %v798_v24 = vmax.f32 %v692_v13, 0.0  ;;  %v965_v25 = vld [vmem:[#allocation2 + $0x1f] sm:$0xff]  ;;  %v4468_v28 = vmul.f32 %v4405_v40, %v4453_v19  ;;  %v1003_v43 = vmul.f32 %v4453_v19, %v4369_v56 }
 0x234   : > { %v4457_v21 = vld [vmem:[#allocation2 + $0x51] sm:$0xff]  ;;  %v1033_v26 = vld [vmem:[#allocation2 + $0x20] sm:$0xff]  ;;  %v4472_v29 = vmul.f32 %v4413_v47, %v4455_v20  ;;  %934 = vst.msk [vmem:[#allocation2 + $0x80] sm:$0xff] %vm823_vm2, %v795_v17  ;;  %v796_v31 = vmax.f32 %v684_v18, 0.0  ;;  %v1001_v32 = vmul.f32 %v4369_v56, %v965_v25  ;;  %v1268_v36 = vmul.f32 %v4401_v37, %v965_v25 }
 0x235   : > { %v1133_v27 = vld [vmem:[#allocation2 + $0x21] sm:$0xff]  ;;  %v4476_v30 = vmul.f32 %v4417_v54, %v4457_v21  ;;  %v1069_v33 = vmul.f32 %v4372_v57, %v1033_v26  ;;  %937 = vst.msk [vmem:[#allocation2 + $0xc8] sm:$0xff] %vm823_vm2, %v798_v24  ;;  %v1233_v35 = vld [vmem:[#allocation2 + $0x37] sm:$0xff]  ;;  %v1368_v39 = vmul.f32 %v4410_v46, %v1033_v26 }
 0x236   : > { %v1169_v34 = vmul.f32 %v4380_v2, %v1133_v27  ;;  %v1333_v38 = vld [vmem:[#allocation2 + $0x38] sm:$0xff]  ;;  %v1468_v42 = vmul.f32 %v4420_v59, %v1133_v27  ;;  %935 = vst.msk [vmem:[#allocation2 + $0x98] sm:$0xff] %vm823_vm2, %v796_v31  ;;  %v2949_v44 = vpop.f32.mrb[8].mxu0  ;;  %v1269_v48 = vmul.f32 %v4401_v37, %v1233_v35  ;;  %v1300_v62 = vadd.f32 %v1268_v36, %v1200_v58  ;;  %v4503_v31 = vld [vmem:[#allocation2 + $0x67] sm:$0xff] }
 0x237   : > { %v1433_v41 = vld [vmem:[#allocation2 + $0x39] sm:$0xff]  ;;  %v1101_v45 = vadd.f32 %v1069_v33, %v1001_v32  ;;  %v1369_v49 = vmul.f32 %v4410_v46, %v1333_v38  ;;  %v705_v52 = vadd.f32 %v2949_v44, %v4377_v1  ;;  %v696_v53 = vpop.f32.mrb[9].mxu0  ;;  %v1569_v63 = vmul.f32 %v4405_v40, %v1233_v35  ;;  %v4507_v36 = vld [vmem:[#allocation2 + $0x68] sm:$0xff] }
 0x238   : > { %v1469_v51 = vmul.f32 %v4420_v59, %v1433_v41  ;;  %v1669_v0 = vmul.f32 %v4413_v47, %v1333_v38  ;;  %v697_v55 = vadd.f32 %v4377_v1, %v696_v53  ;;  %v2950_v6 = vpop.f32.mrb[10].mxu0  ;;  %v1769_v8 = vmul.f32 %v4417_v54, %v1433_v41  ;;  %v4517_v53 = vld [vmem:[#allocation2 + $0x69] sm:$0xff] }
 0x239   : > { %v1201_v7 = vadd.f32 %v1169_v34, %v1101_v45  ;;  %v1002_v12 = vmul.f32 %v1233_v35, %v4369_v56  ;;  %v801_v13 = vmax.f32 %v705_v52, 0.0  ;;  %v708_v14 = vadd.f32 %v2950_v6, %v4377_v1  ;;  %v699_v17 = vpop.f32.mrb[11].mxu0 }
 0x23a   : > { %v1400_v18 = vadd.f32 %v1368_v39, %v1300_v62  ;;  %v1070_v24 = vmul.f32 %v1333_v38, %v4372_v57  ;;  %v799_v58 = vmax.f32 %v697_v55, 0.0  ;;  %v700_v25 = vadd.f32 %v4377_v1, %v699_v17 }
 0x23b   : > { %v1301_v26 = vadd.f32 %v1269_v48, %v1201_v7  ;;  %v1071_v27 = vmul.f32 %v4455_v20, %v4372_v57  ;;  %940 = vst.msk [vmem:[#allocation2 + $0x140] sm:$0xff] %vm823_vm2, %v801_v13  ;;  %v802_v32 = vmax.f32 %v708_v14, 0.0  ;;  %v1170_v35 = vmul.f32 %v1433_v41, %v4380_v2 }
 0x23c   : > { %v1500_v33 = vadd.f32 %v1468_v42, %v1400_v18  ;;  %v1102_v34 = vadd.f32 %v1070_v24, %v1002_v12  ;;  %938 = vst.msk [vmem:[#allocation2 + $0x110] sm:$0xff] %vm823_vm2, %v799_v58  ;;  %v800_v38 = vmax.f32 %v700_v25, 0.0  ;;  %v1171_v45 = vmul.f32 %v4457_v21, %v4380_v2  ;;  %v4529_v18 = vld [vmem:[#allocation12] ss:$0 sm:$0xff] }
 0x23d   : > { %v1401_v39 = vadd.f32 %v1369_v49, %v1301_v26  ;;  %v1103_v44 = vadd.f32 %v1071_v27, %v1003_v43  ;;  %941 = vst.msk [vmem:[#allocation2 + $0x158] sm:$0xff] %vm823_vm2, %v802_v32  ;;  %v1270_v42 = vmul.f32 %v4453_v19, %v4401_v37  ;;  %v1271_v41 = vmul.f32 %v4401_v37, %v4503_v31  ;;  %v4534_v32 = vld [vmem:[#allocation2 + $0x7f] sm:$0xff] }
 0x23e   : > { %v1601_v48 = vadd.f32 %v1569_v63, %v1500_v33  ;;  %v1202_v52 = vadd.f32 %v1170_v35, %v1102_v34  ;;  %939 = vst.msk [vmem:[#allocation2 + $0x128] sm:$0xff] %vm823_vm2, %v800_v38  ;;  %v2953_v62 = vpop.f32.mrb[12].mxu0  ;;  %v1370_v55 = vmul.f32 %v4455_v20, %v4410_v46  ;;  %v1371_v63 = vmul.f32 %v4410_v46, %v4507_v36  ;;  %v4538_v35 = vld [vmem:[#allocation2 + $0x80] sm:$0xff] }
 0x23f   : > { %v1501_v49 = vadd.f32 %v1469_v51, %v1401_v39  ;;  %v1203_v43 = vadd.f32 %v1171_v45, %v1103_v44  ;;  %v721_v6 = vadd.f32 %v2953_v62, %v4377_v1  ;;  %v712_v7 = vpop.f32.mrb[13].mxu0  ;;  %v1470_v13 = vmul.f32 %v4457_v21, %v4420_v59  ;;  %v4546_v45 = vld [vmem:[#allocation2 + $0x81] sm:$0xff] }
 0x240   : > { %v1701_v19 = vadd.f32 %v1669_v0, %v1601_v48  ;;  %v1302_v12 = vadd.f32 %v1270_v42, %v1202_v52  ;;  %v713_v14 = vadd.f32 %v4377_v1, %v712_v7  ;;  %v2954_v17 = vpop.f32.mrb[14].mxu0  ;;  %v1471_v20 = vmul.f32 %v4420_v59, %v4517_v53 }
 0x241   : > { %v1602_v51 = vadd.f32 %v4468_v28, %v1501_v49  ;;  %v1303_v24 = vadd.f32 %v1271_v41, %v1203_v43  ;;  %v805_v58 = vmax.f32 %v721_v6, 0.0  ;;  %v724_v25 = vadd.f32 %v2954_v17, %v4377_v1  ;;  %v715_v26 = vpop.f32.mrb[15].mxu0 }
 0x242   : > { %v1801_v0 = vadd.f32 %v1769_v8, %v1701_v19  ;;  %v1402_v27 = vadd.f32 %v1370_v55, %v1302_v12  ;;  %v803_v21 = vmax.f32 %v713_v14, 0.0  ;;  %v716_v33 = vadd.f32 %v4377_v1, %v715_v26 }
 0x243   : > { %v1702_v34 = vadd.f32 %v4472_v29, %v1602_v51  ;;  %v1403_v28 = vadd.f32 %v1371_v63, %v1303_v24  ;;  %944 = vst.msk [vmem:[#allocation2 + $0x1a0] sm:$0xff] %vm823_vm2, %v805_v58  ;;  %v806_v38 = vmax.f32 %v724_v25, 0.0  ;;  %v1571_v8 = vmul.f32 %v4405_v40, %v4503_v31  ;;  %v973_v41 = vld [vmem:[#allocation2 + $0x10f] sm:$0xff] }
 0x244   : > { %v4542_v39 = vadd.f32 %v4529_v18, %v1801_v0  ;;  %v1502_v44 = vadd.f32 %v1470_v13, %v1402_v27  ;;  %942 = vst.msk [vmem:[#allocation2 + $0x170] sm:$0xff] %vm823_vm2, %v803_v21  ;;  %v804_v48 = vmax.f32 %v716_v33, 0.0  ;;  %v1572_v42 = vmul.f32 %v4405_v40, %v4534_v32  ;;  %v1041_v62 = vld [vmem:[#allocation2 + $0x110] sm:$0xff] }
 0x245   : > { %v1802_v29 = vadd.f32 %v4476_v30, %v1702_v34  ;;  %v1503_v52 = vadd.f32 %v1471_v20, %v1403_v28  ;;  %945 = vst.msk [vmem:[#allocation2 + $0x1b8] sm:$0xff] %vm823_vm2, %v806_v38  ;;  %v1671_v55 = vmul.f32 %v4413_v47, %v4507_v36  ;;  %v1672_v63 = vmul.f32 %v4413_v47, %v4538_v35  ;;  %v1141_v6 = vld [vmem:[#allocation2 + $0x111] sm:$0xff] }
 0x246   : > { %v5431_v49 = vmax.f32 %v4542_v39, 0.0  ;;  %v1603_v43 = vadd.f32 %v1571_v8, %v1502_v44  ;;  %943 = vst.msk [vmem:[#allocation2 + $0x188] sm:$0xff] %vm823_vm2, %v804_v48  ;;  %v2957_v30 = vpop.f32.mrb[16].mxu0  ;;  %v1771_v12 = vmul.f32 %v4417_v54, %v4517_v53  ;;  %v1772_v13 = vmul.f32 %v4417_v54, %v4546_v45  ;;  %v1241_v44 = vld [vmem:[#allocation2 + $0x127] sm:$0xff] }
 0x247   : > { %v4560_v7 = vadd.f32 %v4529_v18, %v1802_v29  ;;  %v1604_v19 = vadd.f32 %v1572_v42, %v1503_v52  ;;  %v737_v14 = vadd.f32 %v2957_v30, %v4377_v1  ;;  %v728_v17 = vpop.f32.mrb[17].mxu0  ;;  %v1009_v24 = vmul.f32 %v4369_v56, %v973_v41  ;;  %v1341_v42 = vld [vmem:[#allocation2 + $0x128] sm:$0xff] }
 0x248   : > { %v1703_v51 = vadd.f32 %v1671_v55, %v1603_v43  ;;  %v1077_v20 = vmul.f32 %v4372_v57, %v1041_v62  ;;  %v729_v58 = vadd.f32 %v4377_v1, %v728_v17  ;;  %v2958_v25 = vpop.f32.mrb[18].mxu0  ;;  %v1177_v27 = vmul.f32 %v4380_v2, %v1141_v6 }
 0x249   : > { %v5432_v26 = vmax.f32 %v4560_v7, 0.0  ;;  %v1704_v0 = vadd.f32 %v1672_v63, %v1604_v19  ;;  %v809_v21 = vmax.f32 %v737_v14, 0.0  ;;  %v740_v33 = vadd.f32 %v2958_v25, %v4377_v1  ;;  %v731_v34 = vpop.f32.mrb[19].mxu0  ;;  %v1441_v19 = vld [vmem:[#allocation2 + $0x129] sm:$0xff]  ;;  %v1642_v25 = vld [vmem:[#allocation2 + $0x140] sm:$0xff] }
 0x24a   : > { %v1803_v28 = vadd.f32 %v1771_v12, %v1703_v51  ;;  %v1109_v38 = vadd.f32 %v1077_v20, %v1009_v24  ;;  %v807_v8 = vmax.f32 %v729_v58, 0.0  ;;  %v732_v48 = vadd.f32 %v4377_v1, %v731_v34  ;;  %v1542_v51 = vld [vmem:[#allocation2 + $0x13f] sm:$0xff] }
 0x24b   : > { %v3120_v29 = vpack.i.bf16 %v5432_v26, %v5431_v49  ;;  %v1804_v52 = vadd.f32 %v1772_v13, %v1704_v0  ;;  %948 = vst.msk [vmem:[#allocation2 + $0x230] sm:$0xff] %vm823_vm2, %v809_v21  ;;  %v810_v43 = vmax.f32 %v740_v33, 0.0  ;;  %v1276_v30 = vmul.f32 %v4401_v37, %v973_v41 }
 0x24c   : > { %v4580_v55 = vadd.f32 %v4529_v18, %v1803_v28  ;;  %v1209_v63 = vadd.f32 %v1177_v27, %v1109_v38  ;;  %946 = vst.msk [vmem:[#allocation2 + $0x200] sm:$0xff] %vm823_vm2, %v807_v8  ;;  %v808_v12 = vmax.f32 %v732_v48, 0.0  ;;  %v1277_v13 = vmul.f32 %v4401_v37, %v1241_v44 }
 0x24d   : > { %3121 = vrot.lane.b32.xlu0 %v3120_v29, %s3664_s22  ;;  %v4586_v14 = vadd.f32 %v4529_v18, %v1804_v52  ;;  %v1376_v17 = vmul.f32 %v4410_v46, %v1041_v62  ;;  %949 = vst.msk [vmem:[#allocation2 + $0x248] sm:$0xff] %vm823_vm2, %v810_v43  ;;  %v1308_v41 = vadd.f32 %v1276_v30, %v4422_v60 }
 0x24e   : > { %5499 = vst [vmem:[#allocation29_spill] sm:$0xff] %v4580_v55  ;;  %v5433_v24 = vmax.f32 %v4580_v55, 0.0  ;;  %v1377_v20 = vmul.f32 %v4410_v46, %v1341_v42  ;;  %v1476_v58 = vmul.f32 %v4420_v59, %v1141_v6  ;;  %947 = vst.msk [vmem:[#allocation2 + $0x218] sm:$0xff] %vm823_vm2, %v808_v12  ;;  %v2961_v0 = vpop.f32.mrb[20].mxu0  ;;  %v1309_v21 = vadd.f32 %v1277_v13, %v1209_v63  ;;  %v1742_v6 = vld [vmem:[#allocation2 + $0x141] sm:$0xff] }
 0x24f   : > { %5500 = vst [vmem:[#allocation30_spill] sm:$0xff] %v4586_v14  ;;  %v5436_v27 = vmax.f32 %v4586_v14, 0.0  ;;  %v1477_v62 = vmul.f32 %v4420_v59, %v1441_v19  ;;  %v1577_v33 = vmul.f32 %v4405_v40, %v1241_v44  ;;  %v753_v34 = vadd.f32 %v2961_v0, %v4377_v1  ;;  %v744_v28 = vpop.f32.mrb[21].mxu0 }
 0x250   : > { %v1408_v38 = vadd.f32 %v1376_v17, %v1308_v41  ;;  %v1578_v60 = vmul.f32 %v4405_v40, %v1542_v51  ;;  %v1677_v8 = vmul.f32 %v4413_v47, %v1341_v42  ;;  %v745_v29 = vadd.f32 %v4377_v1, %v744_v28  ;;  %v2962_v52 = vpop.f32.mrb[22].mxu0 }
 0x251   : > { %v3130_v48 = vpack.i.bf16 %v5436_v27, %v5433_v24  ;;  %v1409_v43 = vadd.f32 %v1377_v20, %v1309_v21  ;;  %v1678_v63 = vmul.f32 %v4413_v47, %v1642_v25  ;;  %v813_v30 = vmax.f32 %v753_v34, 0.0  ;;  %v747_v13 = vpop.f32.mrb[23].mxu0 }
 0x252   : > { %v756_v12 = vadd.f32 %v2962_v52, %v4377_v1  ;;  %v1508_v17 = vadd.f32 %v1476_v58, %v1408_v38  ;;  %v1777_v41 = vmul.f32 %v4417_v54, %v1441_v19  ;;  %v811_v0 = vmax.f32 %v745_v29, 0.0  ;;  %v4616_v52 = vld [vmem:[#allocation2 + $0x157] sm:$0xff] }
 0x253   : > { %3131 = vrot.lane.b32.xlu1 %v3130_v48, %s3664_s22  ;;  %v748_v49 = vadd.f32 %v4377_v1, %v747_v13  ;;  %v1509_v26 = vadd.f32 %v1477_v62, %v1409_v43  ;;  %v1778_v24 = vmul.f32 %v4417_v54, %v1742_v6  ;;  %952 = vst.msk [vmem:[#allocation2 + $0x290] sm:$0xff] %vm823_vm2, %v813_v30  ;;  %v4621_v29 = vld [vmem:[#allocation2 + $0x158] sm:$0xff] }
 0x254   : > { %v814_v20 = vmax.f32 %v756_v12, 0.0  ;;  %v1609_v21 = vadd.f32 %v1577_v33, %v1508_v17  ;;  %v1010_v34 = vmul.f32 %v1241_v44, %v4369_v56  ;;  %v1011_v28 = vmul.f32 %v1542_v51, %v4369_v56  ;;  %950 = vst.msk [vmem:[#allocation2 + $0x260] sm:$0xff] %vm823_vm2, %v811_v0 }
 0x255   : > { %v812_v58 = vmax.f32 %v748_v49, 0.0  ;;  %v1610_v38 = vadd.f32 %v1578_v60, %v1509_v26  ;;  %v1078_v48 = vmul.f32 %v1341_v42, %v4372_v57  ;;  %v1079_v62 = vmul.f32 %v1642_v25, %v4372_v57 }
 0x256   : > { %953 = vst.msk [vmem:[#allocation2 + $0x2a8] sm:$0xff] %vm823_vm2, %v814_v20  ;;  %v1709_v43 = vadd.f32 %v1677_v8, %v1609_v21  ;;  %v1178_v33 = vmul.f32 %v1441_v19, %v4380_v2  ;;  %v1179_v44 = vmul.f32 %v1742_v6, %v4380_v2  ;;  %v1278_v30 = vmul.f32 %v1542_v51, %v4401_v37  ;;  %v2965_v12 = vpop.f32.mrb[24].mxu0 }
 0x257   : > { %951 = vst.msk [vmem:[#allocation2 + $0x278] sm:$0xff] %vm823_vm2, %v812_v58  ;;  %v1710_v49 = vadd.f32 %v1678_v63, %v1610_v38  ;;  %v1110_v26 = vadd.f32 %v1078_v48, %v1010_v34  ;;  %v1111_v60 = vadd.f32 %v1079_v62, %v1011_v28  ;;  %v1279_v42 = vmul.f32 %v4401_v37, %v4616_v52  ;;  %v760_v17 = vpop.f32.mrb[25].mxu0  ;;  %v4635_v34 = vld [vmem:[#allocation2 + $0x159] sm:$0xff] }
 0x258   : > { %v769_v13 = vadd.f32 %v2965_v12, %v4377_v1  ;;  %v1809_v0 = vadd.f32 %v1777_v41, %v1709_v43  ;;  %v1378_v8 = vmul.f32 %v1642_v25, %v4410_v46  ;;  %v1379_v19 = vmul.f32 %v4410_v46, %v4621_v29  ;;  %v2966_v20 = vpop.f32.mrb[26].mxu0 }
 0x259   : > { %v761_v51 = vadd.f32 %v4377_v1, %v760_v17  ;;  %v1810_v21 = vadd.f32 %v1778_v24, %v1710_v49  ;;  %v1210_v58 = vadd.f32 %v1178_v33, %v1110_v26  ;;  %v1211_v63 = vadd.f32 %v1179_v44, %v1111_v60  ;;  %v763_v48 = vpop.f32.mrb[27].mxu0  ;;  %v4646_v33 = vld [vmem:[#allocation2 + $0x16f] sm:$0xff] }
 0x25a   : > { %v817_v28 = vmax.f32 %v769_v13, 0.0  ;;  %v772_v38 = vadd.f32 %v2966_v20, %v4377_v1  ;;  %v4639_v62 = vadd.f32 %v4529_v18, %v1809_v0  ;;  %v1478_v25 = vmul.f32 %v1742_v6, %v4420_v59  ;;  %v4656_v0 = vld [vmem:[#allocation2 + $0x170] sm:$0xff] }
 0x25b   : > { %v815_v41 = vmax.f32 %v761_v51, 0.0  ;;  %v764_v43 = vadd.f32 %v4377_v1, %v763_v48  ;;  %v4644_v12 = vadd.f32 %v4529_v18, %v1810_v21  ;;  %v1310_v24 = vadd.f32 %v1278_v30, %v1210_v58  ;;  %v4665_v58 = vld [vmem:[#allocation2 + $0x171] sm:$0xff] }
 0x25c   : > { %5501 = vst [vmem:[#allocation31_spill] sm:$0xff] %v4639_v62  ;;  %956 = vst.msk [vmem:[#allocation2 + $0x320] sm:$0xff] %vm823_vm2, %v817_v28  ;;  %v818_v44 = vmax.f32 %v772_v38, 0.0  ;;  %v5434_v49 = vmax.f32 %v4639_v62, 0.0  ;;  %v1311_v26 = vadd.f32 %v1279_v42, %v1211_v63  ;;  %v1479_v60 = vmul.f32 %v4420_v59, %v4635_v34  ;;  %v4698_v62 = vld [vmem:[#allocation2 + $0x99] sm:$0xff] }
 0x25d   : > { %5502 = vst [vmem:[#allocation32_spill] sm:$0xff] %v4644_v12  ;;  %954 = vst.msk [vmem:[#allocation2 + $0x2f0] sm:$0xff] %vm823_vm2, %v815_v41  ;;  %v816_v6 = vmax.f32 %v764_v43, 0.0  ;;  %v5435_v13 = vmax.f32 %v4644_v12, 0.0  ;;  %v1410_v17 = vadd.f32 %v1378_v8, %v1310_v24  ;;  %v1579_v30 = vmul.f32 %v4405_v40, %v4616_v52 }
 0x25e   : > { %957 = vst.msk [vmem:[#allocation2 + $0x338] sm:$0xff] %vm823_vm2, %v818_v44  ;;  %v1411_v51 = vadd.f32 %v1379_v19, %v1311_v26  ;;  %v1580_v42 = vmul.f32 %v4405_v40, %v4646_v33  ;;  %v1679_v20 = vmul.f32 %v4413_v47, %v4621_v29  ;;  %v1680_v21 = vmul.f32 %v4413_v47, %v4656_v0  ;;  %v2969_v19 = vpop.f32.mrb[28].mxu0 }
 0x25f   : > { %955 = vst.msk [vmem:[#allocation2 + $0x308] sm:$0xff] %vm823_vm2, %v816_v6  ;;  %v4672_v8 = vpack.i.bf16 %v5435_v13, %v5434_v49  ;;  %v1510_v63 = vadd.f32 %v1478_v25, %v1410_v17  ;;  %v1779_v28 = vmul.f32 %v4417_v54, %v4635_v34  ;;  %v1780_v38 = vmul.f32 %v4417_v54, %v4665_v58  ;;  %v776_v43 = vpop.f32.mrb[29].mxu0  ;;  %v4690_v17 = vld [vmem:[#allocation2 + $0x97] sm:$0xff] }
 0x260   : > { %v785_v48 = vadd.f32 %v2969_v19, %v4377_v1  ;;  %v1511_v41 = vadd.f32 %v1479_v60, %v1411_v51  ;;  %v1004_v24 = vmul.f32 %v4503_v31, %v4369_v56  ;;  %v1005_v44 = vmul.f32 %v4534_v32, %v4369_v56  ;;  %v2970_v51 = vpop.f32.mrb[30].mxu0 }
 0x261   : > { %3126 = vrot.lane.b32.xlu0 %v4672_v8, %s3665_s26  ;;  %v1611_v25 = vadd.f32 %v1579_v30, %v1510_v63  ;;  %v777_v26 = vadd.f32 %v4377_v1, %v776_v43  ;;  %v1072_v6 = vmul.f32 %v4507_v36, %v4372_v57  ;;  %v1073_v60 = vmul.f32 %v4538_v35, %v4372_v57  ;;  %v4696_v30 = vld [vmem:[#allocation2 + $0x98] sm:$0xff]  ;;  %v779_v63 = vpop.f32.mrb[31].mxu0 }
 0x262   : > { %v821_v31 = vmax.f32 %v785_v48, 0.0  ;;  %v1612_v19 = vadd.f32 %v1580_v42, %v1511_v41  ;;  %v1172_v49 = vmul.f32 %v4517_v53, %v4380_v2  ;;  %v1173_v13 = vmul.f32 %v4546_v45, %v4380_v2  ;;  %v4707_v41 = vld [vmem:[#allocation2 + $0xaf] sm:$0xff] }
 0x263   : > { %v1711_v43 = vadd.f32 %v1679_v20, %v1611_v25  ;;  %v819_v27 = vmax.f32 %v777_v26, 0.0  ;;  %v1104_v36 = vadd.f32 %v1072_v6, %v1004_v24  ;;  %v1105_v50 = vadd.f32 %v1073_v60, %v1005_v44 }
 0x264   : > { %960 = vst.msk [vmem:[#allocation2 + $0x380] sm:$0xff] %vm823_vm2, %v821_v31  ;;  %v1712_v12 = vadd.f32 %v1680_v21, %v1612_v19  ;;  %v1272_v42 = vmul.f32 %v4534_v32, %v4401_v37  ;;  %v1273_v53 = vmul.f32 %v4401_v37, %v4690_v17  ;;  %v1372_v48 = vmul.f32 %v4538_v35, %v4410_v46  ;;  %v4712_v21 = vld [vmem:[#allocation2 + $0xb0] sm:$0xff] }
 0x265   : > { %v1811_v20 = vadd.f32 %v1779_v28, %v1711_v43  ;;  %958 = vst.msk [vmem:[#allocation2 + $0x350] sm:$0xff] %vm823_vm2, %v819_v27  ;;  %v1204_v24 = vadd.f32 %v1172_v49, %v1104_v36  ;;  %v1205_v44 = vadd.f32 %v1173_v13, %v1105_v50  ;;  %v1373_v25 = vmul.f32 %v4410_v46, %v4696_v30  ;;  %v4720_v28 = vld [vmem:[#allocation2 + $0xb1] sm:$0xff] }
 0x266   : > { %v1812_v26 = vadd.f32 %v1780_v38, %v1712_v12  ;;  %v1472_v32 = vmul.f32 %v4546_v45, %v4420_v59  ;;  %v1473_v6 = vmul.f32 %v4420_v59, %v4698_v62  ;;  %v1573_v35 = vmul.f32 %v4405_v40, %v4690_v17 }
 0x267   : > { %v4723_v27 = vadd.f32 %v4529_v18, %v1811_v20  ;;  %v1304_v50 = vadd.f32 %v1272_v42, %v1204_v24  ;;  %v1305_v49 = vadd.f32 %v1273_v53, %v1205_v44  ;;  %v1574_v13 = vmul.f32 %v4405_v40, %v4707_v41 }
 0x268   : > { %v4728_v12 = vadd.f32 %v4529_v18, %v1812_v26  ;;  %v1673_v45 = vmul.f32 %v4413_v47, %v4696_v30  ;;  %v1674_v38 = vmul.f32 %v4413_v47, %v4712_v21  ;;  %v1773_v60 = vmul.f32 %v4417_v54, %v4698_v62 }
 0x269   : > { %5503 = vst [vmem:[#allocation33_spill] sm:$0xff] %v4723_v27  ;;  %v5441_v31 = vmax.f32 %v4723_v27, 0.0  ;;  %v1404_v19 = vadd.f32 %v1372_v48, %v1304_v50  ;;  %v1405_v43 = vadd.f32 %v1373_v25, %v1305_v49  ;;  %v1774_v36 = vmul.f32 %v4417_v54, %v4720_v28  ;;  %v4758_v49 = vld [vmem:[#allocation2 + $0x187] sm:$0xff] }
 0x26a   : > { %5504 = vst [vmem:[#allocation34_spill] sm:$0xff] %v4728_v12  ;;  %v5442_v42 = vmax.f32 %v4728_v12, 0.0  ;;  %v788_v53 = vadd.f32 %v2970_v51, %v4377_v1  ;;  %v780_v20 = vadd.f32 %v4377_v1, %v779_v63  ;;  %v1012_v24 = vmul.f32 %v4616_v52, %v4369_v56 }
 0x26b   : > { %v1504_v44 = vadd.f32 %v1472_v32, %v1404_v19  ;;  %v1505_v26 = vadd.f32 %v1473_v6, %v1405_v43  ;;  %v1013_v55 = vmul.f32 %v4646_v33, %v4369_v56  ;;  %v1080_v48 = vmul.f32 %v4621_v29, %v4372_v57 }
 0x26c   : > { %v4752_v25 = vpack.i.bf16 %v5442_v42, %v5441_v31  ;;  %v822_v51 = vmax.f32 %v788_v53, 0.0  ;;  %v820_v50 = vmax.f32 %v780_v20, 0.0  ;;  %v1081_v1 = vmul.f32 %v4656_v0, %v4372_v57  ;;  %v4770_v20 = vld [vmem:[#allocation2 + $0x188] sm:$0xff] }
 0x26d   : > { %v1605_v52 = vadd.f32 %v1573_v35, %v1504_v44  ;;  %v1606_v63 = vadd.f32 %v1574_v13, %v1505_v26  ;;  %v1112_v32 = vadd.f32 %v1080_v48, %v1012_v24  ;;  %v1180_v6 = vmul.f32 %v4635_v34, %v4380_v2  ;;  %v4774_v44 = vld [vmem:[#allocation2 + $0x189] sm:$0xff] }
 0x26e   : > { %3136 = vrot.lane.b32.xlu1 %v4752_v25, %s3665_s26  ;;  %961 = vst.msk [vmem:[#allocation2 + $0x398] sm:$0xff] %vm823_vm2, %v822_v51  ;;  %959 = vst.msk [vmem:[#allocation2 + $0x368] sm:$0xff] %vm823_vm2, %v820_v50  ;;  %v1113_v29 = vadd.f32 %v1081_v1, %v1013_v55  ;;  %v1181_v19 = vmul.f32 %v4665_v58, %v4380_v2  ;;  %v1280_v35 = vmul.f32 %v4646_v33, %v4401_v37  ;;  %v4782_v50 = vld [vmem:[#allocation2 + $0x19f] sm:$0xff]  ;;  %v1339_v31 = vld [vmem:[#allocation2 + $0xc8] sm:$0xff] }
 0x26f   : > { %v1281_v13 = vmul.f32 %v4401_v37, %v4758_v49  ;;  %v1705_v34 = vadd.f32 %v1673_v45, %v1605_v52  ;;  %v1706_v43 = vadd.f32 %v1674_v38, %v1606_v63  ;;  %v1212_v53 = vadd.f32 %v1180_v6, %v1112_v32  ;;  %v4786_v1 = vld [vmem:[#allocation2 + $0x1a0] sm:$0xff] }
 0x270   : > { %v1380_v24 = vmul.f32 %v4656_v0, %v4410_v46  ;;  %v1213_v55 = vadd.f32 %v1181_v19, %v1113_v29  ;;  %v1381_v26 = vmul.f32 %v4410_v46, %v4770_v20  ;;  %v1480_v33 = vmul.f32 %v4665_v58, %v4420_v59  ;;  %v4800_v29 = vld [vmem:[#allocation2 + $0x1a1] sm:$0xff] }
 0x271   : > { %v1481_v48 = vmul.f32 %v4420_v59, %v4774_v44  ;;  %v1805_v45 = vadd.f32 %v1773_v60, %v1705_v34  ;;  %v1806_v38 = vadd.f32 %v1774_v36, %v1706_v43  ;;  %v1312_v51 = vadd.f32 %v1280_v35, %v1212_v53 }
 0x272   : > { %v1581_v0 = vmul.f32 %v4405_v40, %v4758_v49  ;;  %v1313_v52 = vadd.f32 %v1281_v13, %v1213_v55  ;;  %v1582_v63 = vmul.f32 %v4405_v40, %v4782_v50  ;;  %v1681_v58 = vmul.f32 %v4413_v47, %v4770_v20 }
 0x273   : > { %v1682_v32 = vmul.f32 %v4413_v47, %v4786_v1  ;;  %v4795_v60 = vadd.f32 %v4529_v18, %v1805_v45  ;;  %v4798_v36 = vadd.f32 %v4529_v18, %v1806_v38  ;;  %v1412_v6 = vadd.f32 %v1380_v24, %v1312_v51  ;;  %v1239_v38 = vld [vmem:[#allocation2 + $0xc7] sm:$0xff] }
 0x274   : > { %v1781_v19 = vmul.f32 %v4417_v54, %v4774_v44  ;;  %v1413_v35 = vadd.f32 %v1381_v26, %v1313_v52  ;;  %v1782_v13 = vmul.f32 %v4417_v54, %v4800_v29  ;;  %v1006_v34 = vmul.f32 %v4690_v17, %v4369_v56 }
 0x275   : > { %5505 = vst [vmem:[#allocation35_spill] sm:$0xff] %v4795_v60  ;;  %5506 = vst [vmem:[#allocation36_spill] sm:$0xff] %v4798_v36  ;;  %v1007_v43 = vmul.f32 %v4707_v41, %v4369_v56  ;;  %v1876_v53 = vmax.f32 %v4795_v60, 0.0  ;;  %v1877_v55 = vmax.f32 %v4798_v36, 0.0  ;;  %v1512_v24 = vadd.f32 %v1480_v33, %v1412_v6 }
 0x276   : > { %v1074_v45 = vmul.f32 %v4696_v30, %v4372_v57  ;;  %v1513_v51 = vadd.f32 %v1481_v48, %v1413_v35  ;;  %v1075_v26 = vmul.f32 %v4712_v21, %v4372_v57  ;;  %v1174_v52 = vmul.f32 %v4698_v62, %v4380_v2  ;;  %v1439_v48 = vld [vmem:[#allocation2 + $0xc9] sm:$0xff] }
 0x277   : > { %v1175_v17 = vmul.f32 %v4720_v28, %v4380_v2  ;;  %v3140_v33 = vpack.i.bf16 %v1877_v55, %v1876_v53  ;;  %v1613_v6 = vadd.f32 %v1581_v0, %v1512_v24  ;;  %v1274_v30 = vmul.f32 %v4707_v41, %v4401_v37 }
 0x278   : > { %v1106_v42 = vadd.f32 %v1074_v45, %v1006_v34  ;;  %v1614_v35 = vadd.f32 %v1582_v63, %v1513_v51  ;;  %v1107_v27 = vadd.f32 %v1075_v26, %v1007_v43  ;;  %v1275_v12 = vmul.f32 %v4401_v37, %v1239_v38 }
 0x279   : > { %v1374_v62 = vmul.f32 %v4712_v21, %v4410_v46  ;;  %3141 = vrot.lane.b32.xlu0 %v3140_v33, %s3664_s22  ;;  %v1713_v14 = vadd.f32 %v1681_v58, %v1613_v6  ;;  %v1375_v36 = vmul.f32 %v4410_v46, %v1339_v31  ;;  %v1474_v0 = vmul.f32 %v4720_v28, %v4420_v59 }
 0x27a   : > { %v1206_v60 = vadd.f32 %v1174_v52, %v1106_v42  ;;  %v1714_v34 = vadd.f32 %v1682_v32, %v1614_v35  ;;  %v1207_v24 = vadd.f32 %v1175_v17, %v1107_v27  ;;  %v1475_v41 = vmul.f32 %v4420_v59, %v1439_v48  ;;  %v1447_v35 = vld [vmem:[#allocation2 + $0x1b9] sm:$0xff] }
 0x27b   : > { %v1575_v63 = vmul.f32 %v4405_v40, %v1239_v38  ;;  %v1813_v43 = vadd.f32 %v1781_v19, %v1713_v14  ;;  %v1675_v51 = vmul.f32 %v4413_v47, %v1339_v31  ;;  %v1775_v21 = vmul.f32 %v4417_v54, %v1439_v48 }
 0x27c   : > { %v1306_v45 = vadd.f32 %v1274_v30, %v1206_v60  ;;  %v1814_v26 = vadd.f32 %v1782_v13, %v1714_v34  ;;  %v1307_v58 = vadd.f32 %v1275_v12, %v1207_v24  ;;  %v1014_v42 = vmul.f32 %v4758_v49, %v4369_v56  ;;  %v1247_v60 = vld [vmem:[#allocation2 + $0x1b7] sm:$0xff] }
 0x27d   : > { %v1015_v28 = vmul.f32 %v4782_v50, %v4369_v56  ;;  %v4842_v27 = vadd.f32 %v4529_v18, %v1813_v43  ;;  %v1082_v14 = vmul.f32 %v4770_v20, %v4372_v57  ;;  %v1083_v31 = vmul.f32 %v4786_v1, %v4372_v57  ;;  %v1347_v20 = vld [vmem:[#allocation2 + $0x1b8] sm:$0xff] }
 0x27e   : > { %v1406_v32 = vadd.f32 %v1374_v62, %v1306_v45  ;;  %v4849_v19 = vadd.f32 %v4529_v18, %v1814_v26  ;;  %v1407_v12 = vadd.f32 %v1375_v36, %v1307_v58  ;;  %v1182_v49 = vmul.f32 %v4774_v44, %v4380_v2  ;;  %v981_v45 = vld [vmem:[#allocation2 + $0x1ff] sm:$0xff] }
 0x27f   : > { %v1183_v13 = vmul.f32 %v4800_v29, %v4380_v2  ;;  %v5458_v38 = vmax.f32 %v4842_v27, 0.0  ;;  %v1114_v17 = vadd.f32 %v1082_v14, %v1014_v42  ;;  %v1115_v33 = vadd.f32 %v1083_v31, %v1015_v28  ;;  %v1149_v28 = vld [vmem:[#allocation2 + $0x201] sm:$0xff] }
 0x280   : > { %v1506_v52 = vadd.f32 %v1474_v0, %v1406_v32  ;;  %v5459_v6 = vmax.f32 %v4849_v19, 0.0  ;;  %v1507_v30 = vadd.f32 %v1475_v41, %v1407_v12  ;;  %v1282_v48 = vmul.f32 %v4782_v50, %v4401_v37 }
 0x281   : > { %v1283_v36 = vmul.f32 %v4401_v37, %v1247_v60  ;;  %v1214_v44 = vadd.f32 %v1182_v49, %v1114_v17  ;;  %v1215_v34 = vadd.f32 %v1183_v13, %v1115_v33  ;;  %v1382_v24 = vmul.f32 %v4786_v1, %v4410_v46  ;;  %v1049_v1 = vld [vmem:[#allocation2 + $0x200] sm:$0xff]  ;;  %v1249_v33 = vld [vmem:[#allocation2 + $0x217] sm:$0xff] }
 0x282   : > { %v1607_v62 = vadd.f32 %v1575_v63, %v1506_v52  ;;  %v4866_v0 = vpack.i.bf16 %v5459_v6, %v5458_v38  ;;  %v1608_v41 = vadd.f32 %v4425_v61, %v1507_v30  ;;  %v1383_v43 = vmul.f32 %v4410_v46, %v1347_v20 }
 0x283   : > { %v1482_v50 = vmul.f32 %v4800_v29, %v4420_v59  ;;  %v1314_v26 = vadd.f32 %v1282_v48, %v1214_v44  ;;  %v1315_v58 = vadd.f32 %v1283_v36, %v1215_v34  ;;  %v1483_v42 = vmul.f32 %v4420_v59, %v1447_v35 }
 0x284   : > { %v1707_v63 = vadd.f32 %v1675_v51, %v1607_v62  ;;  %3146 = vrot.lane.b32.xlu1 %v4866_v0, %s3665_s26  ;;  %v1708_v32 = vadd.f32 %v4429_v3, %v1608_v41  ;;  %v1583_v61 = vmul.f32 %v4405_v40, %v1247_v60  ;;  %v1683_v14 = vmul.f32 %v4413_v47, %v1347_v20 }
 0x285   : > { %v1783_v31 = vmul.f32 %v4417_v54, %v1447_v35  ;;  %v1414_v12 = vadd.f32 %v1382_v24, %v1314_v26  ;;  %v1415_v51 = vadd.f32 %v1383_v43, %v1315_v58  ;;  %v1017_v49 = vmul.f32 %v4369_v56, %v981_v45  ;;  %v1349_v35 = vld [vmem:[#allocation2 + $0x218] sm:$0xff] }
 0x286   : > { %v1807_v29 = vadd.f32 %v1775_v21, %v1707_v63  ;;  %v1808_v13 = vadd.f32 %v4432_v4, %v1708_v32  ;;  %v1085_v52 = vmul.f32 %v4372_v57, %v1049_v1  ;;  %v1185_v17 = vmul.f32 %v4380_v2, %v1149_v28  ;;  %v1449_v63 = vld [vmem:[#allocation2 + $0x219] sm:$0xff] }
 0x287   : > { %v1284_v3 = vmul.f32 %v4401_v37, %v981_v45  ;;  %v1514_v20 = vadd.f32 %v1482_v50, %v1414_v12  ;;  %v1515_v30 = vadd.f32 %v1483_v42, %v1415_v51  ;;  %v1285_v21 = vmul.f32 %v4401_v37, %v1249_v33  ;;  %v1650_v51 = vld [vmem:[#allocation2 + $0x230] sm:$0xff] }
 0x288   : > { %v4885_v60 = vadd.f32 %v4529_v18, %v1807_v29  ;;  %v4889_v48 = vadd.f32 %v4529_v18, %v1808_v13  ;;  %v1117_v36 = vadd.f32 %v1085_v52, %v1017_v49  ;;  %v1384_v62 = vmul.f32 %v4410_v46, %v1049_v1  ;;  %v1550_v1 = vld [vmem:[#allocation2 + $0x22f] sm:$0xff] }
 0x289   : > { %v1316_v4 = vadd.f32 %v1284_v3, %v4444_v11  ;;  %v1615_v34 = vadd.f32 %v1583_v61, %v1514_v20  ;;  %v1616_v24 = vadd.f32 %v4435_v5, %v1515_v30  ;;  %v1385_v41 = vmul.f32 %v4410_v46, %v1349_v35  ;;  %v1750_v13 = vld [vmem:[#allocation2 + $0x231] sm:$0xff] }
 0x28a   : > { %v1878_v44 = vmax.f32 %v4885_v60, 0.0  ;;  %v1879_v43 = vmax.f32 %v4889_v48, 0.0  ;;  %v1217_v50 = vadd.f32 %v1185_v17, %v1117_v36  ;;  %v1484_v26 = vmul.f32 %v4420_v59, %v1149_v28 }
 0x28b   : > { %v1416_v45 = vadd.f32 %v1384_v62, %v1316_v4  ;;  %v1715_v58 = vadd.f32 %v1683_v14, %v1615_v34  ;;  %v1716_v11 = vadd.f32 %v4439_v9, %v1616_v24  ;;  %v1485_v42 = vmul.f32 %v4420_v59, %v1449_v63  ;;  %v1251_v24 = vld [vmem:[#allocation2 + $0x247] sm:$0xff] }
 0x28c   : > { %v1585_v32 = vmul.f32 %v4405_v40, %v1249_v33  ;;  %v3150_v5 = vpack.i.bf16 %v1879_v43, %v1878_v44  ;;  %v1317_v61 = vadd.f32 %v1285_v21, %v1217_v50  ;;  %v1586_v12 = vmul.f32 %v4405_v40, %v1550_v1 }
 0x28d   : > { %v1516_v29 = vadd.f32 %v1484_v26, %v1416_v45  ;;  %v1815_v49 = vadd.f32 %v1783_v31, %v1715_v58  ;;  %v1816_v28 = vadd.f32 %v4442_v10, %v1716_v11  ;;  %v1685_v9 = vmul.f32 %v4413_v47, %v1349_v35 }
 0x28e   : > { %v1686_v14 = vmul.f32 %v4413_v47, %v1650_v51  ;;  %3151 = vrot.lane.b32.xlu0 %v3150_v5, %s3664_s22  ;;  %v1417_v52 = vadd.f32 %v1385_v41, %v1317_v61  ;;  %v1785_v3 = vmul.f32 %v4417_v54, %v1449_v63  ;;  %v1786_v20 = vmul.f32 %v4417_v54, %v1750_v13 }
 0x28f   : > { %v1617_v17 = vadd.f32 %v1585_v32, %v1516_v29  ;;  %v4913_v30 = vadd.f32 %v4529_v18, %v1815_v49  ;;  %v4916_v31 = vadd.f32 %v4529_v18, %v1816_v28  ;;  %v1018_v10 = vmul.f32 %v1249_v33, %v4369_v56 }
 0x290   : > { %v1019_v21 = vmul.f32 %v1550_v1, %v4369_v56  ;;  %v1517_v36 = vadd.f32 %v1485_v42, %v1417_v52  ;;  %v1086_v62 = vmul.f32 %v1349_v35, %v4372_v57  ;;  %v1087_v34 = vmul.f32 %v1650_v51, %v4372_v57  ;;  %v1351_v42 = vld [vmem:[#allocation2 + $0x248] sm:$0xff] }
 0x291   : > { %v1717_v4 = vadd.f32 %v1685_v9, %v1617_v17  ;;  %v5448_v41 = vmax.f32 %v4913_v30, 0.0  ;;  %v5451_v54 = vmax.f32 %v4916_v31, 0.0  ;;  %v1186_v50 = vmul.f32 %v1449_v63, %v4380_v2  ;;  %v1451_v35 = vld [vmem:[#allocation2 + $0x249] sm:$0xff] }
 0x292   : > { %v1187_v45 = vmul.f32 %v1750_v13, %v4380_v2  ;;  %3161 = vrot.lane.b32.xlu0 %v4672_v8, %s3664_s22  ;;  %v1618_v33 = vadd.f32 %v1586_v12, %v1517_v36  ;;  %v1118_v58 = vadd.f32 %v1086_v62, %v1018_v10  ;;  %v1119_v11 = vadd.f32 %v1087_v34, %v1019_v21  ;;  %v1552_v10 = vld [vmem:[#allocation2 + $0x25f] sm:$0xff]  ;;  %v4952_v34 = vld [vmem:[#allocation11 + $0x8] ss:$0 sm:$0xff] }
 0x293   : > { %v1817_v26 = vadd.f32 %v1785_v3, %v1717_v4  ;;  %v4932_v32 = vpack.i.bf16 %v5451_v54, %v5448_v41  ;;  %v1286_v5 = vmul.f32 %v1550_v1, %v4401_v37  ;;  %v1287_v63 = vmul.f32 %v4401_v37, %v1251_v24  ;;  %v1652_v21 = vld [vmem:[#allocation2 + $0x260] sm:$0xff] }
 0x294   : > { %v1386_v61 = vmul.f32 %v1650_v51, %v4410_v46  ;;  %v1718_v29 = vadd.f32 %v1686_v14, %v1618_v33  ;;  %v1218_v12 = vadd.f32 %v1186_v50, %v1118_v58  ;;  %v1219_v49 = vadd.f32 %v1187_v45, %v1119_v11  ;;  %v1752_v62 = vld [vmem:[#allocation2 + $0x261] sm:$0xff] }
 0x295   : > { %v4938_v8 = vadd.f32 %v4529_v18, %v1817_v26  ;;  %3156 = vrot.lane.b32.xlu1 %v4932_v32, %s3665_s26  ;;  %v1387_v28 = vmul.f32 %v4410_v46, %v1351_v42  ;;  %v1486_v9 = vmul.f32 %v1750_v13, %v4420_v59  ;;  %v1487_v52 = vmul.f32 %v4420_v59, %v1451_v35 }
 0x296   : > { %v1587_v1 = vmul.f32 %v4405_v40, %v1251_v24  ;;  %v1818_v17 = vadd.f32 %v1786_v20, %v1718_v29  ;;  %3171 = vrot.lane.b32.xlu0 %v4752_v25, %s3664_s22  ;;  %v1318_v14 = vadd.f32 %v1286_v5, %v1218_v12  ;;  %v1319_v3 = vadd.f32 %v1287_v63, %v1219_v49  ;;  %v1253_v63 = vld [vmem:[#allocation2 + $0x277] sm:$0xff] }
 0x297   : > { %v5449_v51 = vmax.f32 %v4938_v8, 0.0  ;;  %v1588_v36 = vmul.f32 %v4405_v40, %v1552_v10  ;;  %v1687_v4 = vmul.f32 %v4413_v47, %v1351_v42  ;;  %v1688_v13 = vmul.f32 %v4413_v47, %v1652_v21 }
 0x298   : > { %v1787_v20 = vmul.f32 %v4952_v34, %v1451_v35  ;;  %v4956_v50 = vadd.f32 %v4529_v18, %v1818_v17  ;;  %v1418_v45 = vadd.f32 %v1386_v61, %v1318_v14  ;;  %v1419_v25 = vadd.f32 %v1387_v28, %v1319_v3 }
 0x299   : > { %v1788_v33 = vmul.f32 %v4952_v34, %v1752_v62  ;;  %v1020_v26 = vmul.f32 %v1251_v24, %v4369_v56  ;;  %v1021_v58 = vmul.f32 %v1552_v10, %v4369_v56  ;;  %v1088_v11 = vmul.f32 %v1351_v42, %v4372_v57 }
 0x29a   : > { %v1089_v5 = vmul.f32 %v1652_v21, %v4372_v57  ;;  %v5450_v29 = vmax.f32 %v4956_v50, 0.0  ;;  %v1518_v12 = vadd.f32 %v1486_v9, %v1418_v45  ;;  %v1519_v49 = vadd.f32 %v1487_v52, %v1419_v25  ;;  %3181 = vrot.lane.b32.xlu0 %v4866_v0, %s3664_s22  ;;  %v1353_v52 = vld [vmem:[#allocation2 + $0x278] sm:$0xff] }
 0x29b   : > { %v1188_v61 = vmul.f32 %v1451_v35, %v4380_v2  ;;  %v1120_v28 = vadd.f32 %v1088_v11, %v1020_v26  ;;  %v1189_v24 = vmul.f32 %v1752_v62, %v4380_v2  ;;  %v1288_v14 = vmul.f32 %v1552_v10, %v4401_v37  ;;  %v1453_v26 = vld [vmem:[#allocation2 + $0x279] sm:$0xff] }
 0x29c   : > { %v1121_v17 = vadd.f32 %v1089_v5, %v1021_v58  ;;  %v3165_v42 = vpack.i.bf16 %v5450_v29, %v5449_v51  ;;  %v1619_v3 = vadd.f32 %v1587_v1, %v1518_v12  ;;  %v1620_v41 = vadd.f32 %v1588_v36, %v1519_v49  ;;  %v1554_v1 = vld [vmem:[#allocation2 + $0x28f] sm:$0xff] }
 0x29d   : > { %v1289_v9 = vmul.f32 %v4401_v37, %v1253_v63  ;;  %v1220_v45 = vadd.f32 %v1188_v61, %v1120_v28  ;;  %v1388_v35 = vmul.f32 %v1652_v21, %v4410_v46  ;;  %v1389_v25 = vmul.f32 %v4410_v46, %v1353_v52  ;;  %v1654_v28 = vld [vmem:[#allocation2 + $0x290] sm:$0xff] }
 0x29e   : > { %v1221_v0 = vadd.f32 %v1189_v24, %v1121_v17  ;;  %3166 = vrot.lane.b32.xlu1 %v3165_v42, %s3665_s26  ;;  %v1719_v10 = vadd.f32 %v1687_v4, %v1619_v3  ;;  %v1720_v58 = vadd.f32 %v1688_v13, %v1620_v41  ;;  %v1488_v11 = vmul.f32 %v1752_v62, %v4420_v59  ;;  %v1754_v13 = vld [vmem:[#allocation2 + $0x291] sm:$0xff] }
 0x29f   : > { %v1489_v5 = vmul.f32 %v4420_v59, %v1453_v26  ;;  %v1320_v36 = vadd.f32 %v1288_v14, %v1220_v45  ;;  %v1589_v49 = vmul.f32 %v4405_v40, %v1253_v63  ;;  %v1590_v61 = vmul.f32 %v4405_v40, %v1554_v1  ;;  %3191 = vrot.lane.b32.xlu0 %v4932_v32, %s3664_s22 }
 0x2a0   : > { %v1321_v12 = vadd.f32 %v1289_v9, %v1221_v0  ;;  %v1819_v21 = vadd.f32 %v1787_v20, %v1719_v10  ;;  %v1820_v17 = vadd.f32 %v1788_v33, %v1720_v58  ;;  %v1689_v4 = vmul.f32 %v4413_v47, %v1353_v52 }
 0x2a1   : > { %v1690_v41 = vmul.f32 %v4413_v47, %v1654_v28  ;;  %v1420_v62 = vadd.f32 %v1388_v35, %v1320_v36  ;;  %v1789_v14 = vmul.f32 %v4952_v34, %v1453_v26  ;;  %v1790_v3 = vmul.f32 %v4952_v34, %v1754_v13 }
 0x2a2   : > { %v1421_v24 = vadd.f32 %v1389_v25, %v1321_v12  ;;  %v4988_v9 = vadd.f32 %v4529_v18, %v1819_v21  ;;  %v4991_v45 = vadd.f32 %v4529_v18, %v1820_v17  ;;  %v1022_v32 = vmul.f32 %v1253_v63, %v4369_v56  ;;  %v1255_v25 = vld [vmem:[#allocation2 + $0x2a7] sm:$0xff] }
 0x2a3   : > { %v1023_v20 = vmul.f32 %v1554_v1, %v4369_v56  ;;  %v1520_v33 = vadd.f32 %v1488_v11, %v1420_v62  ;;  %v1090_v10 = vmul.f32 %v1353_v52, %v4372_v57  ;;  %v1091_v35 = vmul.f32 %v1654_v28, %v4372_v57  ;;  %3201 = vrot.lane.b32.xlu0 %v3165_v42, %s3664_s22  ;;  %v1455_v62 = vld [vmem:[#allocation2 + $0x2a9] sm:$0xff] }
 0x2a4   : > { %v1521_v0 = vadd.f32 %v1489_v5, %v1421_v24  ;;  %v5452_v58 = vmax.f32 %v4988_v9, 0.0  ;;  %v5457_v36 = vmax.f32 %v4991_v45, 0.0  ;;  %v1190_v18 = vmul.f32 %v1453_v26, %v4380_v2  ;;  %v1355_v5 = vld [vmem:[#allocation2 + $0x2a8] sm:$0xff] }
 0x2a5   : > { %v1191_v12 = vmul.f32 %v1754_v13, %v4380_v2  ;;  %v1621_v63 = vadd.f32 %v1589_v49, %v1520_v33  ;;  %v1122_v17 = vadd.f32 %v1090_v10, %v1022_v32  ;;  %v1123_v11 = vadd.f32 %v1091_v35, %v1023_v20  ;;  %v1057_v32 = vld [vmem:[#allocation2 + $0x2f0] sm:$0xff] }
 0x2a6   : > { %v1622_v21 = vadd.f32 %v1590_v61, %v1521_v0  ;;  %v3175_v52 = vpack.i.bf16 %v5457_v36, %v5452_v58  ;;  %v1290_v42 = vmul.f32 %v1554_v1, %v4401_v37  ;;  %v1291_v24 = vmul.f32 %v4401_v37, %v1255_v25  ;;  %v989_v61 = vld [vmem:[#allocation2 + $0x2ef] sm:$0xff] }
 0x2a7   : > { %v1390_v51 = vmul.f32 %v1654_v28, %v4410_v46  ;;  %v1721_v26 = vadd.f32 %v1689_v4, %v1621_v63  ;;  %v1222_v54 = vadd.f32 %v1190_v18, %v1122_v17  ;;  %v1223_v49 = vadd.f32 %v1191_v12, %v1123_v11  ;;  %v1157_v4 = vld [vmem:[#allocation2 + $0x2f1] sm:$0xff]  ;;  %v1361_v36 = vld [vmem:[#allocation2 + $0x368] sm:$0xff] }
 0x2a8   : > { %v1722_v29 = vadd.f32 %v1690_v41, %v1622_v21  ;;  %3176 = vrot.lane.b32.xlu1 %v3175_v52, %s3665_s26  ;;  %v1391_v20 = vmul.f32 %v4410_v46, %v1355_v5  ;;  %v1490_v33 = vmul.f32 %v1754_v13, %v4420_v59  ;;  %v1491_v0 = vmul.f32 %v4420_v59, %v1455_v62  ;;  %v1257_v41 = vld [vmem:[#allocation2 + $0x307] sm:$0xff]  ;;  %v5019_v21 = vld [vmem:[#allocation12] ss:$0 sm:$0xff] }
 0x2a9   : > { %v1591_v1 = vmul.f32 %v4405_v40, %v1255_v25  ;;  %v1821_v10 = vadd.f32 %v1789_v14, %v1721_v26  ;;  %v1322_v58 = vadd.f32 %v1290_v42, %v1222_v54  ;;  %v1323_v28 = vadd.f32 %v1291_v24, %v1223_v49  ;;  %3211 = vrot.lane.b32.xlu0 %v3175_v52, %s3664_s22  ;;  %v1357_v26 = vld [vmem:[#allocation2 + $0x308] sm:$0xff] }
 0x2aa   : > { %v1822_v35 = vadd.f32 %v1790_v3, %v1722_v29  ;;  %v1691_v18 = vmul.f32 %v4413_v47, %v1355_v5  ;;  %v1791_v12 = vmul.f32 %v4952_v34, %v1455_v62  ;;  %v1025_v63 = vmul.f32 %v4369_v56, %v989_v61 }
 0x2ab   : > { %v1093_v13 = vmul.f32 %v4372_v57, %v1057_v32  ;;  %v5022_v25 = vadd.f32 %v5019_v21, %v1821_v10  ;;  %v1422_v29 = vadd.f32 %v1390_v51, %v1322_v58  ;;  %v1423_v14 = vadd.f32 %v1391_v20, %v1323_v28  ;;  %v1457_v28 = vld [vmem:[#allocation2 + $0x309] sm:$0xff] }
 0x2ac   : > { %v5025_v54 = vadd.f32 %v5019_v21, %v1822_v35  ;;  %v1193_v17 = vmul.f32 %v4380_v2, %v1157_v4  ;;  %v1292_v11 = vmul.f32 %v4401_v37, %v989_v61  ;;  %v1293_v5 = vmul.f32 %v4401_v37, %v1257_v41 }
 0x2ad   : > { %v1125_v3 = vadd.f32 %v1093_v13, %v1025_v63  ;;  %v5453_v62 = vmax.f32 %v5022_v25, 0.0  ;;  %v1522_v42 = vadd.f32 %v1490_v33, %v1422_v29  ;;  %v1523_v24 = vadd.f32 %v1491_v0, %v1423_v14 }
 0x2ae   : > { %v5456_v52 = vmax.f32 %v5025_v54, 0.0  ;;  %v1324_v10 = vadd.f32 %v1292_v11, %v4450_v16  ;;  %v1392_v51 = vmul.f32 %v4410_v46, %v1057_v32  ;;  %v1393_v58 = vmul.f32 %v4410_v46, %v1357_v26  ;;  %v1558_v16 = vld [vmem:[#allocation2 + $0x31f] sm:$0xff] }
 0x2af   : > { %v1225_v49 = vadd.f32 %v1193_v17, %v1125_v3  ;;  %v1623_v20 = vadd.f32 %v1591_v1, %v1522_v42  ;;  %v1624_v35 = vadd.f32 %v4448_v15, %v1523_v24  ;;  %v1492_v33 = vmul.f32 %v4420_v59, %v1157_v4  ;;  %v1658_v1 = vld [vmem:[#allocation2 + $0x320] sm:$0xff] }
 0x2b0   : > { %v3185_v61 = vpack.i.bf16 %v5456_v52, %v5453_v62  ;;  %v1424_v63 = vadd.f32 %v1392_v51, %v1324_v10  ;;  %v1493_v13 = vmul.f32 %v4420_v59, %v1457_v28  ;;  %v1593_v32 = vmul.f32 %v4405_v40, %v1257_v41  ;;  %v1359_v62 = vld [vmem:[#allocation2 + $0x338] sm:$0xff] }
 0x2b1   : > { %v1325_v0 = vadd.f32 %v1293_v5, %v1225_v49  ;;  %v1723_v29 = vadd.f32 %v1691_v18, %v1623_v20  ;;  %v1724_v14 = vadd.f32 %v4460_v22, %v1624_v35  ;;  %v1594_v3 = vmul.f32 %v4405_v40, %v1558_v16  ;;  %v1758_v5 = vld [vmem:[#allocation2 + $0x321] sm:$0xff] }
 0x2b2   : > { %3186 = vrot.lane.b32.xlu1 %v3185_v61, %s3665_s26  ;;  %v1693_v15 = vmul.f32 %v4413_v47, %v1357_v26  ;;  %v1524_v11 = vadd.f32 %v1492_v33, %v1424_v63  ;;  %v1694_v4 = vmul.f32 %v4413_v47, %v1658_v1  ;;  %v1793_v42 = vmul.f32 %v4952_v34, %v1457_v28 }
 0x2b3   : > { %v1425_v17 = vadd.f32 %v1393_v58, %v1325_v0  ;;  %3221 = vrot.lane.b32.xlu0 %v3185_v61, %s3664_s22  ;;  %v1823_v24 = vadd.f32 %v1791_v12, %v1723_v29  ;;  %v1824_v49 = vadd.f32 %v4463_v23, %v1724_v14  ;;  %v1794_v18 = vmul.f32 %v4952_v34, %v1758_v5  ;;  %v1259_v61 = vld [vmem:[#allocation2 + $0x337] sm:$0xff] }
 0x2b4   : > { %v1026_v22 = vmul.f32 %v1257_v41, %v4369_v56  ;;  %v1625_v51 = vadd.f32 %v1593_v32, %v1524_v11  ;;  %v1027_v20 = vmul.f32 %v1558_v16, %v4369_v56  ;;  %v1094_v58 = vmul.f32 %v1357_v26, %v4372_v57 }
 0x2b5   : > { %v1525_v10 = vadd.f32 %v1493_v13, %v1425_v17  ;;  %v5056_v35 = vadd.f32 %v5019_v21, %v1823_v24  ;;  %v5059_v33 = vadd.f32 %v5019_v21, %v1824_v49  ;;  %v1095_v12 = vmul.f32 %v1658_v1, %v4372_v57 }
 0x2b6   : > { %v1194_v23 = vmul.f32 %v1457_v28, %v4380_v2  ;;  %v1725_v63 = vadd.f32 %v1693_v15, %v1625_v51  ;;  %v1126_v41 = vadd.f32 %v1094_v58, %v1026_v22  ;;  %v1195_v13 = vmul.f32 %v1758_v5, %v4380_v2 }
 0x2b7   : > { %v1626_v0 = vadd.f32 %v1594_v3, %v1525_v10  ;;  %v5454_v32 = vmax.f32 %v5056_v35, 0.0  ;;  %v5455_v26 = vmax.f32 %v5059_v33, 0.0  ;;  %v1127_v29 = vadd.f32 %v1095_v12, %v1027_v20  ;;  %v1560_v20 = vld [vmem:[#allocation2 + $0x34f] sm:$0xff] }
 0x2b8   : > { %v1294_v14 = vmul.f32 %v1558_v16, %v4401_v37  ;;  %v1825_v11 = vadd.f32 %v1793_v42, %v1725_v63  ;;  %v1226_v24 = vadd.f32 %v1194_v23, %v1126_v41  ;;  %v1295_v49 = vmul.f32 %v4401_v37, %v1259_v61  ;;  %v1660_v41 = vld [vmem:[#allocation2 + $0x350] sm:$0xff] }
 0x2b9   : > { %v1726_v17 = vadd.f32 %v1694_v4, %v1626_v0  ;;  %v3195_v28 = vpack.i.bf16 %v5455_v26, %v5454_v32  ;;  %v1227_v3 = vadd.f32 %v1195_v13, %v1127_v29  ;;  %v1394_v15 = vmul.f32 %v1658_v1, %v4410_v46  ;;  %v1459_v4 = vld [vmem:[#allocation2 + $0x339] sm:$0xff]  ;;  %v1760_v29 = vld [vmem:[#allocation2 + $0x351] sm:$0xff] }
 0x2ba   : > { %v1395_v22 = vmul.f32 %v4410_v46, %v1359_v62  ;;  %v1864_v51 = vadd.f32 %v5019_v21, %v1825_v11  ;;  %v1326_v16 = vadd.f32 %v1294_v14, %v1226_v24  ;;  %v1494_v42 = vmul.f32 %v1758_v5, %v4420_v59 }
 0x2bb   : > { %v1826_v10 = vadd.f32 %v1794_v18, %v1726_v17  ;;  %3196 = vrot.lane.b32.xlu1 %v3195_v28, %s3665_s26  ;;  %v1327_v58 = vadd.f32 %v1295_v49, %v1227_v3  ;;  %v1495_v12 = vmul.f32 %v4420_v59, %v1459_v4  ;;  %v1595_v23 = vmul.f32 %v4405_v40, %v1259_v61 }
 0x2bc   : > { %v1596_v0 = vmul.f32 %v4405_v40, %v1560_v20  ;;  %v1896_v63 = vmax.f32 %v1864_v51, 0.0  ;;  %v1426_v18 = vadd.f32 %v1394_v15, %v1326_v16  ;;  %v1695_v13 = vmul.f32 %v4413_v47, %v1359_v62  ;;  %3231 = vrot.lane.b32.xlu0 %v3195_v28, %s3664_s22  ;;  %v1261_v15 = vld [vmem:[#allocation2 + $0x367] sm:$0xff] }
 0x2bd   : > { %v1865_v1 = vadd.f32 %v5019_v21, %v1826_v10  ;;  %v1427_v5 = vadd.f32 %v1395_v22, %v1327_v58  ;;  %v1696_v14 = vmul.f32 %v4413_v47, %v1660_v41  ;;  %v1795_v17 = vmul.f32 %v4952_v34, %v1459_v4 }
 0x2be   : > { %v1796_v11 = vmul.f32 %v4952_v34, %v1760_v29  ;;  %v1526_v49 = vadd.f32 %v1494_v42, %v1426_v18  ;;  %v1028_v3 = vmul.f32 %v1259_v61, %v4369_v56  ;;  %v1029_v10 = vmul.f32 %v1560_v20, %v4369_v56 }
 0x2bf   : > { %v1897_v24 = vmax.f32 %v1865_v1, 0.0  ;;  %v1527_v51 = vadd.f32 %v1495_v12, %v1427_v5  ;;  %v1096_v16 = vmul.f32 %v1359_v62, %v4372_v57  ;;  %v1097_v32 = vmul.f32 %v1660_v41, %v4372_v57 }
 0x2c0   : > { %v1196_v28 = vmul.f32 %v1459_v4, %v4380_v2  ;;  %v1627_v58 = vadd.f32 %v1595_v23, %v1526_v49  ;;  %v1197_v26 = vmul.f32 %v1760_v29, %v4380_v2  ;;  %v1296_v52 = vmul.f32 %v1560_v20, %v4401_v37  ;;  %v1562_v20 = vld [vmem:[#allocation2 + $0x37f] sm:$0xff] }
 0x2c1   : > { %v3205_v22 = vpack.i.bf16 %v1897_v24, %v1896_v63  ;;  %v1628_v1 = vadd.f32 %v1596_v0, %v1527_v51  ;;  %v1128_v42 = vadd.f32 %v1096_v16, %v1028_v3  ;;  %v1129_v18 = vadd.f32 %v1097_v32, %v1029_v10  ;;  %v1461_v24 = vld [vmem:[#allocation2 + $0x369] sm:$0xff]  ;;  %v1662_v16 = vld [vmem:[#allocation2 + $0x380] sm:$0xff] }
 0x2c2   : > { %v1297_v61 = vmul.f32 %v4401_v37, %v1261_v15  ;;  %v1727_v12 = vadd.f32 %v1695_v13, %v1627_v58  ;;  %v1396_v62 = vmul.f32 %v1660_v41, %v4410_v46  ;;  %v1397_v5 = vmul.f32 %v4410_v46, %v1361_v36 }
 0x2c3   : > { %3206 = vrot.lane.b32.xlu1 %v3205_v22, %s3665_s26  ;;  %v1728_v4 = vadd.f32 %v1696_v14, %v1628_v1  ;;  %v1228_v63 = vadd.f32 %v1196_v28, %v1128_v42  ;;  %v1229_v23 = vadd.f32 %v1197_v26, %v1129_v18  ;;  %v1496_v49 = vmul.f32 %v1760_v29, %v4420_v59  ;;  %v1762_v28 = vld [vmem:[#allocation2 + $0x381] sm:$0xff] }
 0x2c4   : > { %3241 = vrot.lane.b32.xlu0 %v3205_v22, %s3664_s22  ;;  %v1827_v32 = vadd.f32 %v1795_v17, %v1727_v12  ;;  %v1497_v0 = vmul.f32 %v4420_v59, %v1461_v24  ;;  %v1597_v3 = vmul.f32 %v4405_v40, %v1261_v15  ;;  %v1598_v13 = vmul.f32 %v4405_v40, %v1562_v20 }
 0x2c5   : > { %v1828_v10 = vadd.f32 %v1796_v11, %v1728_v4  ;;  %v1328_v41 = vadd.f32 %v1296_v52, %v1228_v63  ;;  %v1329_v51 = vadd.f32 %v1297_v61, %v1229_v23  ;;  %v1697_v14 = vmul.f32 %v4413_v47, %v1361_v36  ;;  %v1263_v52 = vld [vmem:[#allocation2 + $0x397] sm:$0xff] }
 0x2c6   : > { %v1866_v26 = vadd.f32 %v5019_v21, %v1827_v32  ;;  %v1698_v29 = vmul.f32 %v4413_v47, %v1662_v16  ;;  %v1797_v22 = vmul.f32 %v4952_v34, %v1461_v24  ;;  %v1030_v17 = vmul.f32 %v1261_v15, %v4369_v56  ;;  %v1363_v15 = vld [vmem:[#allocation2 + $0x398] sm:$0xff] }
 0x2c7   : > { %v1867_v58 = vadd.f32 %v5019_v21, %v1828_v10  ;;  %v1428_v1 = vadd.f32 %v1396_v62, %v1328_v41  ;;  %v1429_v42 = vadd.f32 %v1397_v5, %v1329_v51  ;;  %v1031_v11 = vmul.f32 %v1562_v20, %v4369_v56 }
 0x2c8   : > { %v1898_v18 = vmax.f32 %v1866_v26, 0.0  ;;  %v1098_v61 = vmul.f32 %v1361_v36, %v4372_v57  ;;  %v1099_v12 = vmul.f32 %v1662_v16, %v4372_v57  ;;  %v1198_v4 = vmul.f32 %v1461_v24, %v4380_v2  ;;  %v1463_v57 = vld [vmem:[#allocation2 + $0x399] sm:$0xff] }
 0x2c9   : > { %v1899_v63 = vmax.f32 %v1867_v58, 0.0  ;;  %v1528_v23 = vadd.f32 %v1496_v49, %v1428_v1  ;;  %v1529_v32 = vadd.f32 %v1497_v0, %v1429_v42  ;;  %v1199_v38 = vmul.f32 %v1762_v28, %v4380_v2  ;;  %v1564_v58 = vld [vmem:[#allocation2 + $0x3af] sm:$0xff] }
 0x2ca   : > { %v1130_v6 = vadd.f32 %v1098_v61, %v1030_v17  ;;  %v1131_v10 = vadd.f32 %v1099_v12, %v1031_v11  ;;  %v1298_v62 = vmul.f32 %v1562_v20, %v4401_v37  ;;  %v1299_v56 = vmul.f32 %v4401_v37, %v1263_v52  ;;  %v1664_v42 = vld [vmem:[#allocation2 + $0x3b0] sm:$0xff] }
 0x2cb   : > { %v3215_v5 = vpack.i.bf16 %v1899_v63, %v1898_v18  ;;  %v1629_v41 = vadd.f32 %v1597_v3, %v1528_v23  ;;  %v1630_v51 = vadd.f32 %v1598_v13, %v1529_v32  ;;  %v1798_v36 = vmul.f32 %v4952_v34, %v1762_v28  ;;  %v3262_v13 = vld [vmem:[#allocation14] sm:$0xff]   ;;  %v3263_v63 = vld [vmem:[#allocation14 + $0x8] sm:$0xff]  }
 0x2cc   : > { %v1230_v26 = vadd.f32 %v1198_v4, %v1130_v6  ;;  %v1231_v24 = vadd.f32 %v1199_v38, %v1131_v10  ;;  %v1398_v49 = vmul.f32 %v1662_v16, %v4410_v46  ;;  %v1399_v0 = vmul.f32 %v4410_v46, %v1363_v15  ;;  %v5123_v46 = vpop.permute.xlu0 %3121  ;;  %v1764_v61 = vld [vmem:[#allocation2 + $0x3b1] sm:$0xff] }
 0x2cd   : > { %3216 = vrot.lane.b32.xlu1 %v3215_v5, %s3665_s26  ;;  %v1729_v2 = vadd.f32 %v1697_v14, %v1629_v41  ;;  %v1730_v17 = vadd.f32 %v1698_v29, %v1630_v51  ;;  %v1498_v37 = vmul.f32 %v1762_v28, %v4420_v59  ;;  %v1499_v3 = vmul.f32 %v4420_v59, %v1463_v57 }
 0x2ce   : > { %v1330_v20 = vadd.f32 %v1298_v62, %v1230_v26  ;;  %v1331_v1 = vadd.f32 %v1299_v56, %v1231_v24  ;;  %3246 = vrot.lane.b32.xlu0 %v3215_v5, %s3664_s22  ;;  %v1599_v16 = vmul.f32 %v4405_v40, %v1263_v52  ;;  %v1600_v29 = vmul.f32 %v4405_v40, %v1564_v58  ;;  %v3264_v26 = vld [vmem:[#allocation14 + $0x10] sm:$0xff]  }
 0x2cf   : > { %v1829_v6 = vadd.f32 %v1797_v22, %v1729_v2  ;;  %v1830_v38 = vadd.f32 %v1798_v36, %v1730_v17  ;;  %v1699_v59 = vmul.f32 %v4413_v47, %v1363_v15  ;;  %v3666_v12 = vmov 0   ;;  %v3265_v2 = vld [vmem:[#allocation14 + $0x18] sm:$0xff]  }
 0x2d0   : > { %v1430_v11 = vadd.f32 %v1398_v49, %v1330_v20  ;;  %v1431_v14 = vadd.f32 %v1399_v0, %v1331_v1  ;;  %2321 = vmatprep.subr.bf16.mxu1 %v3666_v12  ;;  %3260 = vset.pattern.permute.xlu1 %v3666_v12  ;;  %v1700_v4 = vmul.f32 %v4413_v47, %v1664_v42  ;;  %v3266_v1 = vld [vmem:[#allocation14 + $0x20] sm:$0xff]  }
 0x2d1   : > { %v1868_v18 = vadd.f32 %v5019_v21, %v1829_v6  ;;  %v1869_v28 = vadd.f32 %v5019_v21, %v1830_v38  ;;  %2322 = vmatpush1.bf16.msra.mxu1 %v3262_v13  ;;  %3261 = vset.pattern.permute.xlu0 %v3666_v12  ;;  %v1799_v62 = vmul.f32 %v4952_v34, %v1463_v57  ;;  %v3132_v13 = vpop.permute.xlu1 %3131  ;;  %v3124_v6 = vunpack.i.h.bf16 %v5123_v46 }
 0x2d2   : > { %v1530_v22 = vadd.f32 %v1498_v37, %v1430_v11  ;;  %v1531_v52 = vadd.f32 %v1499_v3, %v1431_v14  ;;  %2323 = vmatprep.subr.bf16.mxu1 %v3666_v12  ;;  %v1800_v56 = vmul.f32 %v4952_v34, %v1764_v61  ;;  %v3267_v37 = vld [vmem:[#allocation14 + $0x28] sm:$0xff]   ;;  %v3268_v3 = vld [vmem:[#allocation14 + $0x30] sm:$0xff]   ;;  %v3123_v38 = vunpack.i.l.bf16 %v5123_v46 }
 0x2d3   : > { %v1900_v40 = vmax.f32 %v1868_v18, 0.0  ;;  %v1901_v23 = vmax.f32 %v1869_v28, 0.0  ;;  %v3127_v32 = vpop.permute.xlu0 %3126  ;;  %v2109_v11 = vsel %vm823_vm2, 0.0, %v3124_v6  ;;  %v3270_v28 = vld [vmem:[#allocation14 + $0x40] sm:$0xff]  }
 0x2d4   : > { %v1631_v15 = vadd.f32 %v1599_v16, %v1530_v22  ;;  %v1632_v10 = vadd.f32 %v1600_v29, %v1531_v52  ;;  %v3129_v41 = vunpack.i.h.bf16 %v3127_v32  ;;  %v3128_v51 = vunpack.i.l.bf16 %v3127_v32  ;;  %v3269_v16 = vld [vmem:[#allocation14 + $0x38] sm:$0xff]  }
 0x2d5   : > { %v3225_v5 = vpack.i.bf16 %v1901_v23, %v1900_v40  ;;  %2324 = vmatpush1.bf16.msra.mxu1 %v3263_v63  ;;  %v2108_v14 = vsel %vm823_vm2, 0.0, %v3123_v38  ;;  %v3134_v52 = vunpack.i.h.bf16 %v3132_v13 }
 0x2d6   : > { %v1731_v36 = vadd.f32 %v1699_v59, %v1631_v15  ;;  %v1732_v47 = vadd.f32 %v1700_v4, %v1632_v10  ;;  %2325 = vmatprep.subr.bf16.mxu1 %v3666_v12  ;;  %v2174_v24 = vpack.c.bf16 %v3129_v41, %v3128_v51  ;;  %v2141_v59 = vsel %vm2140_vm4, %v2108_v14, %v3128_v51 }
 0x2d7   : > { %3226 = vrot.lane.b32.xlu1 %v3225_v5, %s3665_s26  ;;  %v2142_v61 = vsel %vm2140_vm4, %v2109_v11, %v3129_v41  ;;  %v3133_v4 = vunpack.i.l.bf16 %v3132_v13  ;;  %v2111_v40 = vsel %vm823_vm2, 0.0, %v3134_v52 }
 0x2d8   : > { %v1831_v49 = vadd.f32 %v1799_v62, %v1731_v36  ;;  %v1832_v0 = vadd.f32 %v1800_v56, %v1732_v47  ;;  %2877 = vmatprep.mubr.msk.bf16.mxu1 %vm2281_vm3, %v2174_v24  ;;  %v2173_v46 = vpack.c.bf16 %v2142_v61, %v2141_v59 }
 0x2d9   : > { %2326 = vmatpush1.bf16.msra.mxu1 %v3264_v26  ;;  %v2110_v23 = vsel %vm823_vm2, 0.0, %v3133_v4 }
 0x2da   : > { %v1870_v57 = vadd.f32 %v5019_v21, %v1831_v49  ;;  %v1871_v34 = vadd.f32 %v5019_v21, %v1832_v0  ;;  %2327 = vmatprep.subr.bf16.mxu1 %v3666_v12  ;;  %v5507_v21 = vmov 0.0  }
 0x2dc   : > { %v1902_v17 = vmax.f32 %v1870_v57, 0.0  ;;  %v1903_v58 = vmax.f32 %v1871_v34, 0.0 }
 0x2dd   : > { %2328 = vmatpush1.bf16.msra.mxu1 %v3265_v2 }
 0x2de   : > { %v3235_v20 = vpack.i.bf16 %v1903_v58, %v1902_v17  ;;  %2329 = vmatprep.subr.bf16.mxu1 %v3666_v12 }
 0x2e0   : > { %3236 = vrot.lane.b32.xlu1 %v3235_v20, %s3665_s26  ;;  %3256 = vrot.lane.b32.xlu0 %v3235_v20, %s3664_s22  ;;  %v3137_v42 = vpop.permute.xlu1 %3136 }
 0x2e1   : > { %2330 = vmatpush1.bf16.msra.mxu1 %v3266_v1  ;;  %v3139_v29 = vunpack.i.h.bf16 %v3137_v42  ;;  %v3138_v18 = vunpack.i.l.bf16 %v3137_v42 }
 0x2e2   : > { %2331 = vmatprep.subr.bf16.mxu1 %v3666_v12 }
 0x2e3   : > { %v2176_v22 = vpack.c.bf16 %v3139_v29, %v3138_v18  ;;  %v2143_v62 = vsel %vm2140_vm4, %v2110_v23, %v3138_v18 }
 0x2e4   : > { %2081 = vrot.lane.b32.xlu1 %v5507_v21, %s3665_s26 }
 0x2e5   : > { %2332 = vmatpush1.bf16.msra.mxu1 %v3267_v37 }
 0x2e6   : > { %2333 = vmatprep.subr.bf16.mxu1 %v3666_v12 }
 0x2e8   : > { %3251 = vrot.lane.b32.xlu1 %v3225_v5, %s3664_s22 }
 0x2e9   : > { %2334 = vmatpush1.bf16.msra.mxu1 %v3268_v3 }
 0x2ea   : > { %2335 = vmatprep.subr.bf16.mxu1 %v3666_v12 }
 0x2eb   : > { %v3142_v32 = vpop.permute.xlu0 %3141 }
 0x2ec   : > { %v3144_v56 = vunpack.i.h.bf16 %v3142_v32  ;;  %v3143_v5 = vunpack.i.l.bf16 %v3142_v32 }
 0x2ed   : > { %2336 = vmatpush1.bf16.msra.mxu1 %v3269_v16 }
 0x2ee   : > { %2337 = vmatprep.subr.bf16.mxu1 %v3666_v12  ;;  %v2144_v12 = vsel %vm2140_vm4, %v2111_v40, %v3139_v29  ;;  %v2113_v36 = vsel %vm823_vm2, 0.0, %v3144_v56  ;;  %v2112_v47 = vsel %vm823_vm2, 0.0, %v3143_v5  ;;  %v5508_v29 = vmax.f32 %v4560_v7, 0.0 }
 0x2ef   : > { %v2175_v41 = vpack.c.bf16 %v2144_v12, %v2143_v62  ;;  %v5512_v62 = vld [vmem:[#allocation29_spill] sm:$0xff] }
 0x2f0   : > { %v5513_v12 = vmax.f32 %v5512_v62, 0.0 }
 0x2f1   : > { %2338 = vmatpush1.bf16.msra.mxu1 %v3270_v28  ;;  %v5509_v28 = vmax.f32 %v4542_v39, 0.0 }
 0x2f4   : > { %2354 = vmatmul.mubr.bf16.vlgmr.msra.gmra.mrb[0].mxu1 %v2173_v46 }
 0x2f5   : > { %2878 = vmatprep.mubr.msk.bf16.mxu1 %vm2281_vm3, %v2176_v22 }
 0x2f6   : > { %v3147_v63 = vpop.permute.xlu1 %3146 }
 0x2f7   : > { %v3149_v15 = vunpack.i.h.bf16 %v3147_v63  ;;  %v3148_v10 = vunpack.i.l.bf16 %v3147_v63 }
 0x2f9   : > { %v2178_v51 = vpack.c.bf16 %v3149_v15, %v3148_v10  ;;  %v2145_v26 = vsel %vm2140_vm4, %v2112_v47, %v3148_v10  ;;  %v2146_v24 = vsel %vm2140_vm4, %v2113_v36, %v3149_v15  ;;  %v5510_v15 = vld [vmem:[#allocation30_spill] sm:$0xff] }
 0x2fa   : > { %v2177_v0 = vpack.c.bf16 %v2146_v24, %v2145_v26  ;;  %v5511_v10 = vmax.f32 %v5510_v15, 0.0 }
 0x2fc   : > { %2362 = vmatmul.mubr.bf16.gmra.mrb[4].mxu1 %v2175_v41 }
 0x2fd   : > { %2879 = vmatprep.mubr.msk.bf16.mxu1 %vm2281_vm3, %v2178_v51 }
 0x300   : > { %v3152_v49 = vpop.permute.xlu0 %3151 }
 0x301   : > { %v3154_v57 = vunpack.i.h.bf16 %v3152_v49  ;;  %v3153_v34 = vunpack.i.l.bf16 %v3152_v49 }
 0x303   : > { %v2115_v20 = vsel %vm823_vm2, 0.0, %v3154_v57  ;;  %v2114_v1 = vsel %vm823_vm2, 0.0, %v3153_v34 }
 0x304   : > { %2370 = vmatmul.mubr.bf16.gmra.mrb[8].mxu1 %v2177_v0  ;;  %v3162_v13 = vpop.permute.xlu0 %3161 }
 0x305   : > { %v3164_v38 = vunpack.i.h.bf16 %v3162_v13  ;;  %v3163_v16 = vunpack.i.l.bf16 %v3162_v13 }
 0x307   : > { %v3157_v2 = vpop.permute.xlu1 %3156  ;;  %v2117_v18 = vsel %vm823_vm2, %v5508_v29, %v3164_v38  ;;  %v2116_v59 = vsel %vm823_vm2, %v5509_v28, %v3163_v16 }
 0x308   : > { %v3159_v17 = vunpack.i.h.bf16 %v3157_v2  ;;  %v3158_v58 = vunpack.i.l.bf16 %v3157_v2  ;;  %v3172_v4 = vpop.permute.xlu0 %3171 }
 0x309   : > { %v3174_v63 = vunpack.i.h.bf16 %v3172_v4  ;;  %v3173_v40 = vunpack.i.l.bf16 %v3172_v4 }
 0x30a   : > { %v2180_v37 = vpack.c.bf16 %v3159_v17, %v3158_v58  ;;  %v2147_v21 = vsel %vm2140_vm4, %v2114_v1, %v3158_v58  ;;  %v2148_v3 = vsel %vm2140_vm4, %v2115_v20, %v3159_v17 }
 0x30b   : > { %v2179_v6 = vpack.c.bf16 %v2148_v3, %v2147_v21  ;;  %v2119_v39 = vsel %vm823_vm2, %v5511_v10, %v3174_v63  ;;  %v2118_v56 = vsel %vm823_vm2, %v5513_v12, %v3173_v40 }
 0x30c   : > { %2880 = vmatprep.mubr.msk.bf16.mxu1 %vm2281_vm3, %v2180_v37  ;;  %v3182_v36 = vpop.permute.xlu0 %3181 }
 0x30d   : > { %2378 = vmatmul.mubr.bf16.gmra.mrb[12].mxu1 %v2179_v6  ;;  %v3184_v26 = vunpack.i.h.bf16 %v3182_v36  ;;  %v3183_v24 = vunpack.i.l.bf16 %v3182_v36  ;;  %v5522_v36 = vld [vmem:[#allocation33_spill] sm:$0xff] }
 0x30f   : > { %v2121_v2 = vsel %vm823_vm2, %v1877_v55, %v3184_v26  ;;  %v2120_v58 = vsel %vm823_vm2, %v1876_v53, %v3183_v24 }
 0x310   : > { %v3167_v42 = vpop.permute.xlu1 %3166 }
 0x311   : > { %v3169_v11 = vunpack.i.h.bf16 %v3167_v42  ;;  %v3168_v14 = vunpack.i.l.bf16 %v3167_v42  ;;  %v3192_v3 = vpop.permute.xlu0 %3191 }
 0x312   : > { %v3194_v13 = vunpack.i.h.bf16 %v3192_v3  ;;  %v3193_v6 = vunpack.i.l.bf16 %v3192_v3  ;;  %v5525_v3 = vmax.f32 %v4842_v27, 0.0  ;;  %v5526_v27 = vmax.f32 %v4916_v31, 0.0 }
 0x313   : > { %v2182_v61 = vpack.c.bf16 %v3169_v11, %v3168_v14  ;;  %v2149_v46 = vsel %vm2140_vm4, %v2116_v59, %v3168_v14  ;;  %v2150_v22 = vsel %vm2140_vm4, %v2117_v18, %v3169_v11  ;;  %v5528_v31 = vmax.f32 %v4956_v50, 0.0 }
 0x314   : > { %v2181_v52 = vpack.c.bf16 %v2150_v22, %v2149_v46  ;;  %v2123_v55 = vsel %vm823_vm2, %v1879_v43, %v3194_v13  ;;  %v2122_v53 = vsel %vm823_vm2, %v1878_v44, %v3193_v6  ;;  %v5516_v43 = vld [vmem:[#allocation32_spill] sm:$0xff]  ;;  %v5518_v44 = vld [vmem:[#allocation31_spill] sm:$0xff] }
 0x315   : > { %2881 = vmatprep.mubr.msk.bf16.mxu1 %vm2281_vm3, %v2182_v61  ;;  %v3202_v11 = vpop.permute.xlu0 %3201  ;;  %v5519_v4 = vmax.f32 %v5518_v44, 0.0 }
 0x316   : > { %2386 = vmatmul.mubr.bf16.gmra.mrb[16].mxu1 %v2181_v52  ;;  %v3204_v59 = vunpack.i.h.bf16 %v3202_v11  ;;  %v3203_v61 = vunpack.i.l.bf16 %v3202_v11  ;;  %v5517_v52 = vmax.f32 %v5516_v43, 0.0 }
 0x318   : > { %v2125_v60 = vsel %vm823_vm2, %v5517_v52, %v3204_v59  ;;  %v2124_v63 = vsel %vm823_vm2, %v5519_v4, %v3203_v61  ;;  %v5527_v59 = vmax.f32 %v4913_v30, 0.0  ;;  %v5529_v30 = vmax.f32 %v4938_v8, 0.0 }
 0x31a   : > { %v3177_v23 = vpop.permute.xlu1 %3176 }
 0x31b   : > { %v3179_v7 = vunpack.i.h.bf16 %v3177_v23  ;;  %v3178_v32 = vunpack.i.l.bf16 %v3177_v23  ;;  %v3212_v15 = vpop.permute.xlu0 %3211 }
 0x31c   : > { %v3214_v10 = vunpack.i.h.bf16 %v3212_v15 }
 0x31d   : > { %v2184_v5 = vpack.c.bf16 %v3179_v7, %v3178_v32  ;;  %v2151_v41 = vsel %vm2140_vm4, %v2118_v56, %v3178_v32  ;;  %v2152_v51 = vsel %vm2140_vm4, %v2119_v39, %v3179_v7  ;;  %v3213_v39 = vunpack.i.l.bf16 %v3212_v15 }
 0x31e   : > { %v2183_v47 = vpack.c.bf16 %v2152_v51, %v2151_v41 }
 0x31f   : > { %2882 = vmatprep.mubr.msk.bf16.mxu1 %vm2281_vm3, %v2184_v5  ;;  %v5520_v5 = vld [vmem:[#allocation34_spill] sm:$0xff] }
 0x320   : > { %2394 = vmatmul.mubr.bf16.gmra.mrb[20].mxu1 %v2183_v47  ;;  %v5521_v41 = vmax.f32 %v5520_v5, 0.0  ;;  %v5523_v47 = vmax.f32 %v5522_v36, 0.0 }
 0x322   : > { %v2127_v51 = vsel %vm823_vm2, %v5521_v41, %v3214_v10  ;;  %v2126_v26 = vsel %vm823_vm2, %v5523_v47, %v3213_v39 }
 0x324   : > { %v3187_v49 = vpop.permute.xlu1 %3186 }
 0x325   : > { %v3189_v0 = vunpack.i.h.bf16 %v3187_v49  ;;  %v3188_v57 = vunpack.i.l.bf16 %v3187_v49  ;;  %v3222_v34 = vpop.permute.xlu0 %3221 }
 0x326   : > { %v3223_v17 = vunpack.i.l.bf16 %v3222_v34 }
 0x327   : > { %v2186_v20 = vpack.c.bf16 %v3189_v0, %v3188_v57  ;;  %v2153_v1 = vsel %vm2140_vm4, %v2120_v58, %v3188_v57  ;;  %v2154_v37 = vsel %vm2140_vm4, %v2121_v2, %v3189_v0  ;;  %v3224_v2 = vunpack.i.h.bf16 %v3222_v34 }
 0x328   : > { %v2185_v21 = vpack.c.bf16 %v2154_v37, %v2153_v1  ;;  %v5524_v37 = vmax.f32 %v4849_v19, 0.0  ;;  %v2128_v13 = vsel %vm823_vm2, %v5525_v3, %v3223_v17  ;;  %v5281_v3 = vld [vmem:[#allocation15] ss:$0 sm:$0xff] }
 0x329   : > { %2883 = vmatprep.mubr.msk.bf16.mxu1 %vm2281_vm3, %v2186_v20 }
 0x32a   : > { %2402 = vmatmul.mubr.bf16.gmra.mrb[24].mxu1 %v2185_v21  ;;  %v2129_v21 = vsel %vm823_vm2, %v5524_v37, %v3224_v2 }
 0x32d   : > { %v3197_v38 = vpop.permute.xlu1 %3196 }
 0x32e   : > { %v3199_v16 = vunpack.i.h.bf16 %v3197_v38  ;;  %v3198_v42 = vunpack.i.l.bf16 %v3197_v38  ;;  %v3232_v38 = vpop.permute.xlu0 %3231 }
 0x32f   : > { %v3233_v11 = vunpack.i.l.bf16 %v3232_v38 }
 0x330   : > { %v2188_v14 = vpack.c.bf16 %v3199_v16, %v3198_v42  ;;  %v2155_v29 = vsel %vm2140_vm4, %v2122_v53, %v3198_v42  ;;  %v2156_v18 = vsel %vm2140_vm4, %v2123_v55, %v3199_v16  ;;  %v3234_v53 = vunpack.i.h.bf16 %v3232_v38 }
 0x331   : > { %v2187_v28 = vpack.c.bf16 %v2156_v18, %v2155_v29  ;;  %v2130_v61 = vsel %vm823_vm2, %v5527_v59, %v3233_v11 }
 0x332   : > { %2884 = vmatprep.mubr.msk.bf16.mxu1 %vm2281_vm3, %v2188_v14 }
 0x333   : > { %2410 = vmatmul.mubr.bf16.gmra.mrb[28].mxu1 %v2187_v28  ;;  %v2131_v28 = vsel %vm823_vm2, %v5526_v27, %v3234_v53 }
 0x335   : > { %v3207_v46 = vpop.permute.xlu1 %3206 }
 0x336   : > { %v3209_v48 = vunpack.i.h.bf16 %v3207_v46  ;;  %v3208_v22 = vunpack.i.l.bf16 %v3207_v46  ;;  %v3242_v19 = vpop.permute.xlu0 %3241 }
 0x338   : > { %v2190_v40 = vpack.c.bf16 %v3209_v48, %v3208_v22  ;;  %v2157_v23 = vsel %vm2140_vm4, %v2124_v63, %v3208_v22  ;;  %v2158_v7 = vsel %vm2140_vm4, %v2125_v60, %v3209_v48  ;;  %v3244_v48 = vunpack.i.h.bf16 %v3242_v19 }
 0x339   : > { %v2189_v32 = vpack.c.bf16 %v2158_v7, %v2157_v23  ;;  %v3243_v22 = vunpack.i.l.bf16 %v3242_v19 }
 0x33a   : > { %2885 = vmatprep.mubr.msk.bf16.mxu1 %vm2281_vm3, %v2190_v40  ;;  %v2133_v63 = vsel %vm823_vm2, %v5528_v31, %v3244_v48 }
 0x33b   : > { %2418 = vmatmul.mubr.bf16.gmra.mrb[32].mxu1 %v2189_v32  ;;  %v2132_v40 = vsel %vm823_vm2, %v5529_v30, %v3243_v22 }
 0x33f   : > { %v3217_v62 = vpop.permute.xlu1 %3216 }
 0x340   : > { %v3219_v12 = vunpack.i.h.bf16 %v3217_v62  ;;  %v3218_v56 = vunpack.i.l.bf16 %v3217_v62  ;;  %v3247_v23 = vpop.permute.xlu0 %3246  ;;  %v5530_v62 = vmax.f32 %v4991_v45, 0.0 }
 0x341   : > { %v3249_v15 = vunpack.i.h.bf16 %v3247_v23  ;;  %v3248_v10 = vunpack.i.l.bf16 %v3247_v23 }
 0x342   : > { %v2192_v24 = vpack.c.bf16 %v3219_v12, %v3218_v56  ;;  %v2159_v49 = vsel %vm2140_vm4, %v2126_v26, %v3218_v56  ;;  %v2160_v0 = vsel %vm2140_vm4, %v2127_v51, %v3219_v12  ;;  %v5531_v12 = vmax.f32 %v4988_v9, 0.0 }
 0x343   : > { %v2191_v57 = vpack.c.bf16 %v2160_v0, %v2159_v49  ;;  %v2135_v50 = vsel %vm823_vm2, %v5530_v62, %v3249_v15  ;;  %v5532_v26 = vmax.f32 %v5025_v54, 0.0 }
 0x344   : > { %2886 = vmatprep.mubr.msk.bf16.mxu1 %vm2281_vm3, %v2192_v24  ;;  %v2134_v8 = vsel %vm823_vm2, %v5531_v12, %v3248_v10  ;;  %v5533_v24 = vmax.f32 %v5022_v25, 0.0 }
 0x345   : > { %2426 = vmatmul.mubr.bf16.gmra.mrb[36].mxu1 %v2191_v57 }
 0x349   : > { %v3227_v58 = vpop.permute.xlu1 %3226 }
 0x34a   : > { %v3229_v20 = vunpack.i.h.bf16 %v3227_v58  ;;  %v3228_v1 = vunpack.i.l.bf16 %v3227_v58  ;;  %v5534_v58 = vmax.f32 %v5059_v33, 0.0 }
 0x34c   : > { %v2194_v6 = vpack.c.bf16 %v3229_v20, %v3228_v1  ;;  %v2161_v16 = vsel %vm2140_vm4, %v2128_v13, %v3228_v1  ;;  %v2162_v42 = vsel %vm2140_vm4, %v2129_v21, %v3229_v20  ;;  %v5535_v20 = vmax.f32 %v5056_v35, 0.0 }
 0x34d   : > { %v2193_v55 = vpack.c.bf16 %v2162_v42, %v2161_v16 }
 0x34e   : > { %2887 = vmatprep.mubr.msk.bf16.mxu1 %vm2281_vm3, %v2194_v6 }
 0x34f   : > { %2434 = vmatmul.mubr.bf16.gmra.mrb[40].mxu1 %v2193_v55 }
 0x352   : > { %v3237_v14 = vpop.permute.xlu1 %3236  ;;  %v3257_v49 = vpop.permute.xlu0 %3256 }
 0x353   : > { %v3239_v29 = vunpack.i.h.bf16 %v3237_v14  ;;  %v3238_v18 = vunpack.i.l.bf16 %v3237_v14  ;;  %v3259_v34 = vunpack.i.h.bf16 %v3257_v49  ;;  %v3258_v2 = vunpack.i.l.bf16 %v3257_v49 }
 0x355   : > { %v2196_v46 = vpack.c.bf16 %v3239_v29, %v3238_v18  ;;  %v2163_v43 = vsel %vm2140_vm4, %v2130_v61, %v3238_v18  ;;  %v2164_v60 = vsel %vm2140_vm4, %v2131_v28, %v3239_v29  ;;  %v2139_v54 = vsel %vm823_vm2, %v5534_v58, %v3259_v34  ;;  %v5289_v61 = vld [vmem:[#allocation17] sm:$0xf] }
 0x356   : > { %v2082_v52 = vpop.permute.xlu1 %2081  ;;  %v2195_v44 = vpack.c.bf16 %v2164_v60, %v2163_v43  ;;  %v2138_v25 = vsel %vm823_vm2, %v5535_v20, %v3258_v2  ;;  %2935 = vmatprep.mubr.msk.bf16.mxu0 %vm823_vm2, %v5289_v61 }
 0x357   : > { %2888 = vmatprep.mubr.msk.bf16.mxu1 %vm2281_vm3, %v2196_v46  ;;  %v2198_v4 = vpack.c.bf16 %v2082_v52, %v2082_v52  ;;  %v2165_v7 = vsel %vm2140_vm4, %v2132_v40, %v2082_v52  ;;  %v2166_v32 = vsel %vm2140_vm4, %v2133_v63, %v2082_v52  ;;  %v2167_v5 = vsel %vm2140_vm4, %v2134_v8, %v2082_v52  ;;  %v2531_v63 = vld [vmem:[#allocation18] sm:$0xff] }
 0x358   : > { %2442 = vmatmul.mubr.bf16.gmra.mrb[44].mxu1 %v2195_v44  ;;  %v2197_v39 = vpack.c.bf16 %v2166_v32, %v2165_v7  ;;  %v2168_v41 = vsel %vm2140_vm4, %v2135_v50, %v2082_v52  ;;  %v2171_v1 = vsel %vm2140_vm4, %v2138_v25, %v2082_v52  ;;  %v2172_v37 = vsel %vm2140_vm4, %v2139_v54, %v2082_v52 }
 0x359   : > { %2889 = vmatprep.mubr.msk.bf16.mxu1 %vm2281_vm3, %v2198_v4  ;;  %v2199_v47 = vpack.c.bf16 %v2168_v41, %v2167_v5  ;;  %v2201_v21 = vpack.c.bf16 %v2172_v37, %v2171_v1  ;;  %2534 = vperm.xlu1 %3260, %v2531_v63  }
 0x35a   : > { %v3252_v56 = vpop.permute.xlu1 %3251 }
 0x35b   : > { %v3254_v51 = vunpack.i.h.bf16 %v3252_v56  ;;  %v3253_v36 = vunpack.i.l.bf16 %v3252_v56 }
 0x35d   : > { %v2137_v45 = vsel %vm823_vm2, %v5532_v26, %v3254_v51  ;;  %v2136_v9 = vsel %vm823_vm2, %v5533_v24, %v3253_v36 }
 0x35e   : > { %v2169_v0 = vsel %vm2140_vm4, %v2136_v9, %v2082_v52  ;;  %v2170_v57 = vsel %vm2140_vm4, %v2137_v45, %v2082_v52 }
 0x35f   : > { %v2200_v17 = vpack.c.bf16 %v2170_v57, %v2169_v0 }
 0x360   : > { %2450 = vmatmul.mubr.bf16.gmra.mrb[48].mxu1 %v2197_v39 }
 0x361   : > { %2890 = vmatprep.mubr.msk.bf16.mxu1 %vm2281_vm3, %v2198_v4 }
 0x368   : > { %2458 = vmatmul.mubr.bf16.gmra.mrb[52].mxu1 %v2199_v47 }
 0x369   : > { %2891 = vmatprep.mubr.msk.bf16.mxu1 %vm2281_vm3, %v2198_v4 }
 0x370   : > { %2466 = vmatmul.mubr.bf16.gmra.mrb[56].mxu1 %v2200_v17 }
 0x371   : > { %2892 = vmatprep.mubr.msk.bf16.mxu1 %vm2281_vm3, %v2198_v4 }
 0x378   : > { %2474 = vmatmul.mubr.bf16.gmra.mrb[60].mxu1 %v2201_v21 }
 0x3c7   : > { %v2355_v13 = vpop.f32.mrb[0].mxu1 }
 0x3c8   : > { %v2356_v33 = vadd.f32 %v5281_v3, %v2355_v13  ;;  %v2357_v6 = vpop.f32.mrb[1].mxu1 }
 0x3c9   : > { %v2358_v38 = vpop.f32.mrb[2].mxu1 }
 0x3ca   : > { %v2359_v35 = vadd.f32 %v5281_v3, %v2358_v38  ;;  %v2360_v16 = vpop.f32.mrb[3].mxu1  ;;  %v2482_v42 = vmax.f32 %v2356_v33, 0.0 }
 0x3cc   : > { %v2483_v55 = vmax.f32 %v2359_v35, 0.0 }
 0x3ce   : > { %v5285_v53 = vpack.c.bf16 %v2483_v55, %v2482_v42 }
 0x3cf   : > { %v2363_v11 = vpop.f32.mrb[4].mxu1 }
 0x3d0   : > { %v2364_v14 = vadd.f32 %v5281_v3, %v2363_v11  ;;  %v2365_v19 = vpop.f32.mrb[5].mxu1 }
 0x3d1   : > { %v2366_v29 = vpop.f32.mrb[6].mxu1 }
 0x3d2   : > { %v2367_v18 = vadd.f32 %v5281_v3, %v2366_v29  ;;  %v2368_v27 = vpop.f32.mrb[7].mxu1  ;;  %v2484_v28 = vmax.f32 %v2364_v14, 0.0 }
 0x3d4   : > { %v2485_v59 = vmax.f32 %v2367_v18, 0.0 }
 0x3d6   : > { %v5291_v46 = vpack.c.bf16 %v2485_v59, %v2484_v28 }
 0x3d7   : > { %v2371_v48 = vpop.f32.mrb[8].mxu1 }
 0x3d8   : > { %v2372_v22 = vadd.f32 %v5281_v3, %v2371_v48  ;;  %v2373_v43 = vpop.f32.mrb[9].mxu1 }
 0x3d9   : > { %v2374_v52 = vpop.f32.mrb[10].mxu1 }
 0x3da   : > { %v2375_v60 = vadd.f32 %v5281_v3, %v2374_v52  ;;  %v2376_v44 = vpop.f32.mrb[11].mxu1  ;;  %v2486_v4 = vmax.f32 %v2372_v22, 0.0 }
 0x3dc   : > { %v2487_v31 = vmax.f32 %v2375_v60, 0.0  ;;  %v2541_v60 = vsel %vm823_vm2, %v5285_v53, 0 }
 0x3de   : > { %v5297_v30 = vpack.c.bf16 %v2487_v31, %v2486_v4 }
 0x3e0   : > { %v2379_v40 = vpop.f32.mrb[12].mxu1 }
 0x3e1   : > { %v2380_v23 = vadd.f32 %v5281_v3, %v2379_v40  ;;  %v2381_v7 = vpop.f32.mrb[13].mxu1 }
 0x3e2   : > { %v2382_v32 = vpop.f32.mrb[14].mxu1 }
 0x3e3   : > { %v2383_v15 = vadd.f32 %v5281_v3, %v2382_v32  ;;  %v2384_v10 = vpop.f32.mrb[15].mxu1  ;;  %v2488_v39 = vmax.f32 %v2380_v23, 0.0 }
 0x3e4   : > { %v2544_v10 = vsel %vm823_vm2, %v5291_v46, 0 }
 0x3e5   : > { %v2489_v62 = vmax.f32 %v2383_v15, 0.0 }
 0x3e7   : > { %v5301_v50 = vpack.c.bf16 %v2489_v62, %v2488_v39 }
 0x3e9   : > { %v2387_v12 = vpop.f32.mrb[16].mxu1 }
 0x3ea   : > { %v2388_v8 = vadd.f32 %v5281_v3, %v2387_v12  ;;  %v2389_v56 = vpop.f32.mrb[17].mxu1 }
 0x3eb   : > { %v2390_v5 = vpop.f32.mrb[18].mxu1 }
 0x3ec   : > { %v2391_v41 = vadd.f32 %v5281_v3, %v2390_v5  ;;  %v2392_v51 = vpop.f32.mrb[19].mxu1  ;;  %v2490_v36 = vmax.f32 %v2388_v8, 0.0 }
 0x3ee   : > { %v2491_v47 = vmax.f32 %v2391_v41, 0.0 }
 0x3f0   : > { %v5305_v26 = vpack.c.bf16 %v2491_v47, %v2490_v36  ;;  %v2547_v36 = vsel %vm823_vm2, %v5297_v30, 0  ;;  %v2550_v30 = vsel %vm823_vm2, %v5301_v50, 0 }
 0x3f3   : > { %v2395_v45 = vpop.f32.mrb[20].mxu1 }
 0x3f4   : > { %v2396_v24 = vadd.f32 %v5281_v3, %v2395_v45  ;;  %v2397_v9 = vpop.f32.mrb[21].mxu1 }
 0x3f5   : > { %v2398_v49 = vpop.f32.mrb[22].mxu1 }
 0x3f6   : > { %v2399_v0 = vadd.f32 %v5281_v3, %v2398_v49  ;;  %v2400_v57 = vpop.f32.mrb[23].mxu1  ;;  %v2492_v34 = vmax.f32 %v2396_v24, 0.0 }
 0x3f8   : > { %v2493_v2 = vmax.f32 %v2399_v0, 0.0 }
 0x3fa   : > { %v5309_v17 = vpack.c.bf16 %v2493_v2, %v2492_v34 }
 0x3fd   : > { %v2403_v58 = vpop.f32.mrb[24].mxu1 }
 0x3fe   : > { %v2404_v54 = vadd.f32 %v5281_v3, %v2403_v58  ;;  %v2405_v20 = vpop.f32.mrb[25].mxu1 }
 0x3ff   : > { %v2406_v25 = vpop.f32.mrb[26].mxu1 }
 0x400   : > { %v2407_v1 = vadd.f32 %v5281_v3, %v2406_v25  ;;  %v2408_v37 = vpop.f32.mrb[27].mxu1  ;;  %v2494_v21 = vmax.f32 %v2404_v54, 0.0 }
 0x402   : > { %v2495_v13 = vmax.f32 %v2407_v1, 0.0 }
 0x404   : > { %v5313_v33 = vpack.c.bf16 %v2495_v13, %v2494_v21 }
 0x406   : > { %v2411_v6 = vpop.f32.mrb[28].mxu1 }
 0x407   : > { %v2412_v38 = vadd.f32 %v5281_v3, %v2411_v6  ;;  %v2413_v35 = vpop.f32.mrb[29].mxu1 }
 0x408   : > { %v2414_v16 = vpop.f32.mrb[30].mxu1 }
 0x409   : > { %v2415_v42 = vadd.f32 %v5281_v3, %v2414_v16  ;;  %v2416_v55 = vpop.f32.mrb[31].mxu1  ;;  %v2496_v11 = vmax.f32 %v2412_v38, 0.0  ;;  %v2553_v16 = vsel %vm823_vm2, %v5305_v26, 0 }
 0x40b   : > { %v2497_v14 = vmax.f32 %v2415_v42, 0.0 }
 0x40d   : > { %v5317_v19 = vpack.c.bf16 %v2497_v14, %v2496_v11 }
 0x40e   : > { %v2419_v29 = vpop.f32.mrb[32].mxu1 }
 0x40f   : > { %v2420_v18 = vadd.f32 %v5281_v3, %v2419_v29  ;;  %v2421_v27 = vpop.f32.mrb[33].mxu1 }
 0x410   : > { %v2422_v28 = vpop.f32.mrb[34].mxu1 }
 0x411   : > { %v2423_v59 = vadd.f32 %v5281_v3, %v2422_v28  ;;  %v2424_v48 = vpop.f32.mrb[35].mxu1  ;;  %v2498_v22 = vmax.f32 %v2420_v18, 0.0 }
 0x413   : > { %v2499_v43 = vmax.f32 %v2423_v59, 0.0  ;;  %v2556_v59 = vsel %vm823_vm2, %v5309_v17, 0 }
 0x415   : > { %v2523_v52 = vpack.c.bf16 %v2499_v43, %v2498_v22 }
 0x417   : > { %2972 = vmatprep.subr.msk.bf16.mxu0 %vm823_vm2, %v2523_v52 }
 0x418   : > { %v2427_v44 = vpop.f32.mrb[36].mxu1  ;;  %2920 = vmatpush3.bf16.xpose.msra.mxu0 %v2541_v60 }
 0x419   : > { %v2428_v4 = vadd.f32 %v5281_v3, %v2427_v44  ;;  %v2429_v31 = vpop.f32.mrb[37].mxu1 }
 0x41a   : > { %v2430_v63 = vpop.f32.mrb[38].mxu1 }
 0x41b   : > { %v2431_v40 = vadd.f32 %v5281_v3, %v2430_v63  ;;  %v2432_v23 = vpop.f32.mrb[39].mxu1  ;;  %v2500_v7 = vmax.f32 %v2428_v4, 0.0  ;;  %v2559_v63 = vsel %vm823_vm2, %v5313_v33, 0  ;;  %v2535_v33 = vpop.permute.xlu1 %2534 }
 0x41d   : > { %v2501_v32 = vmax.f32 %v2431_v40, 0.0 }
 0x41f   : > { %v2524_v15 = vpack.c.bf16 %v2501_v32, %v2500_v7 }
 0x421   : > { %2973 = vmatprep.subr.msk.bf16.mxu0 %vm823_vm2, %v2524_v15 }
 0x422   : > { %v2435_v39 = vpop.f32.mrb[40].mxu1  ;;  %2922 = vmatpush3.bf16.xpose.msra.mxu0 %v2544_v10  ;;  %v2562_v10 = vsel %vm823_vm2, %v5317_v19, 0 }
 0x423   : > { %v2436_v53 = vadd.f32 %v5281_v3, %v2435_v39  ;;  %v2437_v62 = vpop.f32.mrb[41].mxu1 }
 0x424   : > { %v2438_v12 = vpop.f32.mrb[42].mxu1 }
 0x425   : > { %v2439_v8 = vadd.f32 %v5281_v3, %v2438_v12  ;;  %v2440_v56 = vpop.f32.mrb[43].mxu1  ;;  %v2502_v5 = vmax.f32 %v2436_v53, 0.0  ;;  %v2629_v53 = vld [vmem:[%s4080_s29] sm:$0xff]  ;;  %v2630_v12 = vld [vmem:[%s4080_s29 + $0x8] sm:$0xff] }
 0x427   : > { %v2503_v41 = vmax.f32 %v2439_v8, 0.0 }
 0x429   : > { %v2525_v51 = vpack.c.bf16 %v2503_v41, %v2502_v5 }
 0x42b   : > { %2974 = vmatprep.subr.msk.bf16.mxu0 %vm823_vm2, %v2525_v51  ;;  %v2443_v47 = vpop.f32.mrb[44].mxu1 }
 0x42c   : > { %2924 = vmatpush3.bf16.xpose.msra.mxu0 %v2547_v36  ;;  %v2444_v46 = vadd.f32 %v5281_v3, %v2443_v47  ;;  %v2445_v45 = vpop.f32.mrb[45].mxu1 }
 0x42d   : > { %v2446_v24 = vpop.f32.mrb[46].mxu1 }
 0x42e   : > { %v2447_v9 = vadd.f32 %v5281_v3, %v2446_v24  ;;  %v2448_v49 = vpop.f32.mrb[47].mxu1  ;;  %v2504_v0 = vmax.f32 %v2444_v46, 0.0 }
 0x430   : > { %v2505_v57 = vmax.f32 %v2447_v9, 0.0 }
 0x432   : > { %v2526_v34 = vpack.c.bf16 %v2505_v57, %v2504_v0 }
 0x433   : > { %v2451_v2 = vpop.f32.mrb[48].mxu1 }
 0x434   : > { %v2452_v58 = vadd.f32 %v5281_v3, %v2451_v2  ;;  %v2453_v54 = vpop.f32.mrb[49].mxu1  ;;  %2975 = vmatprep.subr.msk.bf16.mxu0 %vm823_vm2, %v2526_v34 }
 0x435   : > { %v2454_v20 = vpop.f32.mrb[50].mxu1  ;;  %2926 = vmatpush3.bf16.xpose.msra.mxu0 %v2550_v30 }
 0x436   : > { %v2455_v25 = vadd.f32 %v5281_v3, %v2454_v20  ;;  %v2456_v1 = vpop.f32.mrb[51].mxu1  ;;  %v2506_v37 = vmax.f32 %v2452_v58, 0.0 }
 0x438   : > { %v2507_v21 = vmax.f32 %v2455_v25, 0.0 }
 0x43a   : > { %v2527_v13 = vpack.c.bf16 %v2507_v21, %v2506_v37 }
 0x43b   : > { %v2459_v6 = vpop.f32.mrb[52].mxu1 }
 0x43c   : > { %v2460_v38 = vadd.f32 %v5281_v3, %v2459_v6  ;;  %v2461_v35 = vpop.f32.mrb[53].mxu1  ;;  %2976 = vmatprep.subr.msk.bf16.mxu0 %vm823_vm2, %v2527_v13 }
 0x43d   : > { %v2462_v42 = vpop.f32.mrb[54].mxu1  ;;  %2928 = vmatpush3.bf16.xpose.msra.mxu0 %v2553_v16 }
 0x43e   : > { %v2463_v50 = vadd.f32 %v5281_v3, %v2462_v42  ;;  %v2464_v55 = vpop.f32.mrb[55].mxu1  ;;  %v2508_v11 = vmax.f32 %v2460_v38, 0.0 }
 0x440   : > { %v2509_v14 = vmax.f32 %v2463_v50, 0.0 }
 0x442   : > { %v2528_v29 = vpack.c.bf16 %v2509_v14, %v2508_v11 }
 0x443   : > { %v2467_v18 = vpop.f32.mrb[56].mxu1 }
 0x444   : > { %v2468_v27 = vadd.f32 %v5281_v3, %v2467_v18  ;;  %v2469_v28 = vpop.f32.mrb[57].mxu1  ;;  %2977 = vmatprep.subr.msk.bf16.mxu0 %vm823_vm2, %v2528_v29 }
 0x445   : > { %v2470_v48 = vpop.f32.mrb[58].mxu1  ;;  %2930 = vmatpush3.bf16.xpose.msra.mxu0 %v2556_v59 }
 0x446   : > { %v2471_v26 = vadd.f32 %v5281_v3, %v2470_v48  ;;  %v2472_v22 = vpop.f32.mrb[59].mxu1  ;;  %v2510_v43 = vmax.f32 %v2468_v27, 0.0 }
 0x448   : > { %v2511_v52 = vmax.f32 %v2471_v26, 0.0 }
 0x44a   : > { %v2529_v60 = vpack.c.bf16 %v2511_v52, %v2510_v43 }
 0x44b   : > { %v2475_v44 = vpop.f32.mrb[60].mxu1 }
 0x44c   : > { %v2476_v4 = vadd.f32 %v5281_v3, %v2475_v44  ;;  %v2477_v31 = vpop.f32.mrb[61].mxu1  ;;  %2978 = vmatprep.subr.msk.bf16.mxu0 %vm823_vm2, %v2529_v60 }
 0x44d   : > { %v2478_v40 = vpop.f32.mrb[62].mxu1  ;;  %2932 = vmatpush3.bf16.xpose.msra.mxu0 %v2559_v63 }
 0x44e   : > { %v2479_v17 = vadd.f32 %v5281_v3, %v2478_v40  ;;  %v2480_v23 = vpop.f32.mrb[63].mxu1  ;;  %v2512_v7 = vmax.f32 %v2476_v4, 0.0 }
 0x450   : > { %v2513_v32 = vmax.f32 %v2479_v17, 0.0 }
 0x452   : > { %v2530_v15 = vpack.c.bf16 %v2513_v32, %v2512_v7 }
 0x454   : > { %2979 = vmatprep.subr.msk.bf16.mxu0 %vm823_vm2, %v2530_v15 }
 0x455   : > { %2934 = vmatpush3.bf16.xpose.msra.mxu0 %v2562_v10 }
 0x45c   : > { %2936 = vmatmul.mubr.msk.bf16.vlgmr.msra.gmra.mrb[32].mxu0 %vm823_vm2, %v5289_v61 }
 0x52f   : > { %v2622_v39 = vpop.f32.mrb[32].mxu0 }
 0x530   : > { %v2623_v62 = vadd.f32 %v2622_v39, %v2535_v33  ;;  %v2624_v3 = vpop.f32.mrb[33].mxu0 }
 0x531   : > { %v2625_v8 = vadd.f32 %v2624_v3, %v2535_v33  ;;  %v2626_v56 = vpop.f32.mrb[34].mxu0 }
 0x532   : > { %v2631_v5 = vadd.f32 %v2629_v53, %v2623_v62  ;;  %v2627_v19 = vpop.f32.mrb[35].mxu0 }
 0x533   : > { %v2632_v41 = vadd.f32 %v2630_v12, %v2625_v8 }
 0x534   : > { %2633 = vst [vmem:[%s519_s25] sm:$0xff] %v2631_v5 }
 0x535   : > { %2634 = vst [vmem:[%s519_s25 + $0x8] sm:$0xff] %v2632_v41 }
 0x536   : > { %3570 = shalt.err (!%p3567_p12)
}
 0x537   : > { %s3571_s7 = scalar_lea.hbm %s5369_s5, 256  ;;  %s3575_s6 = scalar_lea.hbm %s5536_s3, 512 }
 0x538   : > { %p3572_p13 = scmp.ne.s32.totalorder %s5369_s5, %s3571_s7  ;;  %p3576_p2 = scmp.lt.u32.totalorder %s5369_s5, %s5536_s3 }
 0x539   : > { %p3577_p10 = scmp.lt.u32.totalorder %s3575_s6, %s3571_s7  ;;  %p3579_p5 = scmp.lt.u32.totalorder %s3571_s7, %s5369_s5 }
 0x53a   : > { %p3573_p1 = pnand %p3572_p13, %p5537_p7 }
 0x53b   : > { %p3578_p4 = por %p3577_p10, %p3576_p2 }
 0x53c   : > { %p3574_p3 = pneg %p3573_p1 }
 0x53d   : > { %p3580_p0 = por %p3579_p5, %p3578_p4 }
 0x53f   : > { %p3581_p6 = pnand %p3580_p0, %p3574_p3 }
 0x541   : > { %3584 = shalt.err (!%p3581_p6)
}
 0x542   : > { %3016 = dma.vmem_to_hbm [thread:$0]  (%p5537_p7), %s5371_s11, 256, %s5369_s5, %s2636_s19  }
 0x543 PF: > { %s2662_s22 = sand.u32 1, %s3635_s13   ;;  %p5538_p11 = scmp.ne.s32.totalorder %s5481_s18, 0 }
 0x544   : > { %p5539_p8 = scmp.ge.s32.totalorder %s3647_s16, 2  ;;  %s2663_s26 = scalar_lea.sflag [#allocation5], %s2662_s22 }
 0x546   : > { %p3051_p9 = pnand %p5539_p8, %p5538_p11 }
 0x548   : > { %3630 = dma.done.wait (!%p3051_p9), %s2663_s26, 256  }
 0x549   : > { %3632 = vsyncadd (!%p3051_p9), %s2663_s26, 4294967040  ;;  %p30_p12 = scmp.ge.s32.totalorder %s3950_s17, 4   ;;  %s5540_s13 = smov %s3639_s14 }
 0x54a   : > { %s5541_s14 = smov %s3643_s15  ;;  %s5542_s15 = smov %s3961_s10 }
 0x54b   : > { %s5543_s16 = smov %s3950_s17  ;;  %32 = sbr.rel (!%p30_p12) target bundleno = 20 (0x14), region = 153 }
 0x552   :  { %2668 = vsyncpa [#allocation4], 1 }
 0x553   :  { %2670 = vsyncpa [#allocation4 + $0x1], 1 }
 0x554   :  { %2671 = vsyncpa [#allocation7], 1 }
 0x555   :  { %2673 = vsyncpa [#allocation7 + $0x1], 1 }
 0x556   :  { %2674 = vsyncpa [#allocation10], 1 }
 0x557   :  { %2675 = vsyncpa [#allocation13], 1 }
 0x558   :  { %2676 = vsyncpa [#allocation16], 1 }
 0x559   :  { %2677 = vsyncpa [#allocation19], 1 }
 0x55a   :  { %2678 = vsyncpa [#allocation5], 1 }
 0x55b   :  { %2680 = vsyncpa [#allocation5 + $0x1], 1 }

</bundles_post_ra>
